<compile_context>
chip_gen: v7x
topology: tpu7x:2x2x1
jax: 0.10.0
libtpu: 0.0.40
codegen_flags: <defaults>
</compile_context>

<pallas_src>
import jax
import jax.numpy as jnp
from jax.experimental import pallas as pl
from jax.experimental.pallas import tpu as pltpu


def fused_kernel(x_ref, wa_ref, ba_ref, wd_ref, bd_ref, o_ref):
    # x_ref : (bn, C, K)  bf16   activations (bn slabs per grid step)
    # wa_ref: (K, F)      bf16   Linear weight, pre-transposed
    # ba_ref: (1, F)      f32
    # wd_ref: (C, C)      bf16   1x1-conv weight, pre-squeezed
    # bd_ref: (C, 1)      f32
    # o_ref : (bn, C, F)  f32
    bn, C, K = x_ref.shape
    F = wa_ref.shape[1]

    # ---- Linear(1280 -> 8): process all bn*C rows in one MXU matmul (bf16 in, f32 acc).
    x = x_ref[...].reshape(bn * C, K)            # layout-preserving merge of leading dims
    h = jnp.dot(x, wa_ref[...], preferred_element_type=jnp.float32) + ba_ref[...]
    # torch.mul(v, 1.0) is a mathematical no-op -> folded away.

    # ---- sigmoid: exp + approximate reciprocal both run on the (otherwise idle) EUP.
    h = pl.reciprocal(1.0 + jnp.exp(-h), approx=True)

    hb = h.astype(jnp.bfloat16)                  # (bn*C, F) operand for the channel matmul
    wd = wd_ref[...]
    bd = bd_ref[...]

    # ---- per-slab 1x1 conv (channel matmul) + relu + softmax tail.
    # leaky_relu after relu is a mathematical no-op -> folded away.
    for i in range(bn):                          # static unroll, bn is small
        hi = hb[i * C:(i + 1) * C]               # (C, F), sublane-aligned static slice
        u = jnp.dot(wd, hi, preferred_element_type=jnp.float32) + bd
        u = jnp.maximum(u, 0.0)
        m = jnp.max(u, axis=-1, keepdims=True)
        e = jnp.exp(u - m)
        o_ref[i] = e * pl.reciprocal(jnp.sum(e, axis=-1, keepdims=True), approx=True)


def _pick_block_n(n, max_bn=4):
    for bn in range(min(n, max_bn), 0, -1):
        if n % bn == 0:
            return bn
    return 1


def pack_params(wa, ba, wd, bd):
    """One-time (off the hot path) re-layout of the PyTorch-style parameters."""
    C = wd.shape[0]
    return dict(
        wa_t=jnp.asarray(wa.T, jnp.bfloat16),                 # (1280, 8)
        ba=jnp.asarray(ba.reshape(1, -1), jnp.float32),       # (1, 8)
        wd=jnp.asarray(wd.reshape(C, C), jnp.bfloat16),       # (64, 64)
        bd=jnp.asarray(bd.reshape(C, 1), jnp.float32),        # (64, 1)
    )


def model_forward(x, params, block_n=None):
    """x: (N, 64, 1, 1280) NCHW.  Any float dtype; bf16 input avoids a per-call cast."""
    N, C, H, K = x.shape
    wa_t, ba2, wd2, bd2 = params["wa_t"], params["ba"], params["wd"], params["bd"]
    assert H == 1 and C == wd2.shape[0] and K == wa_t.shape[0]
    F = wa_t.shape[1]

    bn = _pick_block_n(N) if block_n is None else block_n
    assert N % bn == 0

    x3 = x.reshape(N, C, K)                      # free metadata reshape (H == 1)
    if x3.dtype != jnp.bfloat16:
        x3 = x3.astype(jnp.bfloat16)             # ideally the producer already stores bf16

    out = pl.pallas_call(
        fused_kernel,
        out_shape=jax.ShapeDtypeStruct((N, C, F), jnp.float32),
        grid=(N // bn,),
        in_specs=[
            pl.BlockSpec((bn, C, K), lambda n: (n, 0, 0)),   # activations: one block per step
            pl.BlockSpec((K, F), lambda n: (0, 0)),          # weights revisited -> no re-DMA
            pl.BlockSpec((1, F), lambda n: (0, 0)),
            pl.BlockSpec((C, C), lambda n: (0, 0)),
            pl.BlockSpec((C, 1), lambda n: (0, 0)),
        ],
        out_specs=pl.BlockSpec((bn, C, F), lambda n: (n, 0, 0)),
        compiler_params=pltpu.CompilerParams(
            dimension_semantics=("parallel",)),              # batch axis is independent
    )(x3, wa_t, ba2, wd2, bd2)

    return out.reshape(N, C, H, F)               # (N, 64, 1, 8), NCHW like PyTorch


def init_params(key):
    """PyTorch-style initialization (uniform +-1/sqrt(fan_in)) in f32."""
    k1, k2, k3, k4 = jax.random.split(key, 4)
    bound_a = 1.0 / jnp.sqrt(1280.0)
    wa = jax.random.uniform(k1, (8, 1280), jnp.float32, -bound_a, bound_a)
    ba = jax.random.uniform(k2, (8,), jnp.float32, -bound_a, bound_a)
    bound_d = 1.0 / jnp.sqrt(64.0)
    wd = jax.random.uniform(k3, (64, 64, 1, 1), jnp.float32, -bound_d, bound_d)
    bd = jax.random.uniform(k4, (64,), jnp.float32, -bound_d, bound_d)
    return wa, ba, wd, bd


def reference_forward(x, wa, ba, wd, bd):
    """Pure-JAX f32 reference matching the PyTorch module exactly."""
    C = wd.shape[0]
    v = jnp.matmul(x, wa.T) + ba                                       # Linear over last dim
    v = v * 1.0
    v = jax.nn.sigmoid(v)
    v = jnp.einsum("dc,nchf->ndhf", wd.reshape(C, C), v) + bd.reshape(1, C, 1, 1)
    v = jnp.maximum(v, 0.0)
    v = jnp.where(v >= 0.0, v, 0.01 * v)
    return jax.nn.softmax(v, axis=-1)


if __name__ == "__main__":
    key = jax.random.PRNGKey(0)
    kx, kp = jax.random.split(key)

    # Shapes forced by the module: C=64 channels, K=1280 features; small batch to exercise
    # the grid (block_n=4 -> grid=(2,) so both v7x TensorCores can participate).
    N, C, H, K = 8, 64, 1, 1280
    x = jax.random.normal(kx, (N, C, H, K), jnp.float32)
    wa, ba, wd, bd = init_params(kp)
    params = pack_params(wa, ba, wd, bd)

    # Activations stored in bf16 once at creation -> halves the kernel's dominant DMA.
    x_dev = x.astype(jnp.bfloat16)

    out = model_forward(x_dev, params, block_n=4)
    out = jax.block_until_ready(out)

    # sanity: shape, softmax rows ~ sum to 1 (approx reciprocal), matches f32 reference
    assert out.shape == (N, C, H, 8)
    assert jnp.allclose(jnp.sum(out, axis=-1), 1.0, atol=2e-2)
    ref = reference_forward(x, wa, ba, wd, bd)
    assert float(jnp.max(jnp.abs(out - ref))) < 3e-2
    print("KERNEL_OK")
</pallas_src>

<mosaic_0001>
module attributes {stable_mosaic.version = 11 : i64} {
  func.func @fused_kernel(%arg0: i32, %arg1: memref<4x64x1280xbf16, #tpu.memory_space<vmem>>, %arg2: memref<1280x8xbf16, #tpu.memory_space<vmem>>, %arg3: memref<1x8xf32, #tpu.memory_space<vmem>>, %arg4: memref<64x64xbf16, #tpu.memory_space<vmem>>, %arg5: memref<64x1xf32, #tpu.memory_space<vmem>>, %arg6: memref<4x64x8xf32, #tpu.memory_space<vmem>>) attributes {dimension_semantics = [#tpu.dimension_semantics<parallel>], iteration_bounds = array<i64: 2>, scalar_prefetch = 0 : i64, scratch_operands = 0 : i64, tpu.core_type = #tpu.core_type<tc>, window_params = [{transform_indices = @transform_0, window_bounds = array<i64: 4, 64, 1280>}, {pipeline_mode = #tpu.pipeline_mode<synchronous>, transform_indices = @transform_1, window_bounds = array<i64: 1280, 8>}, {pipeline_mode = #tpu.pipeline_mode<synchronous>, transform_indices = @transform_2, window_bounds = array<i64: 1, 8>}, {pipeline_mode = #tpu.pipeline_mode<synchronous>, transform_indices = @transform_3, window_bounds = array<i64: 64, 64>}, {pipeline_mode = #tpu.pipeline_mode<synchronous>, transform_indices = @transform_4, window_bounds = array<i64: 64, 1>}, {transform_indices = @transform_5, window_bounds = array<i64: 4, 64, 8>}]} {
    %c0 = arith.constant 0 : index
    %c0_0 = arith.constant 0 : index
    %c0_1 = arith.constant 0 : index
    %0 = vector.load %arg1[%c0, %c0_0, %c0_1] : memref<4x64x1280xbf16, #tpu.memory_space<vmem>>, vector<4x64x1280xbf16>
    %1 = vector.shape_cast %0 : vector<4x64x1280xbf16> to vector<256x1280xbf16>
    %c0_2 = arith.constant 0 : index
    %c0_3 = arith.constant 0 : index
    %2 = vector.load %arg2[%c0_2, %c0_3] : memref<1280x8xbf16, #tpu.memory_space<vmem>>, vector<1280x8xbf16>
    %cst = arith.constant dense<0.000000e+00> : vector<256x8xf32>
    %3 = tpu.matmul %1, %2, %cst {dimension_numbers = #tpu.dot_dimension_numbers<[1], [0], [0], [1], [0, 0, 1, 1], [], []>} : vector<256x1280xbf16>, vector<1280x8xbf16>, vector<256x8xf32> -> vector<256x8xf32>
    %c0_4 = arith.constant 0 : index
    %c0_5 = arith.constant 0 : index
    %4 = vector.load %arg3[%c0_4, %c0_5] : memref<1x8xf32, #tpu.memory_space<vmem>>, vector<1x8xf32>
    %5 = vector.broadcast %4 : vector<1x8xf32> to vector<256x8xf32>
    %6 = arith.addf %3, %5 : vector<256x8xf32>
    %cst_6 = arith.constant 0.000000e+00 : f32
    %7 = vector.broadcast %cst_6 : f32 to vector<256x8xf32>
    %8 = arith.subf %7, %6 : vector<256x8xf32>
    %9 = math.exp %8 : vector<256x8xf32>
    %cst_7 = arith.constant 1.000000e+00 : f32
    %10 = vector.broadcast %cst_7 : f32 to vector<256x8xf32>
    %11 = arith.addf %10, %9 : vector<256x8xf32>
    %12 = tpu.reciprocal %11 {approx = true} : vector<256x8xf32> -> vector<256x8xf32>
    %13 = arith.truncf %12 : vector<256x8xf32> to vector<256x8xbf16>
    %c0_8 = arith.constant 0 : index
    %c0_9 = arith.constant 0 : index
    %14 = vector.load %arg4[%c0_8, %c0_9] : memref<64x64xbf16, #tpu.memory_space<vmem>>, vector<64x64xbf16>
    %c0_10 = arith.constant 0 : index
    %c0_11 = arith.constant 0 : index
    %15 = vector.load %arg5[%c0_10, %c0_11] : memref<64x1xf32, #tpu.memory_space<vmem>>, vector<64x1xf32>
    %16 = vector.extract_strided_slice %13 {offsets = [0, 0], sizes = [64, 8], strides = [1, 1]} : vector<256x8xbf16> to vector<64x8xbf16>
    %cst_12 = arith.constant dense<0.000000e+00> : vector<64x8xf32>
    %17 = tpu.matmul %14, %16, %cst_12 {dimension_numbers = #tpu.dot_dimension_numbers<[1], [0], [0], [1], [0, 0, 1, 1], [], []>} : vector<64x64xbf16>, vector<64x8xbf16>, vector<64x8xf32> -> vector<64x8xf32>
    %18 = vector.broadcast %15 : vector<64x1xf32> to vector<64x8xf32>
    %19 = arith.addf %17, %18 : vector<64x8xf32>
    %cst_13 = arith.constant 0.000000e+00 : f32
    %20 = vector.broadcast %cst_13 : f32 to vector<64x8xf32>
    %21 = arith.maximumf %19, %20 : vector<64x8xf32>
    %cst_14 = arith.constant dense<0xFF800000> : vector<64xf32>
    %22 = vector.multi_reduction <maximumf>, %21, %cst_14 [1] : vector<64x8xf32> to vector<64xf32>
    %23 = vector.shape_cast %22 : vector<64xf32> to vector<64x1xf32>
    %24 = vector.broadcast %23 : vector<64x1xf32> to vector<64x8xf32>
    %25 = arith.subf %21, %24 : vector<64x8xf32>
    %26 = math.exp %25 : vector<64x8xf32>
    %cst_15 = arith.constant dense<0.000000e+00> : vector<64xf32>
    %27 = vector.multi_reduction <add>, %26, %cst_15 [1] : vector<64x8xf32> to vector<64xf32>
    %28 = vector.shape_cast %27 : vector<64xf32> to vector<64x1xf32>
    %29 = tpu.reciprocal %28 {approx = true} : vector<64x1xf32> -> vector<64x1xf32>
    %30 = vector.broadcast %29 : vector<64x1xf32> to vector<64x8xf32>
    %31 = arith.mulf %26, %30 : vector<64x8xf32>
    %c0_16 = arith.constant 0 : index
    %c0_17 = arith.constant 0 : index
    %c0_18 = arith.constant 0 : index
    %32 = vector.load %arg6[%c0_16, %c0_17, %c0_18] : memref<4x64x8xf32, #tpu.memory_space<vmem>>, vector<1x64x8xf32>
    %33 = vector.shape_cast %32 : vector<1x64x8xf32> to vector<64x8xf32>
    %34 = vector.shape_cast %31 : vector<64x8xf32> to vector<1x64x8xf32>
    tpu.vector_store %arg6[%c0_16, %c0_17, %c0_18], %34 {strides = array<i32>} : memref<4x64x8xf32, #tpu.memory_space<vmem>>, vector<1x64x8xf32>,
    %35 = vector.extract_strided_slice %13 {offsets = [64, 0], sizes = [64, 8], strides = [1, 1]} : vector<256x8xbf16> to vector<64x8xbf16>
    %cst_19 = arith.constant dense<0.000000e+00> : vector<64x8xf32>
    %36 = tpu.matmul %14, %35, %cst_19 {dimension_numbers = #tpu.dot_dimension_numbers<[1], [0], [0], [1], [0, 0, 1, 1], [], []>} : vector<64x64xbf16>, vector<64x8xbf16>, vector<64x8xf32> -> vector<64x8xf32>
    %37 = vector.broadcast %15 : vector<64x1xf32> to vector<64x8xf32>
    %38 = arith.addf %36, %37 : vector<64x8xf32>
    %cst_20 = arith.constant 0.000000e+00 : f32
    %39 = vector.broadcast %cst_20 : f32 to vector<64x8xf32>
    %40 = arith.maximumf %38, %39 : vector<64x8xf32>
    %cst_21 = arith.constant dense<0xFF800000> : vector<64xf32>
    %41 = vector.multi_reduction <maximumf>, %40, %cst_21 [1] : vector<64x8xf32> to vector<64xf32>
    %42 = vector.shape_cast %41 : vector<64xf32> to vector<64x1xf32>
    %43 = vector.broadcast %42 : vector<64x1xf32> to vector<64x8xf32>
    %44 = arith.subf %40, %43 : vector<64x8xf32>
    %45 = math.exp %44 : vector<64x8xf32>
    %cst_22 = arith.constant dense<0.000000e+00> : vector<64xf32>
    %46 = vector.multi_reduction <add>, %45, %cst_22 [1] : vector<64x8xf32> to vector<64xf32>
    %47 = vector.shape_cast %46 : vector<64xf32> to vector<64x1xf32>
    %48 = tpu.reciprocal %47 {approx = true} : vector<64x1xf32> -> vector<64x1xf32>
    %49 = vector.broadcast %48 : vector<64x1xf32> to vector<64x8xf32>
    %50 = arith.mulf %45, %49 : vector<64x8xf32>
    %c1 = arith.constant 1 : index
    %c0_23 = arith.constant 0 : index
    %c0_24 = arith.constant 0 : index
    %51 = vector.load %arg6[%c1, %c0_23, %c0_24] : memref<4x64x8xf32, #tpu.memory_space<vmem>>, vector<1x64x8xf32>
    %52 = vector.shape_cast %51 : vector<1x64x8xf32> to vector<64x8xf32>
    %53 = vector.shape_cast %50 : vector<64x8xf32> to vector<1x64x8xf32>
    tpu.vector_store %arg6[%c1, %c0_23, %c0_24], %53 {strides = array<i32>} : memref<4x64x8xf32, #tpu.memory_space<vmem>>, vector<1x64x8xf32>,
    %54 = vector.extract_strided_slice %13 {offsets = [128, 0], sizes = [64, 8], strides = [1, 1]} : vector<256x8xbf16> to vector<64x8xbf16>
    %cst_25 = arith.constant dense<0.000000e+00> : vector<64x8xf32>
    %55 = tpu.matmul %14, %54, %cst_25 {dimension_numbers = #tpu.dot_dimension_numbers<[1], [0], [0], [1], [0, 0, 1, 1], [], []>} : vector<64x64xbf16>, vector<64x8xbf16>, vector<64x8xf32> -> vector<64x8xf32>
    %56 = vector.broadcast %15 : vector<64x1xf32> to vector<64x8xf32>
    %57 = arith.addf %55, %56 : vector<64x8xf32>
    %cst_26 = arith.constant 0.000000e+00 : f32
    %58 = vector.broadcast %cst_26 : f32 to vector<64x8xf32>
    %59 = arith.maximumf %57, %58 : vector<64x8xf32>
    %cst_27 = arith.constant dense<0xFF800000> : vector<64xf32>
    %60 = vector.multi_reduction <maximumf>, %59, %cst_27 [1] : vector<64x8xf32> to vector<64xf32>
    %61 = vector.shape_cast %60 : vector<64xf32> to vector<64x1xf32>
    %62 = vector.broadcast %61 : vector<64x1xf32> to vector<64x8xf32>
    %63 = arith.subf %59, %62 : vector<64x8xf32>
    %64 = math.exp %63 : vector<64x8xf32>
    %cst_28 = arith.constant dense<0.000000e+00> : vector<64xf32>
    %65 = vector.multi_reduction <add>, %64, %cst_28 [1] : vector<64x8xf32> to vector<64xf32>
    %66 = vector.shape_cast %65 : vector<64xf32> to vector<64x1xf32>
    %67 = tpu.reciprocal %66 {approx = true} : vector<64x1xf32> -> vector<64x1xf32>
    %68 = vector.broadcast %67 : vector<64x1xf32> to vector<64x8xf32>
    %69 = arith.mulf %64, %68 : vector<64x8xf32>
    %c2 = arith.constant 2 : index
    %c0_29 = arith.constant 0 : index
    %c0_30 = arith.constant 0 : index
    %70 = vector.load %arg6[%c2, %c0_29, %c0_30] : memref<4x64x8xf32, #tpu.memory_space<vmem>>, vector<1x64x8xf32>
    %71 = vector.shape_cast %70 : vector<1x64x8xf32> to vector<64x8xf32>
    %72 = vector.shape_cast %69 : vector<64x8xf32> to vector<1x64x8xf32>
    tpu.vector_store %arg6[%c2, %c0_29, %c0_30], %72 {strides = array<i32>} : memref<4x64x8xf32, #tpu.memory_space<vmem>>, vector<1x64x8xf32>,
    %73 = vector.extract_strided_slice %13 {offsets = [192, 0], sizes = [64, 8], strides = [1, 1]} : vector<256x8xbf16> to vector<64x8xbf16>
    %cst_31 = arith.constant dense<0.000000e+00> : vector<64x8xf32>
    %74 = tpu.matmul %14, %73, %cst_31 {dimension_numbers = #tpu.dot_dimension_numbers<[1], [0], [0], [1], [0, 0, 1, 1], [], []>} : vector<64x64xbf16>, vector<64x8xbf16>, vector<64x8xf32> -> vector<64x8xf32>
    %75 = vector.broadcast %15 : vector<64x1xf32> to vector<64x8xf32>
    %76 = arith.addf %74, %75 : vector<64x8xf32>
    %cst_32 = arith.constant 0.000000e+00 : f32
    %77 = vector.broadcast %cst_32 : f32 to vector<64x8xf32>
    %78 = arith.maximumf %76, %77 : vector<64x8xf32>
    %cst_33 = arith.constant dense<0xFF800000> : vector<64xf32>
    %79 = vector.multi_reduction <maximumf>, %78, %cst_33 [1] : vector<64x8xf32> to vector<64xf32>
    %80 = vector.shape_cast %79 : vector<64xf32> to vector<64x1xf32>
    %81 = vector.broadcast %80 : vector<64x1xf32> to vector<64x8xf32>
    %82 = arith.subf %78, %81 : vector<64x8xf32>
    %83 = math.exp %82 : vector<64x8xf32>
    %cst_34 = arith.constant dense<0.000000e+00> : vector<64xf32>
    %84 = vector.multi_reduction <add>, %83, %cst_34 [1] : vector<64x8xf32> to vector<64xf32>
    %85 = vector.shape_cast %84 : vector<64xf32> to vector<64x1xf32>
    %86 = tpu.reciprocal %85 {approx = true} : vector<64x1xf32> -> vector<64x1xf32>
    %87 = vector.broadcast %86 : vector<64x1xf32> to vector<64x8xf32>
    %88 = arith.mulf %83, %87 : vector<64x8xf32>
    %c3 = arith.constant 3 : index
    %c0_35 = arith.constant 0 : index
    %c0_36 = arith.constant 0 : index
    %89 = vector.load %arg6[%c3, %c0_35, %c0_36] : memref<4x64x8xf32, #tpu.memory_space<vmem>>, vector<1x64x8xf32>
    %90 = vector.shape_cast %89 : vector<1x64x8xf32> to vector<64x8xf32>
    %91 = vector.shape_cast %88 : vector<64x8xf32> to vector<1x64x8xf32>
    tpu.vector_store %arg6[%c3, %c0_35, %c0_36], %91 {strides = array<i32>} : memref<4x64x8xf32, #tpu.memory_space<vmem>>, vector<1x64x8xf32>,
    return
  }
  func.func @transform_0(%arg0: i32) -> (i32, i32, i32) {
    %c0_i32 = arith.constant 0 : i32
    %c0_i32_0 = arith.constant 0 : i32
    %c0_i32_1 = arith.constant 0 : i32
    return %arg0, %c0_i32, %c0_i32_0 : i32, i32, i32
  }
  func.func @transform_1(%arg0: i32) -> (i32, i32) {
    %c0_i32 = arith.constant 0 : i32
    %c0_i32_0 = arith.constant 0 : i32
    %c0_i32_1 = arith.constant 0 : i32
    return %c0_i32, %c0_i32_0 : i32, i32
  }
  func.func @transform_2(%arg0: i32) -> (i32, i32) {
    %c0_i32 = arith.constant 0 : i32
    %c0_i32_0 = arith.constant 0 : i32
    %c0_i32_1 = arith.constant 0 : i32
    return %c0_i32, %c0_i32_0 : i32, i32
  }
  func.func @transform_3(%arg0: i32) -> (i32, i32) {
    %c0_i32 = arith.constant 0 : i32
    %c0_i32_0 = arith.constant 0 : i32
    %c0_i32_1 = arith.constant 0 : i32
    return %c0_i32, %c0_i32_0 : i32, i32
  }
  func.func @transform_4(%arg0: i32) -> (i32, i32) {
    %c0_i32 = arith.constant 0 : i32
    %c0_i32_0 = arith.constant 0 : i32
    %c0_i32_1 = arith.constant 0 : i32
    return %c0_i32, %c0_i32_0 : i32, i32
  }
  func.func @transform_5(%arg0: i32) -> (i32, i32, i32) {
    %c0_i32 = arith.constant 0 : i32
    %c0_i32_0 = arith.constant 0 : i32
    %c0_i32_1 = arith.constant 0 : i32
    return %arg0, %c0_i32, %c0_i32_0 : i32, i32, i32
  }
}

</mosaic_0001>

<bundles_post_ra>
// kernel: tpu_custom_call.1
= control target key start
LH: loop header
LB: loop body
LE: loop exit
PB: predicated region body
PF: predicated region fallthrough
CT: control target
= control target key end

     0   :  { %10 = vsyncpa [#allocation3], 0  ;;  %s7113_s0 = inlined_call_operand.hbm [shape: bf16[8,64,1280], index: 0, kind: input, shape index: {}]   ;;  %s7114_s1 = inlined_call_operand.vmem [shape: bf16[1280,8], index: 1, kind: input, shape index: {}]   ;;  %s7115_s2 = inlined_call_operand.hbm [shape: f32[1,8], index: 2, kind: input, shape index: {}]   ;;  %s7116_s3 = inlined_call_operand.hbm [shape: bf16[64,64], index: 3, kind: input, shape index: {}]   ;;  %s7117_s4 = inlined_call_operand.vmem [shape: f32[64,1], index: 4, kind: input, shape index: {}]   ;;  %s7118_s5 = inlined_call_operand.vmem [shape: f32[8,64,8], index: 5, kind: output, shape index: {}]  }
   0x1   :  { %12 = vsyncpa [#allocation3 + $0x1], 0 }
   0x2   :  { %13 = vsyncpa [#allocation5], 0  ;;  %s5513_s18 = smov 0   ;;  %s5515_s19 = smov 0  }
   0x3   :  { %s5517_s20 = smov 0   ;;  %s5519_s21 = smov 0  }
   0x4 LB: > { %s3723_s22 = sadd.s32 4294967295, %s5473_s21   ;;  %s5533_s23 = sadd.s32 1, %s5473_s21   ;;  %s5473_s21 = sphi %s5519_s21, %s7161_s21   ;;  %s5469_s20 = sphi %s5517_s20, %s7160_s20   ;;  %s5465_s19 = sphi %s5515_s19, %s7159_s19   ;;  %s5461_s18 = sphi %s5513_s18, %s7158_s18  }
   0x5   : > { %s23_s24 = ssub.s32 %s5473_s21, %s5533_s23  ;;  %s26_s25 = sadd.s32 1, %s5469_s20 }
   0x6   : > { %p24_p0 = scmp.eq.s32.totalorder %s23_s24, 0  ;;  %p33_p1 = scmp.ne.s32.totalorder %s5469_s20, %s5465_s19 }
   0x7   : > { %p34_p2 = scmp.eq.s32.totalorder %s5473_s21, 0  ;;  %p39_p3 = scmp.ne.s32.totalorder %s5465_s19, %s5461_s18 }
   0x8   : > { %s5543_s26 = scalar_select %p24_p0, %s5469_s20, %s26_s25  }
   0x9   : > { %p5545_p4 = por %p34_p2, %p33_p1  ;;  %p5551_p5 = scmp.eq.s32.totalorder %s3723_s22, 0 }
   0xa   : > { %p3725_p6 = scmp.ge.s32.totalorder %s5473_s21, 1  ;;  %p160_p7 = scmp.lt.s32.totalorder %s5473_s21, 3 }
   0xb   : > { %s7137_s28 = scalar_select %p5551_p5, 1, 0 }
   0xc   : > { %p5559_p8 = por %p5551_p5, %p39_p3  ;;  %p5563_p9 = pnand %p3725_p6, %p160_p7 }
   0xd   : > { %s5475_s6 = smov [#allocation4]   ;;  %p4724_p11 = scmp.lt.s32.totalorder %s5473_s21, 2 }
   0xe   : > { %s7138_s29 = scalar_select %p5559_p8, 1, 0 }
   0xf   : > { %s7139_s30 = scalar_select %p5563_p9, 1, 0 }
  0x10   : > { %s176_s7 = sshll.u32 %s5475_s6, 4  ;;  %p4711_p10 = pneg %p5563_p9  ;;  %s177_s7 = int_to_ptr.vmem [resolvable:$true] %s176_s7 }
  0x11   : > { %s5476_s9 = smov [#allocation6]   ;;  %p5578_p13 = pnand %p4724_p11, %p5545_p4 }
  0x12   : > { %p5572_p12 = pnand %p4711_p10, %p5551_p5  ;;  %s186_s10 = sshll.u32 %s5476_s9, 4  ;;  %s5582_s10 = int_to_ptr.vmem [resolvable:$true] %s186_s10 }
  0x13   : > { %s7141_s11 = scalar_select %p5578_p13, 1, 0 }
  0x14   : > { %s5349_s14 = scalar_lea.hbm %s7115_s2, 16  ;;  %p5351_p1 = pneg %p5572_p12 }
  0x15   : > { %p5350_p0 = scmp.ne.s32.totalorder %s7115_s2, %s5349_s14  ;;  %p5356_p4 = scmp.lt.u32.totalorder %s5349_s14, %s7115_s2 }
  0x17   : > { %p5352_p2 = pnand %p5351_p1, %p5350_p0 }
  0x19   : > { %p5353_p3 = pneg %p5352_p2 }
  0x1b   : > { %p5358_p6 = pnand %p5356_p4, %p5353_p3 }
  0x1d   : > { %5361 = shalt.err (!%p5358_p6)
}
  0x1e   : > { %s5362_s24 = scalar_lea.vmem %s177_s7, 16  ;;  %s5369_s25 = scalar_lea.vmem %s177_s7, 32 }
  0x1f   : > { %p5363_p7 = scmp.ne.s32.totalorder %s177_s7, %s5362_s24  ;;  %p5370_p5 = scmp.lt.s32.totalorder %s177_s7, %s177_s7 }
  0x20   : > { %p5371_p8 = scmp.lt.s32.totalorder %s5369_s25, %s5362_s24 }
  0x21   : > { %p5365_p10 = pnand %p5363_p7, %p5351_p1 }
  0x22   : > { %p5372_p9 = por %p5371_p8, %p5370_p5 }
  0x23   : > { %p5366_p11 = pneg %p5365_p10 }
  0x25   : > { %p5373_p13 = pnand %p5372_p9, %p5366_p11 }
  0x27   : > { %5376 = shalt.err (!%p5373_p13)
}
  0x28   : > { %4714 = dma.hbm_to_vmem [thread:$0]  (!%p5572_p12), %s7115_s2, 16, %s177_s7, [#allocation5]  }
  0x29   : > { %s5377_s13 = scalar_lea.hbm %s7116_s3, 512 }
  0x2a   : > { %p5378_p0 = scmp.ne.s32.totalorder %s7116_s3, %s5377_s13  ;;  %p5384_p9 = scmp.lt.u32.totalorder %s5377_s13, %s7116_s3 }
  0x2c   : > { %p5380_p5 = pnand %p5378_p0, %p5351_p1 }
  0x2e   : > { %p5381_p8 = pneg %p5380_p5 }
  0x30   : > { %p5386_p13 = pnand %p5384_p9, %p5381_p8 }
  0x32   : > { %5389 = shalt.err (!%p5386_p13)
}
  0x33   : > { %s5390_s7 = scalar_lea.vmem %s5582_s10, 512  ;;  %p5398_p6 = scmp.lt.s32.totalorder %s5582_s10, %s5582_s10 }
  0x34   : > { %p5391_p2 = scmp.ne.s32.totalorder %s5582_s10, %s5390_s7  ;;  %p5399_p7 = scmp.lt.s32.totalorder %s5390_s7, %s5390_s7 }
  0x36   : > { %p5393_p3 = pnand %p5391_p2, %p5351_p1  ;;  %p5400_p10 = por %p5399_p7, %p5398_p6 }
  0x38   : > { %p5394_p4 = pneg %p5393_p3 }
  0x3a   : > { %p5401_p11 = pnand %p5400_p10, %p5394_p4 }
  0x3c   : > { %5404 = shalt.err (!%p5401_p11)
}
  0x3d   : > { %s5477_s18 = smov 64   ;;  %s5478_s24 = smov 4  }
  0x3e   : > { %4717 = dma.hbm_to_vmem [thread:$0]  (!%p5572_p12), %s7116_s3, 512, %s5582_s10, [#allocation5], %s5477_s18, %s5477_s18, %s5478_s24  }
  0x3f   : > { %s203_s6 = sand.u32 1, %s5469_s20   ;;  %s4699_s9 = smul.u32 20480, %s5473_s21 }
  0x40   : > { %s4698_s12 = smul.u32 1280, %s203_s6  ;;  %s5640_s8 = scalar_lea.sflag [#allocation3], %s203_s6 }
  0x41   : > { %s5636_s15 = scalar_lea.hbm %s7113_s0, %s4699_s9  ;;  %p7142_p1 = scmp.ne.s32.totalorder %s7141_s11, 0 }
  0x42   : > { %s207_s16 = scalar_lea.vmem [#allocation2], %s4698_s12  ;;  %s5405_s7 = scalar_lea.hbm %s5636_s15, 20480 }
  0x43   : > { %s215_s17 = sshll.u32 %s207_s16, 4  ;;  %p5406_p12 = scmp.ne.s32.totalorder %s5636_s15, %s5405_s7  ;;  %s5638_s17 = int_to_ptr.vmem [resolvable:$true] %s215_s17 }
  0x44   : > { %p5407_p0 = pneg %p7142_p1  ;;  %s5410_s24 = scalar_lea.hbm %s7113_s0, 40960 }
  0x45   : > { %p5411_p9 = scmp.lt.u32.totalorder %s5636_s15, %s7113_s0  ;;  %p5412_p13 = scmp.lt.u32.totalorder %s5410_s24, %s5405_s7 }
  0x46   : > { %p5408_p5 = pnand %p5407_p0, %p5406_p12  ;;  %p5414_p3 = scmp.lt.u32.totalorder %s5405_s7, %s5636_s15 }
  0x47   : > { %p5413_p2 = por %p5412_p13, %p5411_p9 }
  0x48   : > { %p5409_p8 = pneg %p5408_p5 }
  0x49   : > { %p5415_p4 = por %p5414_p3, %p5413_p2 }
  0x4b   : > { %p5416_p6 = pnand %p5415_p4, %p5409_p8 }
  0x4d   : > { %5419 = shalt.err (!%p5416_p6)
}
  0x4e   : > { %s5420_s6 = scalar_lea.vmem %s5638_s17, 20480  ;;  %s5479_s9 = smov [#allocation2]  }
  0x4f   : > { %p5421_p7 = scmp.ne.s32.totalorder %s5638_s17, %s5420_s6  ;;  %s5425_s12 = sshll.u32 %s5479_s9, 4  ;;  %s5426_s12 = int_to_ptr.vmem [resolvable:$false] %s5425_s12 }
  0x50   : > { %s5427_s13 = scalar_lea.vmem %s5426_s12, 40960  ;;  %p5428_p12 = scmp.lt.s32.totalorder %s5638_s17, %s5426_s12 }
  0x51   : > { %p5423_p10 = pnand %p5421_p7, %p5407_p0  ;;  %p5429_p5 = scmp.lt.s32.totalorder %s5427_s13, %s5420_s6 }
  0x53   : > { %p5424_p11 = pneg %p5423_p10  ;;  %p5430_p9 = por %p5429_p5, %p5428_p12 }
  0x55   : > { %p5431_p13 = pnand %p5430_p9, %p5424_p11 }
  0x57   : > { %5434 = shalt.err (!%p5431_p13)
}
  0x58   : > { %s5480_s14 = smov 640   ;;  %s5481_s16 = smov 40  }
  0x59   : > { %4721 = dma.hbm_to_vmem [thread:$0]  (!%p7142_p1), %s5636_s15, 20480, %s5638_s17, %s5640_s8, %s5480_s14, %s5480_s14, %s5481_s16  }
  0x5a   : > { %p7143_p0 = scmp.ne.s32.totalorder %s7139_s30, 0 }
  0x5b   : > { %s229_s7 = sand.u32 (!%p7143_p0), 1, %s5465_s19   ;;  %p7144_p8 = scmp.ne.s32.totalorder (!%p7143_p0), %s7138_s29, 0 }
  0x5c   : > { %227 = sbr.rel (%p7143_p0) target bundleno = 1279 (0x4ff), region = 40  ;;  %s230_s18 = scalar_lea.sflag (!%p7143_p0), [#allocation3], %s229_s7 }
  0x5d   : > { %s4700_s10 = smul.u32 (!%p7143_p0), 1280, %s229_s7 }
  0x5f   : > { %s5671_s24 = scalar_lea.vmem (!%p7143_p0), [#allocation2], %s4700_s10 }
  0x63   : > { %5452 = dma.done.wait (%p7144_p8), %s230_s18, 20480  }
  0x64   : > { %5454 = vsyncadd (%p7144_p8), %s230_s18, 4294946816  ;;  %p7145_p2 = scmp.ne.s32.totalorder %s7137_s28, 0 }
  0x66   : > { %5456 = dma.done.wait (%p7145_p2), [#allocation5], 528  }
  0x67   : > { %5458 = vsyncadd (%p7145_p2), [#allocation5], 4294966768  ;;  %v4768_v0 = vld [vmem:[%s7114_s1 + $0x40] sm:$0xff]   ;;  %v4770_v2 = vld [vmem:[%s7114_s1 + $0x48] sm:$0xff]   ;;  %vm2942_vm0 = vcmask 523264   ;;  %vm3028_vm1 = vcmask 64512  }
  0x68   : > { %v4769_v1 = vld [vmem:[%s7114_s1] sm:$0xff]   ;;  %4026 = vmatprep.subr.bf16.mxu0 %v4768_v0  ;;  %4682 = vmatprep.subr.bf16.mxu1 %v4768_v0  ;;  %v4771_v3 = vld [vmem:[%s7114_s1 + $0x8] sm:$0xff]   ;;  %v4772_v4 = vld [vmem:[%s7114_s1 + $0x50] sm:$0xff]   ;;  %s3735_s14 = sshll.u32 %s3723_s22, 2 }
  0x69   : > { %4027 = vmatpush3.bf16.msra.mxu0 %v4769_v1  ;;  %4690 = vmatpush3.bf16.msra.mxu1 %v4769_v1  ;;  %v4773_v5 = vld [vmem:[%s7114_s1 + $0x10] sm:$0xff]   ;;  %v4774_v6 = vld [vmem:[%s7114_s1 + $0x58] sm:$0xff]   ;;  %v4776_v8 = vld [vmem:[%s7114_s1 + $0x60] sm:$0xff]   ;;  %p271_p1 = scmp.lt.s32.totalorder %s3735_s14, 7 }
  0x6a   : > { %4028 = vmatprep.subr.bf16.mxu0 %v4770_v2  ;;  %4683 = vmatprep.subr.bf16.mxu1 %v4770_v2  ;;  %v4775_v7 = vld [vmem:[%s7114_s1 + $0x18] sm:$0xff]   ;;  %v4777_v9 = vld [vmem:[%s7114_s1 + $0x20] sm:$0xff]   ;;  %v4778_v10 = vld [vmem:[%s7114_s1 + $0x68] sm:$0xff]  }
  0x6b   : > { %v4786_v11 = vld [vmem:[%s5671_s24 + $0x4] ss:$40 sps:$4 sm:$0xff]   ;;  %v4780_v14 = vld [vmem:[%s7114_s1 + $0x70] sm:$0xff]   ;;  %v4782_v16 = vld [vmem:[%s7114_s1 + $0x78] sm:$0xff]   ;;  %s7163_s14 = smov (!%p271_p1, %s3735_s14), 7 }
  0x6c   : > { %v4789_v12 = vld [vmem:[%s5671_s24 + $0x3c4] ss:$40 sps:$4 sm:$0xff]   ;;  %1917 = vmatprep.mubr.bf16.mxu0 %v4786_v11  ;;  %v4781_v15 = vld [vmem:[%s7114_s1 + $0x30] sm:$0xff]   ;;  %v4783_v17 = vld [vmem:[%s7114_s1 + $0x38] sm:$0xff]   ;;  %s4025_s16 = sshll.u32 %s7163_s14, 6 }
  0x6d   : > { %4029 = vmatpush3.bf16.msra.mxu0 %v4771_v3  ;;  %4691 = vmatpush3.bf16.msra.mxu1 %v4771_v3  ;;  %v4779_v13 = vld [vmem:[%s7114_s1 + $0x28] sm:$0xff]   ;;  %v4790_v18 = vld [vmem:[%s7114_s1 + $0xc0] sm:$0xff]   ;;  %v4794_v23 = vld [vmem:[%s5671_s24 + $0x54] ss:$40 sps:$4 sm:$0xff]   ;;  %s7002_s10 = scalar_lea.vmem %s7118_s5, %s4025_s16 }
  0x6e   : > { %4030 = vmatprep.subr.bf16.mxu0 %v4772_v4  ;;  %4684 = vmatprep.subr.bf16.mxu1 %v4772_v4  ;;  %v4784_v19 = vld [vmem:[%s5671_s24] ss:$40 sps:$4 sm:$0xff]   ;;  %v4796_v24 = vld [vmem:[%s5671_s24 + $0x414] ss:$40 sps:$4 sm:$0xff]   ;;  %v4798_v26 = vld [vmem:[%s5671_s24 + $0x50] ss:$40 sps:$4 sm:$0xff]  }
  0x6f   : > { %2013 = vmatprep.mubr.bf16.mxu1 %v4789_v12  ;;  %v4787_v20 = vld [vmem:[%s5671_s24 + $0x3c0] ss:$40 sps:$4 sm:$0xff]   ;;  %v4800_v27 = vld [vmem:[%s7114_s1 + $0xd0] sm:$0xff]   ;;  %v4802_v30 = vld [vmem:[%s7114_s1 + $0xd8] sm:$0xff]  }
  0x70   : > { %v4791_v21 = vld [vmem:[%s7114_s1 + $0x80] sm:$0xff]   ;;  %v4792_v22 = vld [vmem:[%s7114_s1 + $0xc8] sm:$0xff]   ;;  %v4799_v28 = vld [vmem:[%s5671_s24 + $0x410] ss:$40 sps:$4 sm:$0xff]  }
  0x71   : > { %4031 = vmatpush3.bf16.msra.mxu0 %v4773_v5  ;;  %4692 = vmatpush3.bf16.msra.mxu1 %v4773_v5  ;;  %v4793_v25 = vld [vmem:[%s7114_s1 + $0x88] sm:$0xff]   ;;  %v4801_v29 = vld [vmem:[%s7114_s1 + $0x90] sm:$0xff]   ;;  %v4803_v33 = vld [vmem:[%s7114_s1 + $0x98] sm:$0xff]  }
  0x72   : > { %4032 = vmatprep.subr.bf16.mxu0 %v4774_v6  ;;  %4685 = vmatprep.subr.bf16.mxu1 %v4774_v6  ;;  %v4804_v31 = vld [vmem:[%s5671_s24 + $0xa4] ss:$40 sps:$4 sm:$0xff]   ;;  %v4808_v35 = vld [vmem:[%s5671_s24 + $0xa0] ss:$40 sps:$4 sm:$0xff]   ;;  %v4814_v39 = vld [vmem:[%s5671_s24 + $0xf4] ss:$40 sps:$4 sm:$0xff]  }
  0x73   : > { %v4806_v32 = vld [vmem:[%s5671_s24 + $0x464] ss:$40 sps:$4 sm:$0xff]   ;;  %v4809_v36 = vld [vmem:[%s5671_s24 + $0x460] ss:$40 sps:$4 sm:$0xff]   ;;  %v4816_v40 = vld [vmem:[%s5671_s24 + $0x4b4] ss:$40 sps:$4 sm:$0xff]  }
  0x74   : > { %v4810_v34 = vld [vmem:[%s7114_s1 + $0xe0] sm:$0xff]   ;;  %v4812_v38 = vld [vmem:[%s7114_s1 + $0xe8] sm:$0xff]   ;;  %v4818_v42 = vld [vmem:[%s5671_s24 + $0xf0] ss:$40 sps:$4 sm:$0xff]  }
  0x75   : > { %4033 = vmatpush3.bf16.msra.mxu0 %v4775_v7  ;;  %4693 = vmatpush3.bf16.msra.mxu1 %v4775_v7  ;;  %v4811_v37 = vld [vmem:[%s7114_s1 + $0xa0] sm:$0xff]   ;;  %v4813_v41 = vld [vmem:[%s7114_s1 + $0xa8] sm:$0xff]   ;;  %v4819_v43 = vld [vmem:[%s5671_s24 + $0x4b0] ss:$40 sps:$4 sm:$0xff]  }
  0x76   : > { %4034 = vmatprep.subr.bf16.mxu0 %v4776_v8  ;;  %4686 = vmatprep.subr.bf16.mxu1 %v4776_v8  ;;  %v4820_v44 = vld [vmem:[%s7114_s1 + $0xf0] sm:$0xff]   ;;  %v4824_v46 = vld [vmem:[%s5671_s24 + $0x144] ss:$40 sps:$4 sm:$0xff]   ;;  %v4822_v47 = vld [vmem:[%s7114_s1 + $0xf8] sm:$0xff]  }
  0x77   : > { %v4821_v45 = vld [vmem:[%s7114_s1 + $0xb0] sm:$0xff]   ;;  %v4848_v48 = vld [vmem:[%s7114_s1 + $0x140] sm:$0xff]   ;;  %v4823_v51 = vld [vmem:[%s7114_s1 + $0xb8] sm:$0xff]  }
  0x78   : > { %v4849_v49 = vld [vmem:[%s7114_s1 + $0x100] sm:$0xff]   ;;  %v4828_v50 = vld [vmem:[%s5671_s24 + $0xc] ss:$40 sps:$4 sm:$0xff]   ;;  %v4826_v54 = vld [vmem:[%s5671_s24 + $0x8] ss:$40 sps:$4 sm:$0xff]  }
  0x79   : > { %4035 = vmatpush3.bf16.msra.mxu0 %v4777_v9  ;;  %4694 = vmatpush3.bf16.msra.mxu1 %v4777_v9  ;;  %v4856_v52 = vld [vmem:[%s7114_s1 + $0x148] sm:$0xff]   ;;  %v4830_v56 = vld [vmem:[%s5671_s24 + $0x194] ss:$40 sps:$4 sm:$0xff]   ;;  %v4834_v61 = vld [vmem:[%s5671_s24 + $0x190] ss:$40 sps:$4 sm:$0xff]  }
  0x7a   : > { %4036 = vmatprep.subr.bf16.mxu0 %v4778_v10  ;;  %4687 = vmatprep.subr.bf16.mxu1 %v4778_v10  ;;  %v4857_v53 = vld [vmem:[%s7114_s1 + $0x108] sm:$0xff]   ;;  %v4832_v57 = vld [vmem:[%s5671_s24 + $0x5c] ss:$40 sps:$4 sm:$0xff]   ;;  %v4864_v58 = vld [vmem:[%s7114_s1 + $0x150] sm:$0xff]  }
  0x7b   : > { %v4829_v55 = vld [vmem:[%s5671_s24 + $0x140] ss:$40 sps:$4 sm:$0xff]   ;;  %v4865_v59 = vld [vmem:[%s7114_s1 + $0x110] sm:$0xff]   ;;  %v4866_v60 = vld [vmem:[%s7114_s1 + $0x158] sm:$0xff]  }
  0x7c   : > { %v4835_v62 = vld [vmem:[%s5671_s24 + $0x58] ss:$40 sps:$4 sm:$0xff]   ;;  %v4836_v0 = vld [vmem:[%s5671_s24 + $0x1e4] ss:$40 sps:$4 sm:$0xff]   ;;  %v4841_v6 = vld [vmem:[%s5671_s24 + $0xa8] ss:$40 sps:$4 sm:$0xff]  }
  0x7d   : > { %4037 = vmatpush3.bf16.msra.mxu0 %v4779_v13  ;;  %4695 = vmatpush3.bf16.msra.mxu1 %v4779_v13  ;;  %v4867_v63 = vld [vmem:[%s7114_s1 + $0x118] sm:$0xff]   ;;  %v4874_v1 = vld [vmem:[%s7114_s1 + $0x160] sm:$0xff]   ;;  %v4838_v2 = vld [vmem:[%s5671_s24 + $0xac] ss:$40 sps:$4 sm:$0xff]  }
  0x7e   : > { %4038 = vmatprep.subr.bf16.mxu0 %v4780_v14  ;;  %4688 = vmatprep.subr.bf16.mxu1 %v4780_v14  ;;  %v4875_v3 = vld [vmem:[%s7114_s1 + $0x120] sm:$0xff]   ;;  %v4876_v4 = vld [vmem:[%s7114_s1 + $0x168] sm:$0xff]   ;;  %v4884_v8 = vld [vmem:[%s7114_s1 + $0x170] sm:$0xff]  }
  0x7f   : > { %v4840_v5 = vld [vmem:[%s5671_s24 + $0x1e0] ss:$40 sps:$4 sm:$0xff]   ;;  %v4842_v9 = vld [vmem:[%s5671_s24 + $0x234] ss:$40 sps:$4 sm:$0xff]   ;;  %v4846_v14 = vld [vmem:[%s5671_s24 + $0x230] ss:$40 sps:$4 sm:$0xff]  }
  0x80   : > { %v4877_v7 = vld [vmem:[%s7114_s1 + $0x128] sm:$0xff]   ;;  %v4844_v10 = vld [vmem:[%s5671_s24 + $0xfc] ss:$40 sps:$4 sm:$0xff]   ;;  %v4885_v11 = vld [vmem:[%s7114_s1 + $0x130] sm:$0xff]  }
  0x81   : > { %4039 = vmatpush3.bf16.msra.mxu0 %v4781_v15  ;;  %4696 = vmatpush3.bf16.msra.mxu1 %v4781_v15  ;;  %v4886_v12 = vld [vmem:[%s7114_s1 + $0x178] sm:$0xff]  }
  0x82   : > { %4040 = vmatprep.subr.bf16.mxu0 %v4782_v16  ;;  %4689 = vmatprep.subr.bf16.mxu1 %v4782_v16  ;;  %v4887_v13 = vld [vmem:[%s7114_s1 + $0x138] sm:$0xff]   ;;  %v4850_v16 = vld [vmem:[%s5671_s24 + $0x284] ss:$40 sps:$4 sm:$0xff]  }
  0x83   : > { %v4847_v15 = vld [vmem:[%s5671_s24 + $0xf8] ss:$40 sps:$4 sm:$0xff]  }
  0x85   : > { %4041 = vmatpush3.bf16.msra.mxu0 %v4783_v17  ;;  %4697 = vmatpush3.bf16.msra.mxu1 %v4783_v17  ;;  %v4852_v17 = vld [vmem:[%s5671_s24 + $0x14c] ss:$40 sps:$4 sm:$0xff]  }
  0x86   : > { %4138 = vmatprep.subr.bf16.mxu1 %v4790_v18  ;;  %4250 = vmatprep.subr.bf16.mxu0 %v4848_v48  ;;  %v4854_v18 = vld [vmem:[%s5671_s24 + $0x280] ss:$40 sps:$4 sm:$0xff]   ;;  %v4892_v48 = vld [vmem:[%s5671_s24 + $0x14] ss:$40 sps:$4 sm:$0xff]  }
  0x88   : > { %1918 = vmatmul.mubr.bf16.vlgmr.msra.gmra.mrb[0].mxu0 %v4784_v19  ;;  %2014 = vmatmul.mubr.bf16.vlgmr.msra.gmra.mrb[0].mxu1 %v4787_v20  ;;  %v4855_v19 = vld [vmem:[%s5671_s24 + $0x148] ss:$40 sps:$4 sm:$0xff]   ;;  %v4858_v20 = vld [vmem:[%s5671_s24 + $0x2d4] ss:$40 sps:$4 sm:$0xff]  }
  0x89   : > { %4139 = vmatpush3.bf16.msra.mxu1 %v4791_v21  ;;  %1925 = vmatprep.mubr.bf16.mxu0 %v4794_v23  ;;  %v4860_v21 = vld [vmem:[%s5671_s24 + $0x19c] ss:$40 sps:$4 sm:$0xff]  }
  0x8a   : > { %4140 = vmatprep.subr.bf16.mxu1 %v4792_v22  ;;  %2021 = vmatprep.mubr.bf16.mxu1 %v4796_v24  ;;  %v4918_v22 = vld [vmem:[%s7114_s1 + $0x1c0] sm:$0xff]   ;;  %v4920_v24 = vld [vmem:[%s7114_s1 + $0x1c8] sm:$0xff]  }
  0x8b   : > { %4251 = vmatpush3.bf16.msra.mxu0 %v4849_v49  ;;  %v4919_v23 = vld [vmem:[%s7114_s1 + $0x180] sm:$0xff]   ;;  %v4952_v49 = vld [vmem:[%s7114_s1 + $0x1f8] sm:$0xff]  }
  0x8c   : > { %4252 = vmatprep.subr.bf16.mxu0 %v4856_v52  ;;  %v4893_v52 = vld [vmem:[%s5671_s24 + $0x288] ss:$40 sps:$4 sm:$0xff]  }
  0x8d   : > { %4141 = vmatpush3.bf16.msra.mxu1 %v4793_v25  ;;  %v4921_v25 = vld [vmem:[%s7114_s1 + $0x188] sm:$0xff]  }
  0x8e   : > { %4142 = vmatprep.subr.bf16.mxu1 %v4800_v27  ;;  %v4863_v27 = vld [vmem:[%s5671_s24 + $0x198] ss:$40 sps:$4 sm:$0xff]  }
  0x8f   : > { %4253 = vmatpush3.bf16.msra.mxu0 %v4857_v53  ;;  %v4894_v53 = vld [vmem:[%s5671_s24 + $0x2dc] ss:$40 sps:$4 sm:$0xff]  }
  0x90   : > { %1926 = vmatmul.mubr.bf16.gmra.mrb[4].mxu0 %v4798_v26  ;;  %2022 = vmatmul.mubr.bf16.gmra.mrb[4].mxu1 %v4799_v28  ;;  %v4862_v26 = vld [vmem:[%s5671_s24 + $0x2d0] ss:$40 sps:$4 sm:$0xff]  }
  0x91   : > { %4143 = vmatpush3.bf16.msra.mxu1 %v4801_v29  ;;  %1933 = vmatprep.mubr.bf16.mxu0 %v4804_v31  ;;  %v4928_v28 = vld [vmem:[%s7114_s1 + $0x1d0] sm:$0xff]  }
  0x92   : > { %4144 = vmatprep.subr.bf16.mxu1 %v4802_v30  ;;  %2029 = vmatprep.mubr.bf16.mxu1 %v4806_v32  ;;  %v4929_v29 = vld [vmem:[%s7114_s1 + $0x190] sm:$0xff]   ;;  %v4868_v30 = vld [vmem:[%s5671_s24 + $0x324] ss:$40 sps:$4 sm:$0xff]   ;;  %v4930_v32 = vld [vmem:[%s7114_s1 + $0x1d8] sm:$0xff]  }
  0x93   : > { %4254 = vmatprep.subr.bf16.mxu0 %v4864_v58  ;;  %v4870_v31 = vld [vmem:[%s5671_s24 + $0x1ec] ss:$40 sps:$4 sm:$0xff]   ;;  %v4899_v58 = vld [vmem:[%s5671_s24 + $0x60] ss:$40 sps:$4 sm:$0xff]  }
  0x94   : > { %4255 = vmatpush3.bf16.msra.mxu0 %v4865_v59  ;;  %v4967_v59 = vld [vmem:[%s7114_s1 + $0x208] sm:$0xff]  }
  0x95   : > { %4145 = vmatpush3.bf16.msra.mxu1 %v4803_v33  ;;  %4256 = vmatprep.subr.bf16.mxu0 %v4866_v60  ;;  %v4931_v33 = vld [vmem:[%s7114_s1 + $0x198] sm:$0xff]   ;;  %v4980_v60 = vld [vmem:[%s7114_s1 + $0x250] sm:$0xff]  }
  0x96   : > { %4146 = vmatprep.subr.bf16.mxu1 %v4810_v34  ;;  %v4938_v34 = vld [vmem:[%s7114_s1 + $0x1e0] sm:$0xff]  }
  0x98   : > { %1934 = vmatmul.mubr.bf16.gmra.mrb[8].mxu0 %v4808_v35  ;;  %2030 = vmatmul.mubr.bf16.gmra.mrb[8].mxu1 %v4809_v36  ;;  %v4872_v35 = vld [vmem:[%s5671_s24 + $0x320] ss:$40 sps:$4 sm:$0xff]  }
  0x99   : > { %4147 = vmatpush3.bf16.msra.mxu1 %v4811_v37  ;;  %1941 = vmatprep.mubr.bf16.mxu0 %v4814_v39  ;;  %v4873_v36 = vld [vmem:[%s5671_s24 + $0x1e8] ss:$40 sps:$4 sm:$0xff]   ;;  %v4939_v37 = vld [vmem:[%s7114_s1 + $0x1a0] sm:$0xff]  }
  0x9a   : > { %4148 = vmatprep.subr.bf16.mxu1 %v4812_v38  ;;  %2037 = vmatprep.mubr.bf16.mxu1 %v4816_v40  ;;  %v4878_v38 = vld [vmem:[%s5671_s24 + $0x374] ss:$40 sps:$4 sm:$0xff]   ;;  %v4940_v40 = vld [vmem:[%s7114_s1 + $0x1e8] sm:$0xff]  }
  0x9b   : > { %4257 = vmatpush3.bf16.msra.mxu0 %v4867_v63  ;;  %v4880_v39 = vld [vmem:[%s5671_s24 + $0x23c] ss:$40 sps:$4 sm:$0xff]   ;;  %v4981_v63 = vld [vmem:[%s7114_s1 + $0x210] sm:$0xff]  }
  0x9c   : > { %4258 = vmatprep.subr.bf16.mxu0 %v4874_v1  ;;  %v4994_v1 = vld [vmem:[%s7114_s1 + $0x258] sm:$0xff]  }
  0x9d   : > { %4149 = vmatpush3.bf16.msra.mxu1 %v4813_v41  ;;  %v4941_v41 = vld [vmem:[%s7114_s1 + $0x1a8] sm:$0xff]  }
  0x9e   : > { %4150 = vmatprep.subr.bf16.mxu1 %v4820_v44  ;;  %v4883_v44 = vld [vmem:[%s5671_s24 + $0x238] ss:$40 sps:$4 sm:$0xff]  }
  0x9f   : > { %4259 = vmatpush3.bf16.msra.mxu0 %v4875_v3  ;;  %v4905_v3 = vld [vmem:[%s5671_s24 + $0xb0] ss:$40 sps:$4 sm:$0xff]  }
  0xa0   : > { %1942 = vmatmul.mubr.bf16.gmra.mrb[12].mxu0 %v4818_v42  ;;  %2038 = vmatmul.mubr.bf16.gmra.mrb[12].mxu1 %v4819_v43  ;;  %v4948_v42 = vld [vmem:[%s7114_s1 + $0x1f0] sm:$0xff]  }
  0xa1   : > { %4151 = vmatpush3.bf16.msra.mxu1 %v4821_v45  ;;  %1949 = vmatprep.mubr.bf16.mxu0 %v4824_v46  ;;  %v4882_v43 = vld [vmem:[%s5671_s24 + $0x370] ss:$40 sps:$4 sm:$0xff]   ;;  %v4950_v45 = vld [vmem:[%s7114_s1 + $0x240] sm:$0xff]  }
  0xa2   : > { %4152 = vmatprep.subr.bf16.mxu1 %v4822_v47  ;;  %2078 = vmatprep.mubr.bf16.mxu1 %v4828_v50  ;;  %v4949_v46 = vld [vmem:[%s7114_s1 + $0x1b0] sm:$0xff]   ;;  %v4953_v50 = vld [vmem:[%s7114_s1 + $0x1b8] sm:$0xff]  }
  0xa3   : > { %4260 = vmatprep.subr.bf16.mxu0 %v4876_v4  ;;  %v4888_v47 = vld [vmem:[%s5671_s24 + $0x28c] ss:$40 sps:$4 sm:$0xff]   ;;  %v4906_v4 = vld [vmem:[%s5671_s24 + $0x37c] ss:$40 sps:$4 sm:$0xff]  }
  0xa4   : > { %4261 = vmatpush3.bf16.msra.mxu0 %v4877_v7  ;;  %v5003_v7 = vld [vmem:[%s7114_s1 + $0x220] sm:$0xff]  }
  0xa5   : > { %4153 = vmatpush3.bf16.msra.mxu1 %v4823_v51  ;;  %4262 = vmatprep.subr.bf16.mxu0 %v4884_v8  ;;  %v4890_v51 = vld [vmem:[%s5671_s24 + $0x10] ss:$40 sps:$4 sm:$0xff]   ;;  %v5004_v8 = vld [vmem:[%s7114_s1 + $0x268] sm:$0xff]  }
  0xa6   : > { %4362 = vmatprep.subr.bf16.mxu1 %v4918_v22  ;;  %v4926_v22 = vld [vmem:[%s5671_s24 + $0x418] ss:$40 sps:$4 sm:$0xff]  }
  0xa8   : > { %1950 = vmatmul.mubr.bf16.gmra.mrb[16].mxu0 %v4829_v55  ;;  %2079 = vmatmul.mubr.bf16.vlgmr.msra.gmra.mrb[16].mxu1 %v4826_v54  ;;  %v4896_v54 = vld [vmem:[%s5671_s24 + $0x64] ss:$40 sps:$4 sm:$0xff]  }
  0xa9   : > { %1957 = vmatprep.mubr.bf16.mxu0 %v4830_v56  ;;  %2086 = vmatprep.mubr.bf16.mxu1 %v4832_v57  ;;  %v4951_v55 = vld [vmem:[%s7114_s1 + $0x200] sm:$0xff]   ;;  %v4966_v56 = vld [vmem:[%s7114_s1 + $0x248] sm:$0xff]  }
  0xaa   : > { %4263 = vmatpush3.bf16.msra.mxu0 %v4885_v11  ;;  %4363 = vmatpush3.bf16.msra.mxu1 %v4919_v23  ;;  %v4898_v57 = vld [vmem:[%s5671_s24 + $0x2d8] ss:$40 sps:$4 sm:$0xff]  }
  0xab   : > { %4264 = vmatprep.subr.bf16.mxu0 %v4886_v12  ;;  %4364 = vmatprep.subr.bf16.mxu1 %v4920_v24  ;;  %v4911_v11 = vld [vmem:[%s5671_s24 + $0x100] ss:$40 sps:$4 sm:$0xff]   ;;  %v4912_v12 = vld [vmem:[%s5671_s24 + $0x3cc] ss:$40 sps:$4 sm:$0xff]  }
  0xac   : > { %v4927_v23 = vld [vmem:[%s5671_s24 + $0x1a0] ss:$40 sps:$4 sm:$0xff]   ;;  %v4932_v24 = vld [vmem:[%s5671_s24 + $0x46c] ss:$40 sps:$4 sm:$0xff]  }
  0xae   : > { %4265 = vmatpush3.bf16.msra.mxu0 %v4887_v13  ;;  %4365 = vmatpush3.bf16.msra.mxu1 %v4921_v25  ;;  %v4914_v13 = vld [vmem:[%s5671_s24 + $0x154] ss:$40 sps:$4 sm:$0xff]  }
  0xaf   : > { %4366 = vmatprep.subr.bf16.mxu1 %v4928_v28  ;;  %4474 = vmatprep.subr.bf16.mxu0 %v4950_v45  ;;  %v4934_v25 = vld [vmem:[%s5671_s24 + $0x1f4] ss:$40 sps:$4 sm:$0xff]  }
  0xb0   : > { %1958 = vmatmul.mubr.bf16.gmra.mrb[20].mxu0 %v4834_v61  ;;  %2087 = vmatmul.mubr.bf16.gmra.mrb[20].mxu1 %v4835_v62  ;;  %v4900_v61 = vld [vmem:[%s5671_s24 + $0x32c] ss:$40 sps:$4 sm:$0xff]   ;;  %v4942_v28 = vld [vmem:[%s5671_s24 + $0x4bc] ss:$40 sps:$4 sm:$0xff]  }
  0xb1   : > { %1965 = vmatprep.mubr.bf16.mxu0 %v4836_v0  ;;  %2094 = vmatprep.mubr.bf16.mxu1 %v4838_v2  ;;  %v4902_v62 = vld [vmem:[%s5671_s24 + $0xb4] ss:$40 sps:$4 sm:$0xff]   ;;  %v4904_v0 = vld [vmem:[%s5671_s24 + $0x328] ss:$40 sps:$4 sm:$0xff]  }
  0xb2   : > { %4367 = vmatpush3.bf16.msra.mxu1 %v4929_v29  ;;  %v4995_v2 = vld [vmem:[%s7114_s1 + $0x218] sm:$0xff]   ;;  %v4944_v29 = vld [vmem:[%s5671_s24 + $0x244] ss:$40 sps:$4 sm:$0xff]  }
  0xb3   : > { %4368 = vmatprep.subr.bf16.mxu1 %v4930_v32  ;;  %v4954_v32 = vld [vmem:[%s5671_s24 + $0x294] ss:$40 sps:$4 sm:$0xff]  }
  0xb4   : > { %v4976_v45 = vld [vmem:[%s5671_s24 + $0x10c] ss:$40 sps:$4 sm:$0xff]  }
  0xb6   : > { %4369 = vmatpush3.bf16.msra.mxu1 %v4931_v33  ;;  %v4958_v33 = vld [vmem:[%s5671_s24 + $0x1c] ss:$40 sps:$4 sm:$0xff]  }
  0xb7   : > { %4370 = vmatprep.subr.bf16.mxu1 %v4938_v34  ;;  %v4956_v34 = vld [vmem:[%s5671_s24 + $0x18] ss:$40 sps:$4 sm:$0xff]  }
  0xb8   : > { %1966 = vmatmul.mubr.bf16.gmra.mrb[24].mxu0 %v4840_v5  ;;  %2095 = vmatmul.mubr.bf16.gmra.mrb[24].mxu1 %v4841_v6  ;;  %v4908_v5 = vld [vmem:[%s5671_s24 + $0x104] ss:$40 sps:$4 sm:$0xff]  }
  0xb9   : > { %1973 = vmatprep.mubr.bf16.mxu0 %v4842_v9  ;;  %2102 = vmatprep.mubr.bf16.mxu1 %v4844_v10  ;;  %v5002_v6 = vld [vmem:[%s7114_s1 + $0x260] sm:$0xff]   ;;  %v5005_v9 = vld [vmem:[%s7114_s1 + $0x228] sm:$0xff]  }
  0xba   : > { %4371 = vmatpush3.bf16.msra.mxu1 %v4939_v37  ;;  %v4910_v10 = vld [vmem:[%s5671_s24 + $0x378] ss:$40 sps:$4 sm:$0xff]   ;;  %v4962_v37 = vld [vmem:[%s5671_s24 + $0x6c] ss:$40 sps:$4 sm:$0xff]  }
  0xbb   : > { %4372 = vmatprep.subr.bf16.mxu1 %v4940_v40  ;;  %v4968_v40 = vld [vmem:[%s5671_s24 + $0x334] ss:$40 sps:$4 sm:$0xff]  }
  0xbe   : > { %4373 = vmatpush3.bf16.msra.mxu1 %v4941_v41  ;;  %v4970_v41 = vld [vmem:[%s5671_s24 + $0xbc] ss:$40 sps:$4 sm:$0xff]  }
  0xbf   : > { %4374 = vmatprep.subr.bf16.mxu1 %v4948_v42  ;;  %v4972_v42 = vld [vmem:[%s5671_s24 + $0x330] ss:$40 sps:$4 sm:$0xff]  }
  0xc0   : > { %1974 = vmatmul.mubr.bf16.gmra.mrb[28].mxu0 %v4846_v14  ;;  %2103 = vmatmul.mubr.bf16.gmra.mrb[28].mxu1 %v4847_v15  ;;  %v5012_v14 = vld [vmem:[%s7114_s1 + $0x270] sm:$0xff]  }
  0xc1   : > { %1981 = vmatprep.mubr.bf16.mxu0 %v4850_v16  ;;  %2110 = vmatprep.mubr.bf16.mxu1 %v4852_v17  ;;  %v5013_v15 = vld [vmem:[%s7114_s1 + $0x230] sm:$0xff]   ;;  %v5014_v16 = vld [vmem:[%s7114_s1 + $0x278] sm:$0xff]  }
  0xc2   : > { %4375 = vmatpush3.bf16.msra.mxu1 %v4949_v46  ;;  %v4916_v17 = vld [vmem:[%s5671_s24 + $0x3c8] ss:$40 sps:$4 sm:$0xff]  }
  0xc3   : > { %4376 = vmatprep.subr.bf16.mxu1 %v4952_v49  ;;  %v4978_v46 = vld [vmem:[%s5671_s24 + $0x380] ss:$40 sps:$4 sm:$0xff]   ;;  %v4984_v49 = vld [vmem:[%s5671_s24 + $0x15c] ss:$40 sps:$4 sm:$0xff]  }
  0xc6   : > { %4377 = vmatpush3.bf16.msra.mxu1 %v4953_v50  ;;  %v4986_v50 = vld [vmem:[%s5671_s24 + $0x3d0] ss:$40 sps:$4 sm:$0xff]  }
  0xc8   : > { %1982 = vmatmul.mubr.bf16.gmra.mrb[32].mxu0 %v4854_v18  ;;  %2111 = vmatmul.mubr.bf16.gmra.mrb[32].mxu1 %v4855_v19  ;;  %v5015_v18 = vld [vmem:[%s7114_s1 + $0x238] sm:$0xff]  }
  0xc9   : > { %1989 = vmatprep.mubr.bf16.mxu0 %v4858_v20  ;;  %2118 = vmatprep.mubr.bf16.mxu1 %v4860_v21  ;;  %v4917_v19 = vld [vmem:[%s5671_s24 + $0x150] ss:$40 sps:$4 sm:$0xff]   ;;  %v4922_v20 = vld [vmem:[%s5671_s24 + $0x41c] ss:$40 sps:$4 sm:$0xff]  }
  0xca   : > { %v4924_v21 = vld [vmem:[%s5671_s24 + $0x1a4] ss:$40 sps:$4 sm:$0xff]  }
  0xd0   : > { %1990 = vmatmul.mubr.bf16.gmra.mrb[36].mxu0 %v4862_v26  ;;  %2119 = vmatmul.mubr.bf16.gmra.mrb[36].mxu1 %v4863_v27  ;;  %v4936_v26 = vld [vmem:[%s5671_s24 + $0x468] ss:$40 sps:$4 sm:$0xff]  }
  0xd1   : > { %1997 = vmatprep.mubr.bf16.mxu0 %v4868_v30  ;;  %2126 = vmatprep.mubr.bf16.mxu1 %v4870_v31  ;;  %v4937_v27 = vld [vmem:[%s5671_s24 + $0x1f0] ss:$40 sps:$4 sm:$0xff]   ;;  %v4947_v31 = vld [vmem:[%s5671_s24 + $0x240] ss:$40 sps:$4 sm:$0xff]  }
  0xd2   : > { %v4946_v30 = vld [vmem:[%s5671_s24 + $0x4b8] ss:$40 sps:$4 sm:$0xff]  }
  0xd8   : > { %1998 = vmatmul.mubr.bf16.gmra.mrb[40].mxu0 %v4872_v35  ;;  %2127 = vmatmul.mubr.bf16.gmra.mrb[40].mxu1 %v4873_v36  ;;  %v4959_v35 = vld [vmem:[%s5671_s24 + $0x290] ss:$40 sps:$4 sm:$0xff]   ;;  %v4960_v36 = vld [vmem:[%s5671_s24 + $0x2e4] ss:$40 sps:$4 sm:$0xff]  }
  0xd9   : > { %2005 = vmatprep.mubr.bf16.mxu0 %v4878_v38  ;;  %2134 = vmatprep.mubr.bf16.mxu1 %v4880_v39  ;;  %v4964_v38 = vld [vmem:[%s5671_s24 + $0x2e0] ss:$40 sps:$4 sm:$0xff]  }
  0xda   : > { %v4965_v39 = vld [vmem:[%s5671_s24 + $0x68] ss:$40 sps:$4 sm:$0xff]  }
  0xe0   : > { %2006 = vmatmul.mubr.bf16.gmra.mrb[44].mxu0 %v4882_v43  ;;  %2135 = vmatmul.mubr.bf16.gmra.mrb[44].mxu1 %v4883_v44  ;;  %v4973_v43 = vld [vmem:[%s5671_s24 + $0xb8] ss:$40 sps:$4 sm:$0xff]   ;;  %v4974_v44 = vld [vmem:[%s5671_s24 + $0x384] ss:$40 sps:$4 sm:$0xff]  }
  0xe1   : > { %2142 = vmatprep.mubr.bf16.mxu1 %v4888_v47  ;;  %2239 = vmatprep.mubr.bf16.mxu0 %v4892_v48  ;;  %v4979_v47 = vld [vmem:[%s5671_s24 + $0x108] ss:$40 sps:$4 sm:$0xff]   ;;  %v4982_v48 = vld [vmem:[%s5671_s24 + $0x3d4] ss:$40 sps:$4 sm:$0xff]  }
  0xe8   : > { %2143 = vmatmul.mubr.bf16.gmra.mrb[48].mxu1 %v4893_v52  ;;  %2240 = vmatmul.mubr.bf16.vlgmr.msra.gmra.mrb[48].mxu0 %v4890_v51  ;;  %v4987_v51 = vld [vmem:[%s5671_s24 + $0x158] ss:$40 sps:$4 sm:$0xff]   ;;  %v4988_v52 = vld [vmem:[%s5671_s24 + $0x424] ss:$40 sps:$4 sm:$0xff]  }
  0xe9   : > { %2150 = vmatprep.mubr.bf16.mxu1 %v4894_v53  ;;  %2247 = vmatprep.mubr.bf16.mxu0 %v4896_v54  ;;  %v4990_v53 = vld [vmem:[%s5671_s24 + $0x1ac] ss:$40 sps:$4 sm:$0xff]   ;;  %v4992_v54 = vld [vmem:[%s5671_s24 + $0x420] ss:$40 sps:$4 sm:$0xff]  }
  0xea   : > { %4475 = vmatpush3.bf16.msra.mxu0 %v4951_v55  ;;  %v4993_v55 = vld [vmem:[%s5671_s24 + $0x1a8] ss:$40 sps:$4 sm:$0xff]  }
  0xeb   : > { %4476 = vmatprep.subr.bf16.mxu0 %v4966_v56  ;;  %v4996_v56 = vld [vmem:[%s5671_s24 + $0x474] ss:$40 sps:$4 sm:$0xff]  }
  0xee   : > { %4477 = vmatpush3.bf16.msra.mxu0 %v4967_v59  ;;  %v5001_v59 = vld [vmem:[%s5671_s24 + $0x1f8] ss:$40 sps:$4 sm:$0xff]  }
  0xef   : > { %4478 = vmatprep.subr.bf16.mxu0 %v4980_v60  ;;  %v5006_v60 = vld [vmem:[%s5671_s24 + $0x4c4] ss:$40 sps:$4 sm:$0xff]  }
  0xf0   : > { %2151 = vmatmul.mubr.bf16.gmra.mrb[52].mxu1 %v4898_v57  ;;  %2248 = vmatmul.mubr.bf16.gmra.mrb[52].mxu0 %v4899_v58  ;;  %v4998_v57 = vld [vmem:[%s5671_s24 + $0x1fc] ss:$40 sps:$4 sm:$0xff]   ;;  %v5000_v58 = vld [vmem:[%s5671_s24 + $0x470] ss:$40 sps:$4 sm:$0xff]  }
  0xf1   : > { %2158 = vmatprep.mubr.bf16.mxu1 %v4900_v61  ;;  %2255 = vmatprep.mubr.bf16.mxu0 %v4902_v62  ;;  %v5008_v61 = vld [vmem:[%s5671_s24 + $0x24c] ss:$40 sps:$4 sm:$0xff]  }
  0xf2   : > { %4479 = vmatpush3.bf16.msra.mxu0 %v4981_v63 }
  0xf3   : > { %4480 = vmatprep.subr.bf16.mxu0 %v4994_v1  ;;  %v5010_v1 = vld [vmem:[%s5671_s24 + $0x4c0] ss:$40 sps:$4 sm:$0xff]  }
  0xf6   : > { %4481 = vmatpush3.bf16.msra.mxu0 %v4995_v2  ;;  %v5011_v2 = vld [vmem:[%s5671_s24 + $0x248] ss:$40 sps:$4 sm:$0xff]  }
  0xf7   : > { %4482 = vmatprep.subr.bf16.mxu0 %v5002_v6  ;;  %v5016_v6 = vld [vmem:[%s5671_s24 + $0x29c] ss:$40 sps:$4 sm:$0xff]  }
  0xf8   : > { %2159 = vmatmul.mubr.bf16.gmra.mrb[56].mxu1 %v4904_v0  ;;  %2256 = vmatmul.mubr.bf16.gmra.mrb[56].mxu0 %v4905_v3 }
  0xf9   : > { %2166 = vmatprep.mubr.bf16.mxu1 %v4906_v4  ;;  %2263 = vmatprep.mubr.bf16.mxu0 %v4908_v5 }
  0xfa   : > { %4483 = vmatpush3.bf16.msra.mxu0 %v5003_v7  ;;  %v5020_v7 = vld [vmem:[%s5671_s24 + $0x24] ss:$40 sps:$4 sm:$0xff]  }
  0xfb   : > { %4484 = vmatprep.subr.bf16.mxu0 %v5004_v8 }
  0xfe   : > { %4485 = vmatpush3.bf16.msra.mxu0 %v5005_v9 }
  0xff   : > { %4486 = vmatprep.subr.bf16.mxu0 %v5012_v14 }
 0x100   : > { %2167 = vmatmul.mubr.bf16.gmra.mrb[60].mxu1 %v4910_v10  ;;  %2264 = vmatmul.mubr.bf16.gmra.mrb[60].mxu0 %v4911_v11 }
 0x101   : > { %2174 = vmatprep.mubr.bf16.mxu1 %v4912_v12  ;;  %2271 = vmatprep.mubr.bf16.mxu0 %v4914_v13 }
 0x102   : > { %4487 = vmatpush3.bf16.msra.mxu0 %v5013_v15 }
 0x103   : > { %4488 = vmatprep.subr.bf16.mxu0 %v5014_v16 }
 0x106   : > { %4489 = vmatpush3.bf16.msra.mxu0 %v5015_v18  ;;  %v5021_v18 = vld [vmem:[%s5671_s24 + $0x298] ss:$40 sps:$4 sm:$0xff]  }
 0x108   : > { %2175 = vmatmul.mubr.bf16.gmra.mrb[64].mxu1 %v4916_v17  ;;  %2272 = vmatmul.mubr.bf16.gmra.mrb[64].mxu0 %v4917_v19  ;;  %v5018_v17 = vld [vmem:[%s5671_s24 + $0x20] ss:$40 sps:$4 sm:$0xff]  }
 0x109   : > { %2182 = vmatprep.mubr.bf16.mxu1 %v4922_v20  ;;  %2279 = vmatprep.mubr.bf16.mxu0 %v4924_v21 }
 0x110   : > { %2183 = vmatmul.mubr.bf16.gmra.mrb[68].mxu1 %v4926_v22  ;;  %2280 = vmatmul.mubr.bf16.gmra.mrb[68].mxu0 %v4927_v23  ;;  %v5022_v22 = vld [vmem:[%s5671_s24 + $0x2ec] ss:$40 sps:$4 sm:$0xff]  }
 0x111   : > { %2190 = vmatprep.mubr.bf16.mxu1 %v4932_v24  ;;  %2287 = vmatprep.mubr.bf16.mxu0 %v4934_v25  ;;  %v5024_v23 = vld [vmem:[%s5671_s24 + $0x74] ss:$40 sps:$4 sm:$0xff]  }
 0x118   : > { %2191 = vmatmul.mubr.bf16.gmra.mrb[72].mxu1 %v4936_v26  ;;  %2288 = vmatmul.mubr.bf16.gmra.mrb[72].mxu0 %v4937_v27 }
 0x119   : > { %2198 = vmatprep.mubr.bf16.mxu1 %v4942_v28  ;;  %2295 = vmatprep.mubr.bf16.mxu0 %v4944_v29 }
 0x120   : > { %2199 = vmatmul.mubr.bf16.gmra.mrb[76].mxu1 %v4946_v30  ;;  %2296 = vmatmul.mubr.bf16.gmra.mrb[76].mxu0 %v4947_v31 }
 0x121   : > { %2303 = vmatprep.mubr.bf16.mxu0 %v4954_v32  ;;  %2400 = vmatprep.mubr.bf16.mxu1 %v4958_v33  ;;  %v5026_v33 = vld [vmem:[%s5671_s24 + $0x2e8] ss:$40 sps:$4 sm:$0xff]  }
 0x128   : > { %2304 = vmatmul.mubr.bf16.gmra.mrb[80].mxu0 %v4959_v35  ;;  %2401 = vmatmul.mubr.bf16.vlgmr.msra.gmra.mrb[80].mxu1 %v4956_v34  ;;  %v5027_v34 = vld [vmem:[%s5671_s24 + $0x70] ss:$40 sps:$4 sm:$0xff]  }
 0x129   : > { %2311 = vmatprep.mubr.bf16.mxu0 %v4960_v36  ;;  %2408 = vmatprep.mubr.bf16.mxu1 %v4962_v37 }
 0x130   : > { %2312 = vmatmul.mubr.bf16.gmra.mrb[84].mxu0 %v4964_v38  ;;  %2409 = vmatmul.mubr.bf16.gmra.mrb[84].mxu1 %v4965_v39 }
 0x131   : > { %2319 = vmatprep.mubr.bf16.mxu0 %v4968_v40  ;;  %2416 = vmatprep.mubr.bf16.mxu1 %v4970_v41  ;;  %v5028_v40 = vld [vmem:[%s5671_s24 + $0x33c] ss:$40 sps:$4 sm:$0xff]  }
 0x132   : > { %v5030_v41 = vld [vmem:[%s5671_s24 + $0xc4] ss:$40 sps:$4 sm:$0xff]  }
 0x138   : > { %2320 = vmatmul.mubr.bf16.gmra.mrb[88].mxu0 %v4972_v42  ;;  %2417 = vmatmul.mubr.bf16.gmra.mrb[88].mxu1 %v4973_v43 }
 0x139   : > { %2327 = vmatprep.mubr.bf16.mxu0 %v4974_v44  ;;  %2424 = vmatprep.mubr.bf16.mxu1 %v4976_v45 }
 0x140   : > { %2328 = vmatmul.mubr.bf16.gmra.mrb[92].mxu0 %v4978_v46  ;;  %2425 = vmatmul.mubr.bf16.gmra.mrb[92].mxu1 %v4979_v47 }
 0x141   : > { %2335 = vmatprep.mubr.bf16.mxu0 %v4982_v48  ;;  %2432 = vmatprep.mubr.bf16.mxu1 %v4984_v49 }
 0x148   : > { %2336 = vmatmul.mubr.bf16.gmra.mrb[96].mxu0 %v4986_v50  ;;  %2433 = vmatmul.mubr.bf16.gmra.mrb[96].mxu1 %v4987_v51  ;;  %v5032_v50 = vld [vmem:[%s5671_s24 + $0x338] ss:$40 sps:$4 sm:$0xff]  }
 0x149   : > { %2343 = vmatprep.mubr.bf16.mxu0 %v4988_v52  ;;  %2440 = vmatprep.mubr.bf16.mxu1 %v4990_v53  ;;  %v5033_v51 = vld [vmem:[%s5671_s24 + $0xc0] ss:$40 sps:$4 sm:$0xff]  }
 0x150   : > { %2344 = vmatmul.mubr.bf16.gmra.mrb[100].mxu0 %v4992_v54  ;;  %2441 = vmatmul.mubr.bf16.gmra.mrb[100].mxu1 %v4993_v55 }
 0x151   : > { %2351 = vmatprep.mubr.bf16.mxu0 %v4996_v56  ;;  %2448 = vmatprep.mubr.bf16.mxu1 %v4998_v57  ;;  %v5034_v56 = vld [vmem:[%s5671_s24 + $0x38c] ss:$40 sps:$4 sm:$0xff]  }
 0x152   : > { %v5036_v57 = vld [vmem:[%s5671_s24 + $0x114] ss:$40 sps:$4 sm:$0xff]  }
 0x158   : > { %2352 = vmatmul.mubr.bf16.gmra.mrb[104].mxu0 %v5000_v58  ;;  %2449 = vmatmul.mubr.bf16.gmra.mrb[104].mxu1 %v5001_v59 }
 0x159   : > { %2359 = vmatprep.mubr.bf16.mxu0 %v5006_v60  ;;  %2456 = vmatprep.mubr.bf16.mxu1 %v5008_v61 }
 0x15b   : > { %v4042_v62 = vpop.f32.mrb[0].mxu0  ;;  %v4114_v63 = vpop.f32.mrb[0].mxu1 }
 0x15c   : > { %v4043_v0 = vpop.f32.mrb[1].mxu0  ;;  %v4115_v3 = vpop.f32.mrb[1].mxu1 }
 0x15d   : > { %v6033_v4 = vadd.f32 %v4043_v0, %v4042_v62  ;;  %v4045_v5 = vpop.f32.mrb[2].mxu0  ;;  %v6037_v8 = vadd.f32 %v4115_v3, %v4114_v63  ;;  %v4117_v9 = vpop.f32.mrb[2].mxu1  ;;  %v6079_v62 = vld [vmem:[#allocation4] ss:$0 sm:$0xff]  ;;  %v5038_v3 = vld [vmem:[%s5671_s24 + $0x388] ss:$40 sps:$4 sm:$0xff]  }
 0x15e   : > { %v4046_v10 = vpop.f32.mrb[3].mxu0  ;;  %v4118_v11 = vpop.f32.mrb[3].mxu1 }
 0x15f   : > { %v6039_v12 = vadd.f32 %v4046_v10, %v4045_v5  ;;  %v6041_v13 = vadd.f32 %v4118_v11, %v4117_v9  ;;  %v5039_v5 = vld [vmem:[%s5671_s24 + $0x110] ss:$40 sps:$4 sm:$0xff]  }
 0x160   : > { %2360 = vmatmul.mubr.bf16.gmra.mrb[108].mxu0 %v5010_v1  ;;  %2457 = vmatmul.mubr.bf16.gmra.mrb[108].mxu1 %v5011_v2 }
 0x161   : > { %2464 = vmatprep.mubr.bf16.mxu1 %v5016_v6  ;;  %2561 = vmatprep.mubr.bf16.mxu0 %v5020_v7  ;;  %v1920_v6 = vadd.f32 %v6033_v4, %v6079_v62 }
 0x163   : > { %v4048_v14 = vpop.f32.mrb[4].mxu0  ;;  %v4120_v15 = vpop.f32.mrb[4].mxu1 }
 0x164   : > { %v4049_v16 = vpop.f32.mrb[5].mxu0  ;;  %v4121_v19 = vpop.f32.mrb[5].mxu1 }
 0x165   : > { %v6045_v20 = vadd.f32 %v4049_v16, %v4048_v14  ;;  %v4051_v21 = vpop.f32.mrb[6].mxu0  ;;  %v6049_v24 = vadd.f32 %v4121_v19, %v4120_v15  ;;  %v4123_v25 = vpop.f32.mrb[6].mxu1  ;;  %v5040_v14 = vld [vmem:[%s5671_s24 + $0x3dc] ss:$40 sps:$4 sm:$0xff]  }
 0x166   : > { %v4052_v26 = vpop.f32.mrb[7].mxu0  ;;  %v4124_v27 = vpop.f32.mrb[7].mxu1  ;;  %v5042_v15 = vld [vmem:[%s5671_s24 + $0x164] ss:$40 sps:$4 sm:$0xff]  }
 0x167   : > { %v6051_v28 = vadd.f32 %v4052_v26, %v4051_v21  ;;  %v6053_v29 = vadd.f32 %v4124_v27, %v4123_v25 }
 0x168   : > { %2465 = vmatmul.mubr.bf16.gmra.mrb[112].mxu1 %v5021_v18  ;;  %2562 = vmatmul.mubr.bf16.vlgmr.msra.gmra.mrb[112].mxu0 %v5018_v17  ;;  %v1923_v18 = vadd.f32 %v6039_v12, %v6079_v62  ;;  %v1928_v12 = vadd.f32 %v6045_v20, %v6079_v62 }
 0x169   : > { %2472 = vmatprep.mubr.bf16.mxu1 %v5022_v22  ;;  %2569 = vmatprep.mubr.bf16.mxu0 %v5024_v23 }
 0x16b   : > { %v4054_v30 = vpop.f32.mrb[8].mxu0  ;;  %v4126_v31 = vpop.f32.mrb[8].mxu1 }
 0x16c   : > { %v4055_v32 = vpop.f32.mrb[9].mxu0  ;;  %v4127_v35 = vpop.f32.mrb[9].mxu1 }
 0x16d   : > { %v6057_v36 = vadd.f32 %v4055_v32, %v4054_v30  ;;  %v4057_v37 = vpop.f32.mrb[10].mxu0  ;;  %v6059_v38 = vadd.f32 %v4127_v35, %v4126_v31  ;;  %v4129_v39 = vpop.f32.mrb[10].mxu1  ;;  %v5044_v30 = vld [vmem:[%s5671_s24 + $0x3d8] ss:$40 sps:$4 sm:$0xff]  }
 0x16e   : > { %v4058_v42 = vpop.f32.mrb[11].mxu0  ;;  %v4130_v43 = vpop.f32.mrb[11].mxu1  ;;  %v5045_v31 = vld [vmem:[%s5671_s24 + $0x160] ss:$40 sps:$4 sm:$0xff]  }
 0x16f   : > { %v6063_v44 = vadd.f32 %v4058_v42, %v4057_v37  ;;  %v6065_v45 = vadd.f32 %v4130_v43, %v4129_v39  ;;  %v5046_v37 = vld [vmem:[%s5671_s24 + $0x42c] ss:$40 sps:$4 sm:$0xff]   ;;  %v1931_v42 = vadd.f32 %v6051_v28, %v6079_v62  ;;  %v1936_v28 = vadd.f32 %v6057_v36, %v6079_v62 }
 0x170   : > { %2473 = vmatmul.mubr.bf16.gmra.mrb[116].mxu1 %v5026_v33  ;;  %2570 = vmatmul.mubr.bf16.gmra.mrb[116].mxu0 %v5027_v34  ;;  %v5048_v39 = vld [vmem:[%s5671_s24 + $0x1b4] ss:$40 sps:$4 sm:$0xff]  }
 0x171   : > { %2480 = vmatprep.mubr.bf16.mxu1 %v5028_v40  ;;  %2577 = vmatprep.mubr.bf16.mxu0 %v5030_v41 }
 0x173   : > { %v4060_v46 = vpop.f32.mrb[12].mxu0  ;;  %v4132_v47 = vpop.f32.mrb[12].mxu1 }
 0x174   : > { %v4061_v48 = vpop.f32.mrb[13].mxu0  ;;  %v4133_v49 = vpop.f32.mrb[13].mxu1 }
 0x175   : > { %v6069_v52 = vadd.f32 %v4061_v48, %v4060_v46  ;;  %v4063_v53 = vpop.f32.mrb[14].mxu0  ;;  %v6071_v54 = vadd.f32 %v4133_v49, %v4132_v47  ;;  %v4135_v55 = vpop.f32.mrb[14].mxu1 }
 0x176   : > { %v4064_v58 = vpop.f32.mrb[15].mxu0  ;;  %v4136_v59 = vpop.f32.mrb[15].mxu1 }
 0x177   : > { %v6075_v60 = vadd.f32 %v4064_v58, %v4063_v53  ;;  %v6077_v61 = vadd.f32 %v4136_v59, %v4135_v55  ;;  %v5050_v53 = vld [vmem:[%s5671_s24 + $0x428] ss:$40 sps:$4 sm:$0xff]  }
 0x178   : > { %2481 = vmatmul.mubr.bf16.gmra.mrb[120].mxu1 %v5032_v50  ;;  %2578 = vmatmul.mubr.bf16.gmra.mrb[120].mxu0 %v5033_v51  ;;  %v5051_v55 = vld [vmem:[%s5671_s24 + $0x1b0] ss:$40 sps:$4 sm:$0xff]  }
 0x179   : > { %2488 = vmatprep.mubr.bf16.mxu1 %v5034_v56  ;;  %2585 = vmatprep.mubr.bf16.mxu0 %v5036_v57 }
 0x17b   : > { %v4066_v63 = vpop.f32.mrb[16].mxu0  ;;  %v4154_v0 = vpop.f32.mrb[16].mxu1 }
 0x17c   : > { %v4067_v1 = vpop.f32.mrb[17].mxu0  ;;  %v4155_v2 = vpop.f32.mrb[17].mxu1 }
 0x17d   : > { %v6085_v7 = vadd.f32 %v4067_v1, %v4066_v63  ;;  %v4156_v9 = vadd.f32 %v4155_v2, %v4154_v0  ;;  %v4069_v10 = vpop.f32.mrb[18].mxu0  ;;  %v4157_v11 = vpop.f32.mrb[18].mxu1  ;;  %v5052_v63 = vld [vmem:[%s5671_s24 + $0x47c] ss:$40 sps:$4 sm:$0xff]  }
 0x17e   : > { %v4070_v16 = vpop.f32.mrb[19].mxu0  ;;  %v4158_v17 = vpop.f32.mrb[19].mxu1  ;;  %v5054_v0 = vld [vmem:[%s5671_s24 + $0x204] ss:$40 sps:$4 sm:$0xff]  }
 0x17f   : > { %v6091_v19 = vadd.f32 %v4156_v9, %v1920_v6  ;;  %v6093_v21 = vadd.f32 %v4070_v16, %v4069_v10  ;;  %v4159_v22 = vadd.f32 %v4158_v17, %v4157_v11  ;;  %v5056_v16 = vld [vmem:[%s5671_s24 + $0x478] ss:$40 sps:$4 sm:$0xff]  }
 0x180   : > { %2489 = vmatmul.mubr.bf16.gmra.mrb[124].mxu1 %v5038_v3  ;;  %2586 = vmatmul.mubr.bf16.gmra.mrb[124].mxu0 %v5039_v5  ;;  %v1939_v3 = vadd.f32 %v6063_v44, %v6079_v62  ;;  %v5057_v17 = vld [vmem:[%s5671_s24 + $0x200] ss:$40 sps:$4 sm:$0xff]   ;;  %v1944_v44 = vadd.f32 %v6069_v52, %v6079_v62 }
 0x181   : > { %v6095_v4 = vadd.f32 %v4159_v22, %v1923_v18  ;;  %2496 = vmatprep.mubr.bf16.mxu1 %v5040_v14  ;;  %2593 = vmatprep.mubr.bf16.mxu0 %v5042_v15 }
 0x183   : > { %v4072_v23 = vpop.f32.mrb[20].mxu0  ;;  %v4160_v25 = vpop.f32.mrb[20].mxu1 }
 0x184   : > { %v4073_v26 = vpop.f32.mrb[21].mxu0  ;;  %v4161_v27 = vpop.f32.mrb[21].mxu1 }
 0x185   : > { %v6101_v32 = vadd.f32 %v4073_v26, %v4072_v23  ;;  %v4162_v33 = vadd.f32 %v4161_v27, %v4160_v25  ;;  %v4075_v34 = vpop.f32.mrb[22].mxu0  ;;  %v4163_v35 = vpop.f32.mrb[22].mxu1  ;;  %v5058_v26 = vld [vmem:[%s5671_s24 + $0x4cc] ss:$40 sps:$4 sm:$0xff]  }
 0x186   : > { %v4076_v40 = vpop.f32.mrb[23].mxu0  ;;  %v4164_v41 = vpop.f32.mrb[23].mxu1  ;;  %v5060_v27 = vld [vmem:[%s5671_s24 + $0x254] ss:$40 sps:$4 sm:$0xff]  }
 0x187   : > { %v6107_v43 = vadd.f32 %v4162_v33, %v1928_v12  ;;  %v6109_v46 = vadd.f32 %v4076_v40, %v4075_v34  ;;  %v4165_v47 = vadd.f32 %v4164_v41, %v4163_v35  ;;  %v1947_v12 = vadd.f32 %v6075_v60, %v6079_v62 }
 0x188   : > { %2497 = vmatmul.mubr.bf16.gmra.mrb[128].mxu1 %v5044_v30  ;;  %2594 = vmatmul.mubr.bf16.gmra.mrb[128].mxu0 %v5045_v31  ;;  %v1952_v60 = vadd.f32 %v6085_v7, %v6079_v62 }
 0x189   : > { %v6111_v20 = vadd.f32 %v4165_v47, %v1931_v42  ;;  %2504 = vmatprep.mubr.bf16.mxu1 %v5046_v37  ;;  %2601 = vmatprep.mubr.bf16.mxu0 %v5048_v39  ;;  %v5062_v42 = vld [vmem:[%s5671_s24 + $0x4c8] ss:$40 sps:$4 sm:$0xff]  }
 0x18a   : > { %v5063_v47 = vld [vmem:[%s5671_s24 + $0x250] ss:$40 sps:$4 sm:$0xff]  }
 0x18b   : > { %v4078_v48 = vpop.f32.mrb[24].mxu0  ;;  %v4166_v49 = vpop.f32.mrb[24].mxu1 }
 0x18c   : > { %v4079_v50 = vpop.f32.mrb[25].mxu0  ;;  %v4167_v51 = vpop.f32.mrb[25].mxu1 }
 0x18d   : > { %v6117_v56 = vadd.f32 %v4079_v50, %v4078_v48  ;;  %v4168_v57 = vadd.f32 %v4167_v51, %v4166_v49  ;;  %v4081_v58 = vpop.f32.mrb[26].mxu0  ;;  %v4169_v59 = vpop.f32.mrb[26].mxu1 }
 0x18e   : > { %v4082_v1 = vpop.f32.mrb[27].mxu0  ;;  %v4170_v2 = vpop.f32.mrb[27].mxu1 }
 0x18f   : > { %v6123_v5 = vadd.f32 %v4168_v57, %v1936_v28  ;;  %v6125_v6 = vadd.f32 %v4082_v1, %v4081_v58  ;;  %v4171_v9 = vadd.f32 %v4170_v2, %v4169_v59  ;;  %v1955_v57 = vadd.f32 %v6093_v21, %v6079_v62 }
 0x190   : > { %2505 = vmatmul.mubr.bf16.gmra.mrb[132].mxu1 %v5050_v53  ;;  %2602 = vmatmul.mubr.bf16.gmra.mrb[132].mxu0 %v5051_v55  ;;  %v5064_v53 = vld [vmem:[%s5671_s24 + $0x2a4] ss:$40 sps:$4 sm:$0xff]  }
 0x191   : > { %v6127_v36 = vadd.f32 %v4171_v9, %v1939_v3  ;;  %2512 = vmatprep.mubr.bf16.mxu1 %v5052_v63  ;;  %2609 = vmatprep.mubr.bf16.mxu0 %v5054_v0  ;;  %v5066_v9 = vld [vmem:[%s5671_s24 + $0x2a0] ss:$40 sps:$4 sm:$0xff]  }
 0x193   : > { %v4084_v10 = vpop.f32.mrb[28].mxu0  ;;  %v4172_v11 = vpop.f32.mrb[28].mxu1 }
 0x194   : > { %v4085_v14 = vpop.f32.mrb[29].mxu0  ;;  %v4173_v15 = vpop.f32.mrb[29].mxu1 }
 0x195   : > { %v6133_v18 = vadd.f32 %v4085_v14, %v4084_v10  ;;  %v4174_v22 = vadd.f32 %v4173_v15, %v4172_v11  ;;  %v4087_v23 = vpop.f32.mrb[30].mxu0  ;;  %v4175_v25 = vpop.f32.mrb[30].mxu1  ;;  %v1960_v10 = vadd.f32 %v6101_v32, %v6079_v62 }
 0x196   : > { %v4088_v30 = vpop.f32.mrb[31].mxu0  ;;  %v4176_v31 = vpop.f32.mrb[31].mxu1 }
 0x197   : > { %v6139_v33 = vadd.f32 %v4174_v22, %v1944_v44  ;;  %v6141_v34 = vadd.f32 %v4088_v30, %v4087_v23  ;;  %v4177_v35 = vadd.f32 %v4176_v31, %v4175_v25  ;;  %v1963_v22 = vadd.f32 %v6109_v46, %v6079_v62 }
 0x198   : > { %2513 = vmatmul.mubr.bf16.gmra.mrb[136].mxu1 %v5056_v16  ;;  %2610 = vmatmul.mubr.bf16.gmra.mrb[136].mxu0 %v5057_v17  ;;  %v5067_v16 = vld [vmem:[%s5671_s24 + $0x2f4] ss:$40 sps:$4 sm:$0xff]  }
 0x199   : > { %v6143_v52 = vadd.f32 %v4177_v35, %v1947_v12  ;;  %2520 = vmatprep.mubr.bf16.mxu1 %v5058_v26  ;;  %2617 = vmatprep.mubr.bf16.mxu0 %v5060_v27  ;;  %v5069_v35 = vld [vmem:[%s5671_s24 + $0x2f0] ss:$40 sps:$4 sm:$0xff]  }
 0x19b   : > { %v4090_v37 = vpop.f32.mrb[32].mxu0  ;;  %v4178_v39 = vpop.f32.mrb[32].mxu1 }
 0x19c   : > { %v4091_v40 = vpop.f32.mrb[33].mxu0  ;;  %v4179_v41 = vpop.f32.mrb[33].mxu1 }
 0x19d   : > { %v6149_v48 = vadd.f32 %v4091_v40, %v4090_v37  ;;  %v4180_v49 = vadd.f32 %v4179_v41, %v4178_v39  ;;  %v4093_v50 = vpop.f32.mrb[34].mxu0  ;;  %v4181_v51 = vpop.f32.mrb[34].mxu1  ;;  %v1968_v37 = vadd.f32 %v6117_v56, %v6079_v62 }
 0x19e   : > { %v4094_v55 = vpop.f32.mrb[35].mxu0  ;;  %v4182_v28 = vpop.f32.mrb[35].mxu1 }
 0x19f   : > { %v6154_v58 = vadd.f32 %v4180_v49, %v1952_v60  ;;  %v6156_v59 = vadd.f32 %v4094_v55, %v4093_v50  ;;  %v4183_v63 = vadd.f32 %v4182_v28, %v4181_v51  ;;  %v1971_v49 = vadd.f32 %v6125_v6, %v6079_v62 }
 0x1a0   : > { %2521 = vmatmul.mubr.bf16.gmra.mrb[140].mxu1 %v5062_v42  ;;  %2618 = vmatmul.mubr.bf16.gmra.mrb[140].mxu0 %v5063_v47  ;;  %v5070_v42 = vld [vmem:[%s5671_s24 + $0x344] ss:$40 sps:$4 sm:$0xff]  }
 0x1a1   : > { %v6158_v7 = vadd.f32 %v4183_v63, %v1955_v57  ;;  %2625 = vmatprep.mubr.bf16.mxu0 %v5064_v53 }
 0x1a3   : > { %v4096_v0 = vpop.f32.mrb[36].mxu0  ;;  %v4184_v1 = vpop.f32.mrb[36].mxu1 }
 0x1a4   : > { %v4097_v2 = vpop.f32.mrb[37].mxu0  ;;  %v4185_v3 = vpop.f32.mrb[37].mxu1 }
 0x1a5   : > { %v6163_v21 = vadd.f32 %v4097_v2, %v4096_v0  ;;  %v4186_v11 = vadd.f32 %v4185_v3, %v4184_v1  ;;  %v4099_v14 = vpop.f32.mrb[38].mxu0  ;;  %v4187_v15 = vpop.f32.mrb[38].mxu1  ;;  %v5072_v0 = vld [vmem:[%s5671_s24 + $0x340] ss:$40 sps:$4 sm:$0xff]   ;;  %v1976_v1 = vadd.f32 %v6133_v18, %v6079_v62 }
 0x1a6   : > { %v4100_v17 = vpop.f32.mrb[39].mxu0  ;;  %v4188_v44 = vpop.f32.mrb[39].mxu1 }
 0x1a7   : > { %v6168_v23 = vadd.f32 %v4186_v11, %v1960_v10  ;;  %v6170_v25 = vadd.f32 %v4100_v17, %v4099_v14  ;;  %v4189_v26 = vadd.f32 %v4188_v44, %v4187_v15  ;;  %v5073_v10 = vld [vmem:[%s5671_s24 + $0x394] ss:$40 sps:$4 sm:$0xff]   ;;  %v1979_v15 = vadd.f32 %v6141_v34, %v6079_v62 }
 0x1a8   : > { %2626 = vmatmul.mubr.bf16.gmra.mrb[144].mxu0 %v5066_v9 }
 0x1a9   : > { %v6172_v32 = vadd.f32 %v4189_v26, %v1963_v22  ;;  %2633 = vmatprep.mubr.bf16.mxu0 %v5067_v16 }
 0x1ab   : > { %v4102_v27 = vpop.f32.mrb[40].mxu0  ;;  %v4190_v30 = vpop.f32.mrb[40].mxu1 }
 0x1ac   : > { %v4103_v31 = vpop.f32.mrb[41].mxu0  ;;  %v4191_v12 = vpop.f32.mrb[41].mxu1 }
 0x1ad   : > { %v6177_v39 = vadd.f32 %v4103_v31, %v4102_v27  ;;  %v4192_v46 = vadd.f32 %v4191_v12, %v4190_v30  ;;  %v4105_v40 = vpop.f32.mrb[42].mxu0  ;;  %v4193_v41 = vpop.f32.mrb[42].mxu1  ;;  %v5075_v31 = vld [vmem:[%s5671_s24 + $0x390] ss:$40 sps:$4 sm:$0xff]   ;;  %v1984_v12 = vadd.f32 %v6149_v48, %v6079_v62 }
 0x1ae   : > { %v4106_v47 = vpop.f32.mrb[43].mxu0  ;;  %v4194_v60 = vpop.f32.mrb[43].mxu1 }
 0x1af   : > { %v6182_v50 = vadd.f32 %v4192_v46, %v1968_v37  ;;  %v6184_v51 = vadd.f32 %v4106_v47, %v4105_v40  ;;  %v4195_v53 = vadd.f32 %v4194_v60, %v4193_v41  ;;  %v5076_v40 = vld [vmem:[%s5671_s24 + $0x3e4] ss:$40 sps:$4 sm:$0xff]   ;;  %v1987_v41 = vadd.f32 %v6156_v59, %v6079_v62 }
 0x1b0   : > { %2634 = vmatmul.mubr.bf16.gmra.mrb[148].mxu0 %v5069_v35 }
 0x1b1   : > { %v6186_v56 = vadd.f32 %v4195_v53, %v1971_v49  ;;  %2641 = vmatprep.mubr.bf16.mxu0 %v5070_v42 }
 0x1b3   : > { %v4108_v55 = vpop.f32.mrb[44].mxu0  ;;  %v4196_v28 = vpop.f32.mrb[44].mxu1 }
 0x1b4   : > { %v4109_v57 = vpop.f32.mrb[45].mxu0  ;;  %v4197_v63 = vpop.f32.mrb[45].mxu1 }
 0x1b5   : > { %v6191_v2 = vadd.f32 %v4109_v57, %v4108_v55  ;;  %v4198_v6 = vadd.f32 %v4197_v63, %v4196_v28  ;;  %v4111_v3 = vpop.f32.mrb[46].mxu0  ;;  %v4199_v9 = vpop.f32.mrb[46].mxu1 }
 0x1b6   : > { %v4112_v11 = vpop.f32.mrb[47].mxu0  ;;  %v4200_v14 = vpop.f32.mrb[47].mxu1 }
 0x1b7   : > { %v6196_v16 = vadd.f32 %v4198_v6, %v1976_v1  ;;  %v6198_v17 = vadd.f32 %v4112_v11, %v4111_v3  ;;  %v4201_v44 = vadd.f32 %v4200_v14, %v4199_v9  ;;  %v5078_v1 = vld [vmem:[%s5671_s24 + $0x3e0] ss:$40 sps:$4 sm:$0xff]   ;;  %v1992_v6 = vadd.f32 %v6163_v21, %v6079_v62  ;;  %v5079_v11 = vld [vmem:[%s5671_s24 + $0x434] ss:$40 sps:$4 sm:$0xff]  }
 0x1b8   : > { %2642 = vmatmul.mubr.bf16.gmra.mrb[152].mxu0 %v5072_v0  ;;  %v1995_v14 = vadd.f32 %v6170_v25, %v6079_v62 }
 0x1b9   : > { %v6200_v18 = vadd.f32 %v4201_v44, %v1979_v15  ;;  %2649 = vmatprep.mubr.bf16.mxu0 %v5073_v10 }
 0x1bb   : > { %v4202_v22 = vpop.f32.mrb[48].mxu1  ;;  %v4266_v26 = vpop.f32.mrb[48].mxu0 }
 0x1bc   : > { %v4203_v27 = vpop.f32.mrb[49].mxu1  ;;  %v4267_v30 = vpop.f32.mrb[49].mxu0 }
 0x1bd   : > { %v4204_v35 = vadd.f32 %v4203_v27, %v4202_v22  ;;  %v4268_v34 = vadd.f32 %v4267_v30, %v4266_v26  ;;  %v4205_v37 = vpop.f32.mrb[50].mxu1  ;;  %v4269_v46 = vpop.f32.mrb[50].mxu0 }
 0x1be   : > { %v4206_v42 = vpop.f32.mrb[51].mxu1  ;;  %v4270_v47 = vpop.f32.mrb[51].mxu0 }
 0x1bf   : > { %v6208_v60 = vadd.f32 %v4204_v35, %v1984_v12  ;;  %v6211_v49 = vadd.f32 %v4268_v34, %v6091_v19  ;;  %v4207_v53 = vadd.f32 %v4206_v42, %v4205_v37  ;;  %v4271_v55 = vadd.f32 %v4270_v47, %v4269_v46  ;;  %v5081_v34 = vld [vmem:[%s5671_s24 + $0x430] ss:$40 sps:$4 sm:$0xff]   ;;  %v5082_v42 = vld [vmem:[%s5671_s24 + $0x484] ss:$40 sps:$4 sm:$0xff]  }
 0x1c0   : > { %2650 = vmatmul.mubr.bf16.gmra.mrb[156].mxu0 %v5075_v31  ;;  %v2000_v37 = vadd.f32 %v6177_v39, %v6079_v62  ;;  %v2003_v47 = vadd.f32 %v6184_v51, %v6079_v62 }
 0x1c1   : > { %v6213_v48 = vadd.f32 %v4207_v53, %v1987_v41  ;;  %v6216_v28 = vadd.f32 %v4271_v55, %v6095_v4  ;;  %2657 = vmatprep.mubr.bf16.mxu0 %v5076_v40 }
 0x1c3   : > { %v4208_v57 = vpop.f32.mrb[52].mxu1  ;;  %v4272_v63 = vpop.f32.mrb[52].mxu0 }
 0x1c4   : > { %v4209_v59 = vpop.f32.mrb[53].mxu1  ;;  %v4273_v0 = vpop.f32.mrb[53].mxu0 }
 0x1c5   : > { %v4210_v19 = vadd.f32 %v4209_v59, %v4208_v57  ;;  %v4274_v3 = vadd.f32 %v4273_v0, %v4272_v63  ;;  %v4211_v9 = vpop.f32.mrb[54].mxu1  ;;  %v4275_v10 = vpop.f32.mrb[54].mxu0 }
 0x1c6   : > { %v4212_v4 = vpop.f32.mrb[55].mxu1  ;;  %v4276_v15 = vpop.f32.mrb[55].mxu0 }
 0x1c7   : > { %v6224_v44 = vadd.f32 %v4210_v19, %v1992_v6  ;;  %v6227_v22 = vadd.f32 %v4274_v3, %v6107_v43  ;;  %v4213_v26 = vadd.f32 %v4212_v4, %v4211_v9  ;;  %v4277_v27 = vadd.f32 %v4276_v15, %v4275_v10  ;;  %v5084_v3 = vld [vmem:[%s5671_s24 + $0x480] ss:$40 sps:$4 sm:$0xff]   ;;  %v5085_v4 = vld [vmem:[%s5671_s24 + $0x4d4] ss:$40 sps:$4 sm:$0xff]  }
 0x1c8   : > { %2658 = vmatmul.mubr.bf16.gmra.mrb[160].mxu0 %v5078_v1  ;;  %v2008_v9 = vadd.f32 %v6191_v2, %v6079_v62  ;;  %v2011_v15 = vadd.f32 %v6198_v17, %v6079_v62 }
 0x1c9   : > { %v6229_v21 = vadd.f32 %v4213_v26, %v1995_v14  ;;  %v6232_v30 = vadd.f32 %v4277_v27, %v6111_v20  ;;  %2665 = vmatprep.mubr.bf16.mxu0 %v5079_v11 }
 0x1cb   : > { %v4214_v31 = vpop.f32.mrb[56].mxu1  ;;  %v4278_v12 = vpop.f32.mrb[56].mxu0 }
 0x1cc   : > { %v4215_v25 = vpop.f32.mrb[57].mxu1  ;;  %v4279_v35 = vpop.f32.mrb[57].mxu0 }
 0x1cd   : > { %v4216_v43 = vadd.f32 %v4215_v25, %v4214_v31  ;;  %v4280_v46 = vadd.f32 %v4279_v35, %v4278_v12  ;;  %v4217_v40 = vpop.f32.mrb[58].mxu1  ;;  %v4281_v41 = vpop.f32.mrb[58].mxu0 }
 0x1ce   : > { %v4218_v20 = vpop.f32.mrb[59].mxu1  ;;  %v4282_v53 = vpop.f32.mrb[59].mxu0 }
 0x1cf   : > { %v6240_v55 = vadd.f32 %v4216_v43, %v2000_v37  ;;  %v6243_v57 = vadd.f32 %v4280_v46, %v6123_v5  ;;  %v4219_v63 = vadd.f32 %v4218_v20, %v4217_v40  ;;  %v4283_v59 = vadd.f32 %v4282_v53, %v4281_v41  ;;  %v5087_v46 = vld [vmem:[%s5671_s24 + $0x4d0] ss:$40 sps:$4 sm:$0xff]  }
 0x1d0   : > { %2666 = vmatmul.mubr.bf16.gmra.mrb[164].mxu0 %v5081_v34  ;;  %v2016_v40 = vadd.f32 %v6037_v8, %v6079_v62  ;;  %v2019_v20 = vadd.f32 %v6041_v13, %v6079_v62  ;;  %v2024_v13 = vadd.f32 %v6049_v24, %v6079_v62 }
 0x1d1   : > { %v6245_v39 = vadd.f32 %v4219_v63, %v2003_v47  ;;  %v6248_v0 = vadd.f32 %v4283_v59, %v6127_v36  ;;  %2673 = vmatprep.mubr.bf16.mxu0 %v5082_v42 }
 0x1d3   : > { %v4220_v1 = vpop.f32.mrb[60].mxu1  ;;  %v4284_v6 = vpop.f32.mrb[60].mxu0 }
 0x1d4   : > { %v4221_v51 = vpop.f32.mrb[61].mxu1  ;;  %v4285_v19 = vpop.f32.mrb[61].mxu0 }
 0x1d5   : > { %v4222_v5 = vadd.f32 %v4221_v51, %v4220_v1  ;;  %v4286_v10 = vadd.f32 %v4285_v19, %v4284_v6  ;;  %v4223_v11 = vpop.f32.mrb[62].mxu1  ;;  %v4287_v14 = vpop.f32.mrb[62].mxu0 }
 0x1d6   : > { %v4224_v36 = vpop.f32.mrb[63].mxu1  ;;  %v4288_v26 = vpop.f32.mrb[63].mxu0 }
 0x1d7   : > { %v6256_v27 = vadd.f32 %v4222_v5, %v2008_v9  ;;  %v6259_v31 = vadd.f32 %v4286_v10, %v6139_v33  ;;  %v4225_v12 = vadd.f32 %v4224_v36, %v4223_v11  ;;  %v4289_v25 = vadd.f32 %v4288_v26, %v4287_v14 }
 0x1d8   : > { %2674 = vmatmul.mubr.bf16.gmra.mrb[168].mxu0 %v5084_v3 }
 0x1d9   : > { %v6261_v2 = vadd.f32 %v4225_v12, %v2011_v15  ;;  %v6264_v35 = vadd.f32 %v4289_v25, %v6143_v52  ;;  %2681 = vmatprep.mubr.bf16.mxu0 %v5085_v4  ;;  %v2027_v4 = vadd.f32 %v6053_v29, %v6079_v62  ;;  %v2032_v29 = vadd.f32 %v6059_v38, %v6079_v62 }
 0x1db   : > { %v4226_v34 = vpop.f32.mrb[64].mxu1  ;;  %v4290_v37 = vpop.f32.mrb[64].mxu0 }
 0x1dc   : > { %v4227_v43 = vpop.f32.mrb[65].mxu1  ;;  %v4291_v17 = vpop.f32.mrb[65].mxu0 }
 0x1dd   : > { %v4228_v41 = vadd.f32 %v4227_v43, %v4226_v34  ;;  %v4292_v33 = vadd.f32 %v4291_v17, %v4290_v37  ;;  %v4229_v42 = vpop.f32.mrb[66].mxu1  ;;  %v4293_v47 = vpop.f32.mrb[66].mxu0 }
 0x1de   : > { %v4230_v53 = vpop.f32.mrb[67].mxu1  ;;  %v4294_v63 = vpop.f32.mrb[67].mxu0 }
 0x1df   : > { %v6271_v52 = vadd.f32 %v4228_v41, %v2016_v40  ;;  %v6274_v59 = vadd.f32 %v4292_v33, %v6154_v58  ;;  %v4231_v1 = vadd.f32 %v4230_v53, %v4229_v42  ;;  %v4295_v6 = vadd.f32 %v4294_v63, %v4293_v47 }
 0x1e0   : > { %2682 = vmatmul.mubr.bf16.gmra.mrb[172].mxu0 %v5087_v46 }
 0x1e1   : > { %v6276_v51 = vadd.f32 %v4231_v1, %v2019_v20  ;;  %v6279_v8 = vadd.f32 %v4295_v6, %v6158_v7 }
 0x1e3   : > { %v4232_v19 = vpop.f32.mrb[68].mxu1  ;;  %v4296_v3 = vpop.f32.mrb[68].mxu0 }
 0x1e4   : > { %v4233_v9 = vpop.f32.mrb[69].mxu1  ;;  %v4297_v5 = vpop.f32.mrb[69].mxu0 }
 0x1e5   : > { %v4234_v10 = vadd.f32 %v4233_v9, %v4232_v19  ;;  %v4298_v11 = vadd.f32 %v4297_v5, %v4296_v3  ;;  %v4235_v14 = vpop.f32.mrb[70].mxu1  ;;  %v4299_v58 = vpop.f32.mrb[70].mxu0 }
 0x1e6   : > { %v4236_v15 = vpop.f32.mrb[71].mxu1  ;;  %v4300_v36 = vpop.f32.mrb[71].mxu0 }
 0x1e7   : > { %v6285_v26 = vadd.f32 %v4234_v10, %v2024_v13  ;;  %v6288_v7 = vadd.f32 %v4298_v11, %v6168_v23  ;;  %v4237_v12 = vadd.f32 %v4236_v15, %v4235_v14  ;;  %v4301_v25 = vadd.f32 %v4300_v36, %v4299_v58 }
 0x1e8   : > { %v2035_v23 = vadd.f32 %v6065_v45, %v6079_v62  ;;  %v2040_v45 = vadd.f32 %v6071_v54, %v6079_v62 }
 0x1e9   : > { %v6290_v34 = vadd.f32 %v4237_v12, %v2027_v4  ;;  %v6293_v24 = vadd.f32 %v4301_v25, %v6172_v32 }
 0x1eb   : > { %v4238_v37 = vpop.f32.mrb[72].mxu1  ;;  %v4302_v43 = vpop.f32.mrb[72].mxu0 }
 0x1ec   : > { %v4239_v17 = vpop.f32.mrb[73].mxu1  ;;  %v4303_v46 = vpop.f32.mrb[73].mxu0 }
 0x1ed   : > { %v4240_v40 = vadd.f32 %v4239_v17, %v4238_v37  ;;  %v4304_v41 = vadd.f32 %v4303_v46, %v4302_v43  ;;  %v4241_v33 = vpop.f32.mrb[74].mxu1  ;;  %v4305_v42 = vpop.f32.mrb[74].mxu0  ;;  %v6323_v17 = vld [vmem:[#allocation6] sm:$0xff]  }
 0x1ee   : > { %v4242_v47 = vpop.f32.mrb[75].mxu1  ;;  %v4306_v20 = vpop.f32.mrb[75].mxu0  ;;  %4626 = vmatprep.mubr.msk.bf16.mxu1 %vm2942_vm0, %v6323_v17 }
 0x1ef   : > { %v6299_v53 = vadd.f32 %v4240_v40, %v2032_v29  ;;  %v6302_v32 = vadd.f32 %v4304_v41, %v6182_v50  ;;  %v4243_v63 = vadd.f32 %v4242_v47, %v4241_v33  ;;  %v4307_v1 = vadd.f32 %v4306_v20, %v4305_v42 }
 0x1f0   : > { %v2043_v50 = vadd.f32 %v6077_v61, %v6079_v62 }
 0x1f1   : > { %v6304_v6 = vadd.f32 %v4243_v63, %v2035_v23  ;;  %v6307_v38 = vadd.f32 %v4307_v1, %v6186_v56 }
 0x1f3   : > { %v4244_v19 = vpop.f32.mrb[76].mxu1  ;;  %v4308_v3 = vpop.f32.mrb[76].mxu0 }
 0x1f4   : > { %v4245_v9 = vpop.f32.mrb[77].mxu1  ;;  %v4309_v5 = vpop.f32.mrb[77].mxu0 }
 0x1f5   : > { %v4246_v13 = vadd.f32 %v4245_v9, %v4244_v19  ;;  %v4310_v10 = vadd.f32 %v4309_v5, %v4308_v3  ;;  %v4247_v11 = vpop.f32.mrb[78].mxu1  ;;  %v4311_v14 = vpop.f32.mrb[78].mxu0 }
 0x1f6   : > { %v4248_v58 = vpop.f32.mrb[79].mxu1  ;;  %v4312_v4 = vpop.f32.mrb[79].mxu0 }
 0x1f7   : > { %v6313_v15 = vadd.f32 %v4246_v13, %v2040_v45  ;;  %v6316_v56 = vadd.f32 %v4310_v10, %v6196_v16  ;;  %v4249_v36 = vadd.f32 %v4248_v58, %v4247_v11  ;;  %v4313_v12 = vadd.f32 %v4312_v4, %v4311_v14 }
 0x1f9   : > { %v6318_v25 = vadd.f32 %v4249_v36, %v2043_v50  ;;  %v6321_v54 = vadd.f32 %v4313_v12, %v6200_v18 }
 0x1fb   : > { %v4314_v37 = vpop.f32.mrb[80].mxu0  ;;  %v4378_v43 = vpop.f32.mrb[80].mxu1 }
 0x1fc   : > { %v4315_v46 = vpop.f32.mrb[81].mxu0  ;;  %v4379_v61 = vpop.f32.mrb[81].mxu1 }
 0x1fd   : > { %v4316_v62 = vadd.f32 %v4315_v46, %v4314_v37  ;;  %v4380_v29 = vadd.f32 %v4379_v61, %v4378_v43  ;;  %v4317_v40 = vpop.f32.mrb[82].mxu0  ;;  %v4381_v41 = vpop.f32.mrb[82].mxu1 }
 0x1fe   : > { %v4318_v16 = vpop.f32.mrb[83].mxu0  ;;  %v4382_v33 = vpop.f32.mrb[83].mxu1 }
 0x1ff   : > { %v6328_v42 = vadd.f32 %v4316_v62, %v6208_v60  ;;  %v6331_v18 = vadd.f32 %v4380_v29, %v6211_v49  ;;  %v4319_v23 = vadd.f32 %v4318_v16, %v4317_v40  ;;  %v4383_v47 = vadd.f32 %v4382_v33, %v4381_v41 }
 0x201   : > { %v6334_v20 = vadd.f32 %v4319_v23, %v6213_v48  ;;  %v6337_v63 = vadd.f32 %v4383_v47, %v6216_v28 }
 0x203   : > { %v4320_v1 = vpop.f32.mrb[84].mxu0  ;;  %v4384_v19 = vpop.f32.mrb[84].mxu1 }
 0x204   : > { %v4321_v3 = vpop.f32.mrb[85].mxu0  ;;  %v4385_v9 = vpop.f32.mrb[85].mxu1 }
 0x205   : > { %v4322_v5 = vadd.f32 %v4321_v3, %v4320_v1  ;;  %v4386_v45 = vadd.f32 %v4385_v9, %v4384_v19  ;;  %v4323_v13 = vpop.f32.mrb[86].mxu0  ;;  %v4387_v60 = vpop.f32.mrb[86].mxu1 }
 0x206   : > { %v4324_v10 = vpop.f32.mrb[87].mxu0  ;;  %v4388_v11 = vpop.f32.mrb[87].mxu1 }
 0x207   : > { %v6340_v49 = vadd.f32 %v4322_v5, %v6224_v44  ;;  %v6343_v14 = vadd.f32 %v4386_v45, %v6227_v22  ;;  %v4325_v48 = vadd.f32 %v4324_v10, %v4323_v13  ;;  %v4389_v50 = vadd.f32 %v4388_v11, %v4387_v60 }
 0x209   : > { %v6346_v28 = vadd.f32 %v4325_v48, %v6229_v21  ;;  %v6349_v58 = vadd.f32 %v4389_v50, %v6232_v30 }
 0x20b   : > { %v4326_v4 = vpop.f32.mrb[88].mxu0  ;;  %v4390_v36 = vpop.f32.mrb[88].mxu1 }
 0x20c   : > { %v4327_v12 = vpop.f32.mrb[89].mxu0  ;;  %v4391_v37 = vpop.f32.mrb[89].mxu1 }
 0x20d   : > { %v4328_v43 = vadd.f32 %v4327_v12, %v4326_v4  ;;  %v4392_v46 = vadd.f32 %v4391_v37, %v4390_v36  ;;  %v4329_v61 = vpop.f32.mrb[90].mxu0  ;;  %v4393_v44 = vpop.f32.mrb[90].mxu1 }
 0x20e   : > { %v4330_v62 = vpop.f32.mrb[91].mxu0  ;;  %v4394_v29 = vpop.f32.mrb[91].mxu1 }
 0x20f   : > { %v6352_v22 = vadd.f32 %v4328_v43, %v6240_v55  ;;  %v6355_v40 = vadd.f32 %v4392_v46, %v6243_v57  ;;  %v4331_v21 = vadd.f32 %v4330_v62, %v4329_v61  ;;  %v4395_v41 = vadd.f32 %v4394_v29, %v4393_v44 }
 0x211   : > { %v6358_v30 = vadd.f32 %v4331_v21, %v6245_v39  ;;  %v6361_v16 = vadd.f32 %v4395_v41, %v6248_v0 }
 0x213   : > { %v4332_v33 = vpop.f32.mrb[92].mxu0  ;;  %v4396_v23 = vpop.f32.mrb[92].mxu1 }
 0x214   : > { %v4333_v47 = vpop.f32.mrb[93].mxu0  ;;  %v4397_v1 = vpop.f32.mrb[93].mxu1 }
 0x215   : > { %v4334_v19 = vadd.f32 %v4333_v47, %v4332_v33  ;;  %v4398_v3 = vadd.f32 %v4397_v1, %v4396_v23  ;;  %v4335_v9 = vpop.f32.mrb[94].mxu0  ;;  %v4399_v55 = vpop.f32.mrb[94].mxu1 }
 0x216   : > { %v4336_v5 = vpop.f32.mrb[95].mxu0  ;;  %v4400_v45 = vpop.f32.mrb[95].mxu1 }
 0x217   : > { %v6364_v57 = vadd.f32 %v4334_v19, %v6256_v27  ;;  %v6367_v13 = vadd.f32 %v4398_v3, %v6259_v31  ;;  %v4337_v39 = vadd.f32 %v4336_v5, %v4335_v9  ;;  %v4401_v60 = vadd.f32 %v4400_v45, %v4399_v55 }
 0x219   : > { %v6370_v0 = vadd.f32 %v4337_v39, %v6261_v2  ;;  %v6373_v10 = vadd.f32 %v4401_v60, %v6264_v35 }
 0x21b   : > { %v4338_v11 = vpop.f32.mrb[96].mxu0  ;;  %v4402_v48 = vpop.f32.mrb[96].mxu1 }
 0x21c   : > { %v4339_v50 = vpop.f32.mrb[97].mxu0  ;;  %v4403_v4 = vpop.f32.mrb[97].mxu1 }
 0x21d   : > { %v4340_v36 = vadd.f32 %v4339_v50, %v4338_v11  ;;  %v4404_v12 = vadd.f32 %v4403_v4, %v4402_v48  ;;  %v4341_v37 = vpop.f32.mrb[98].mxu0  ;;  %v4405_v27 = vpop.f32.mrb[98].mxu1 }
 0x21e   : > { %v4342_v43 = vpop.f32.mrb[99].mxu0  ;;  %v4406_v46 = vpop.f32.mrb[99].mxu1 }
 0x21f   : > { %v6376_v31 = vadd.f32 %v4340_v36, %v6271_v52  ;;  %v6379_v61 = vadd.f32 %v4404_v12, %v6274_v59  ;;  %v4343_v2 = vadd.f32 %v4342_v43, %v4341_v37  ;;  %v4407_v44 = vadd.f32 %v4406_v46, %v4405_v27 }
 0x221   : > { %v6382_v35 = vadd.f32 %v4343_v2, %v6276_v51  ;;  %v6385_v62 = vadd.f32 %v4407_v44, %v6279_v8 }
 0x223   : > { %v4344_v29 = vpop.f32.mrb[100].mxu0  ;;  %v4408_v21 = vpop.f32.mrb[100].mxu1 }
 0x224   : > { %v4345_v41 = vpop.f32.mrb[101].mxu0  ;;  %v4409_v33 = vpop.f32.mrb[101].mxu1 }
 0x225   : > { %v4346_v23 = vadd.f32 %v4345_v41, %v4344_v29  ;;  %v4410_v47 = vadd.f32 %v4409_v33, %v4408_v21  ;;  %v4347_v1 = vpop.f32.mrb[102].mxu0  ;;  %v4411_v52 = vpop.f32.mrb[102].mxu1 }
 0x226   : > { %v4348_v19 = vpop.f32.mrb[103].mxu0  ;;  %v4412_v3 = vpop.f32.mrb[103].mxu1 }
 0x227   : > { %v6388_v59 = vadd.f32 %v4346_v23, %v6285_v26  ;;  %v6391_v9 = vadd.f32 %v4410_v47, %v6288_v7  ;;  %v4349_v51 = vadd.f32 %v4348_v19, %v4347_v1  ;;  %v4413_v55 = vadd.f32 %v4412_v3, %v4411_v52 }
 0x229   : > { %v6394_v8 = vadd.f32 %v4349_v51, %v6290_v34  ;;  %v6397_v5 = vadd.f32 %v4413_v55, %v6293_v24 }
 0x22b   : > { %v4350_v45 = vpop.f32.mrb[104].mxu0  ;;  %v4414_v39 = vpop.f32.mrb[104].mxu1 }
 0x22c   : > { %v4351_v60 = vpop.f32.mrb[105].mxu0  ;;  %v4415_v11 = vpop.f32.mrb[105].mxu1 }
 0x22d   : > { %v4352_v48 = vadd.f32 %v4351_v60, %v4350_v45  ;;  %v4416_v50 = vadd.f32 %v4415_v11, %v4414_v39  ;;  %v4353_v4 = vpop.f32.mrb[106].mxu0  ;;  %v4417_v26 = vpop.f32.mrb[106].mxu1 }
 0x22e   : > { %v4354_v36 = vpop.f32.mrb[107].mxu0  ;;  %v4418_v12 = vpop.f32.mrb[107].mxu1 }
 0x22f   : > { %v6400_v7 = vadd.f32 %v4352_v48, %v6299_v53  ;;  %v6403_v37 = vadd.f32 %v4416_v50, %v6302_v32  ;;  %v4355_v34 = vadd.f32 %v4354_v36, %v4353_v4  ;;  %v4419_v27 = vadd.f32 %v4418_v12, %v4417_v26 }
 0x231   : > { %v6406_v24 = vadd.f32 %v4355_v34, %v6304_v6  ;;  %v6409_v43 = vadd.f32 %v4419_v27, %v6307_v38 }
 0x233   : > { %v4356_v46 = vpop.f32.mrb[108].mxu0  ;;  %v4420_v2 = vpop.f32.mrb[108].mxu1 }
 0x234   : > { %v4357_v44 = vpop.f32.mrb[109].mxu0  ;;  %v4421_v29 = vpop.f32.mrb[109].mxu1 }
 0x235   : > { %v4358_v21 = vadd.f32 %v4357_v44, %v4356_v46  ;;  %v4422_v41 = vadd.f32 %v4421_v29, %v4420_v2  ;;  %v4359_v33 = vpop.f32.mrb[110].mxu0  ;;  %v4423_v53 = vpop.f32.mrb[110].mxu1 }
 0x236   : > { %v4360_v23 = vpop.f32.mrb[111].mxu0  ;;  %v4424_v47 = vpop.f32.mrb[111].mxu1 }
 0x237   : > { %v6412_v32 = vadd.f32 %v4358_v21, %v6313_v15  ;;  %v6415_v1 = vadd.f32 %v4422_v41, %v6316_v56  ;;  %v4361_v6 = vadd.f32 %v4360_v23, %v4359_v33  ;;  %v4425_v52 = vadd.f32 %v4424_v47, %v4423_v53 }
 0x239   : > { %v6418_v38 = vadd.f32 %v4361_v6, %v6318_v25  ;;  %v6421_v19 = vadd.f32 %v4425_v52, %v6321_v54 }
 0x23b   : > { %v4426_v3 = vpop.f32.mrb[112].mxu1  ;;  %v4490_v51 = vpop.f32.mrb[112].mxu0 }
 0x23c   : > { %v4427_v55 = vpop.f32.mrb[113].mxu1  ;;  %v4491_v45 = vpop.f32.mrb[113].mxu0 }
 0x23d   : > { %v4428_v39 = vadd.f32 %v4427_v55, %v4426_v3  ;;  %v4492_v60 = vadd.f32 %v4491_v45, %v4490_v51  ;;  %v4429_v11 = vpop.f32.mrb[114].mxu1  ;;  %v4493_v15 = vpop.f32.mrb[114].mxu0 }
 0x23e   : > { %v4430_v48 = vpop.f32.mrb[115].mxu1  ;;  %v4494_v50 = vpop.f32.mrb[115].mxu0 }
 0x23f   : > { %v6424_v56 = vadd.f32 %v4428_v39, %v6328_v42  ;;  %v2564_v4 = vadd.f32 %v4492_v60, %v6331_v18  ;;  %v4431_v25 = vadd.f32 %v4430_v48, %v4429_v11  ;;  %v4495_v26 = vadd.f32 %v4494_v50, %v4493_v15 }
 0x241   : > { %v2690_v36 = vsub.f32 0.0, %v2564_v4  ;;  %v6428_v54 = vadd.f32 %v4431_v25, %v6334_v20  ;;  %v2567_v12 = vadd.f32 %v4495_v26, %v6337_v63 }
 0x243   : > { %v2722_v34 = vmul.f32 1.442695, %v2690_v36  ;;  %v2691_v27 = vsub.f32 0.0, %v2567_v12  ;;  %v4432_v46 = vpop.f32.mrb[116].mxu1  ;;  %v4496_v2 = vpop.f32.mrb[116].mxu0 }
 0x244   : > { %v4433_v44 = vpop.f32.mrb[117].mxu1  ;;  %v4497_v29 = vpop.f32.mrb[117].mxu0 }
 0x245   : > { %5092 = vpow2.f32 %v2722_v34  ;;  %v2724_v21 = vmul.f32 1.442695, %v2691_v27  ;;  %v4434_v42 = vadd.f32 %v4433_v44, %v4432_v46  ;;  %v4498_v41 = vadd.f32 %v4497_v29, %v4496_v2  ;;  %v4435_v33 = vpop.f32.mrb[118].mxu1  ;;  %v4499_v18 = vpop.f32.mrb[118].mxu0  ;;  %v2875_v44 = vld [vmem:[%s7117_s4 + $0x8] sm:$0xff] }
 0x246   : > { %v4436_v53 = vpop.f32.mrb[119].mxu1  ;;  %v4500_v23 = vpop.f32.mrb[119].mxu0 }
 0x247   : > { %5094 = vpow2.f32 %v2724_v21  ;;  %v6432_v20 = vadd.f32 %v4434_v42, %v6340_v49  ;;  %v2572_v63 = vadd.f32 %v4498_v41, %v6343_v14  ;;  %v4437_v47 = vadd.f32 %v4436_v53, %v4435_v33  ;;  %v2874_v49 = vld [vmem:[%s7117_s4] sm:$0xff]  ;;  %v2876_v14 = vld [vmem:[%s7117_s4 + $0x10] sm:$0xff] }
 0x248   : > { %v4501_v6 = vadd.f32 %v4500_v23, %v4499_v18 }
 0x249   : > { %v2692_v52 = vsub.f32 0.0, %v2572_v63  ;;  %v6436_v3 = vadd.f32 %v4437_v47, %v6346_v28  ;;  %v2878_v47 = vld [vmem:[%s7117_s4 + $0x20] sm:$0xff] }
 0x24a   : > { %v2575_v51 = vadd.f32 %v4501_v6, %v6349_v58  ;;  %v5482_v58 = vmov 0  }
 0x24b   : > { %v2726_v55 = vmul.f32 1.442695, %v2692_v52  ;;  %v4438_v45 = vpop.f32.mrb[120].mxu1  ;;  %v4502_v39 = vpop.f32.mrb[120].mxu0  ;;  %4766 = vset.pattern.permute.xlu0 %v5482_v58  ;;  %4767 = vset.pattern.permute.xlu1 %v5482_v58 }
 0x24c   : > { %v2693_v60 = vsub.f32 0.0, %v2575_v51  ;;  %v4439_v11 = vpop.f32.mrb[121].mxu1  ;;  %v4503_v15 = vpop.f32.mrb[121].mxu0  ;;  %2884 = vperm.xlu0 %4766, %v2874_v49   ;;  %2894 = vperm.xlu1 %4767, %v2876_v14  }
 0x24d   : > { %5096 = vpow2.f32 %v2726_v55  ;;  %v4440_v48 = vadd.f32 %v4439_v11, %v4438_v45  ;;  %v4504_v28 = vadd.f32 %v4503_v15, %v4502_v39  ;;  %v4441_v50 = vpop.f32.mrb[122].mxu1  ;;  %v4505_v4 = vpop.f32.mrb[122].mxu0 }
 0x24e   : > { %v2728_v25 = vmul.f32 1.442695, %v2693_v60  ;;  %v4442_v26 = vpop.f32.mrb[123].mxu1  ;;  %v4506_v36 = vpop.f32.mrb[123].mxu0 }
 0x24f   : > { %v5093_v12 = vpop.eup %5092  ;;  %v6446_v34 = vadd.f32 %v4440_v48, %v6352_v22  ;;  %v2580_v27 = vadd.f32 %v4504_v28, %v6355_v40  ;;  %v4443_v46 = vadd.f32 %v4442_v26, %v4441_v50  ;;  %v4507_v2 = vadd.f32 %v4506_v36, %v4505_v4  ;;  %v2877_v22 = vld [vmem:[%s7117_s4 + $0x18] sm:$0xff]  ;;  %v2880_v28 = vld [vmem:[%s7117_s4 + $0x30] sm:$0xff] }
 0x250   : > { %v2786_v29 = vadd.f32 1.0, %v5093_v12  ;;  %5098 = vpow2.f32 %v2728_v25  ;;  %2889 = vperm.xlu0 %4766, %v2875_v44   ;;  %2899 = vperm.xlu1 %4767, %v2877_v22  }
 0x251   : > { %v5095_v21 = vpop.eup %5094  ;;  %v2694_v42 = vsub.f32 0.0, %v2580_v27  ;;  %v6453_v41 = vadd.f32 %v4443_v46, %v6358_v30  ;;  %v2583_v33 = vadd.f32 %v4507_v2, %v6361_v16  ;;  %v2879_v16 = vld [vmem:[%s7117_s4 + $0x28] sm:$0xff] }
 0x252   : > { %v2787_v18 = vadd.f32 1.0, %v5095_v21  ;;  %5100 = vrcp.f32 %v2786_v29 }
 0x253   : > { %v2730_v40 = vmul.f32 1.442695, %v2694_v42  ;;  %v2695_v53 = vsub.f32 0.0, %v2583_v33  ;;  %v4444_v23 = vpop.f32.mrb[124].mxu1  ;;  %v4508_v63 = vpop.f32.mrb[124].mxu0 }
 0x254   : > { %5102 = vrcp.f32 %v2787_v18  ;;  %v4445_v30 = vpop.f32.mrb[125].mxu1  ;;  %v4509_v6 = vpop.f32.mrb[125].mxu0  ;;  %2904 = vperm.xlu0 %4766, %v2878_v47   ;;  %2909 = vperm.xlu1 %4767, %v2879_v16  }
 0x255   : > { %5104 = vpow2.f32 %v2730_v40  ;;  %v2732_v52 = vmul.f32 1.442695, %v2695_v53  ;;  %v4446_v51 = vadd.f32 %v4445_v30, %v4444_v23  ;;  %v4510_v55 = vadd.f32 %v4509_v6, %v4508_v63  ;;  %v4447_v45 = vpop.f32.mrb[126].mxu1  ;;  %v4511_v39 = vpop.f32.mrb[126].mxu0 }
 0x256   : > { %v4448_v60 = vpop.f32.mrb[127].mxu1  ;;  %v4512_v11 = vpop.f32.mrb[127].mxu0 }
 0x257   : > { %v5097_v15 = vpop.eup %5096  ;;  %5106 = vpow2.f32 %v2732_v52  ;;  %v6466_v49 = vadd.f32 %v4446_v51, %v6364_v57  ;;  %v2588_v14 = vadd.f32 %v4510_v55, %v6367_v13  ;;  %v4449_v48 = vadd.f32 %v4448_v60, %v4447_v45  ;;  %v2881_v57 = vld [vmem:[%s7117_s4 + $0x38] sm:$0xff] }
 0x258   : > { %v2788_v50 = vadd.f32 1.0, %v5097_v15  ;;  %v4513_v4 = vadd.f32 %v4512_v11, %v4511_v39  ;;  %2914 = vperm.xlu0 %4766, %v2880_v28   ;;  %2919 = vperm.xlu1 %4767, %v2881_v57  }
 0x259   : > { %v2696_v58 = vsub.f32 0.0, %v2588_v14  ;;  %v6473_v25 = vadd.f32 %v4449_v48, %v6370_v0 }
 0x25a   : > { %v5099_v26 = vpop.eup %5098  ;;  %v2591_v36 = vadd.f32 %v4513_v4, %v6373_v10  ;;  %5108 = vrcp.f32 %v2788_v50 }
 0x25b   : > { %v2789_v13 = vadd.f32 1.0, %v5099_v26  ;;  %v2734_v12 = vmul.f32 1.442695, %v2696_v58  ;;  %v4450_v27 = vpop.f32.mrb[128].mxu1  ;;  %v4514_v46 = vpop.f32.mrb[128].mxu0 }
 0x25c   : > { %v2697_v2 = vsub.f32 0.0, %v2591_v36  ;;  %v4451_v44 = vpop.f32.mrb[129].mxu1  ;;  %v4515_v29 = vpop.f32.mrb[129].mxu0 }
 0x25d   : > { %v5101_v21 = vpop.eup %5100  ;;  %5110 = vrcp.f32 %v2789_v13  ;;  %v4452_v0 = vadd.f32 %v4451_v44, %v4450_v27  ;;  %v4516_v42 = vadd.f32 %v4515_v29, %v4514_v46  ;;  %v4453_v33 = vpop.f32.mrb[130].mxu1 }
 0x25e   : > { %v4517_v10 = vpop.f32.mrb[130].mxu0  ;;  %v5103_v18 = vpop.eup %5102  ;;  %5112 = vpow2.f32 %v2734_v12  ;;  %v2736_v22 = vmul.f32 1.442695, %v2697_v2 }
 0x25f   : > { %v4454_v40 = vpop.f32.mrb[131].mxu1  ;;  %v4518_v53 = vpop.f32.mrb[131].mxu0  ;;  %v6480_v63 = vadd.f32 %v4452_v0, %v6376_v31  ;;  %v2596_v47 = vadd.f32 %v4516_v42, %v6379_v61  ;;  %v2850_v52 = vpack.c.bf16 %v5103_v18, %v5101_v21 }
 0x260   : > { %v5105_v23 = vpop.eup %5104  ;;  %v4455_v30 = vadd.f32 %v4454_v40, %v4453_v33  ;;  %v4519_v6 = vadd.f32 %v4518_v53, %v4517_v10  ;;  %5114 = vpow2.f32 %v2736_v22 }
 0x261   : > { %v2790_v16 = vadd.f32 1.0, %v5105_v23  ;;  %v5107_v51 = vpop.eup %5106  ;;  %v2698_v55 = vsub.f32 0.0, %v2596_v47  ;;  %4618 = vmatprep.subr.bf16.mxu1 %v2850_v52 }
 0x262   : > { %v6484_v45 = vadd.f32 %v4455_v30, %v6382_v35  ;;  %v2599_v39 = vadd.f32 %v4519_v6, %v6385_v62  ;;  %v2791_v60 = vadd.f32 1.0, %v5107_v51  ;;  %4619 = vmatpush3.bf16.msra.mxu1 %v2850_v52 }
 0x263   : > { %5116 = vrcp.f32 %v2790_v16  ;;  %v2738_v11 = vmul.f32 1.442695, %v2698_v55  ;;  %v4456_v15 = vpop.f32.mrb[132].mxu1  ;;  %v4520_v61 = vpop.f32.mrb[132].mxu0 }
 0x264   : > { %v2699_v31 = vsub.f32 0.0, %v2599_v39  ;;  %5118 = vrcp.f32 %v2791_v60  ;;  %v4457_v14 = vpop.f32.mrb[133].mxu1  ;;  %v4521_v48 = vpop.f32.mrb[133].mxu0 }
 0x265   : > { %5120 = vpow2.f32 %v2738_v11  ;;  %v4458_v50 = vadd.f32 %v4457_v14, %v4456_v15  ;;  %v4522_v4 = vadd.f32 %v4521_v48, %v4520_v61  ;;  %v4459_v58 = vpop.f32.mrb[134].mxu1  ;;  %v4523_v35 = vpop.f32.mrb[134].mxu0 }
 0x266   : > { %v2740_v28 = vmul.f32 1.442695, %v2699_v31  ;;  %v5109_v26 = vpop.eup %5108  ;;  %v4460_v36 = vpop.f32.mrb[135].mxu1 }
 0x267   : > { %v4524_v62 = vpop.f32.mrb[135].mxu0  ;;  %v5111_v57 = vpop.eup %5110  ;;  %v6488_v13 = vadd.f32 %v4458_v50, %v6388_v59  ;;  %v2604_v12 = vadd.f32 %v4522_v4, %v6391_v9  ;;  %v4461_v27 = vadd.f32 %v4460_v36, %v4459_v58 }
 0x268   : > { %5122 = vpow2.f32 %v2740_v28  ;;  %v5113_v46 = vpop.eup %5112  ;;  %v4525_v2 = vadd.f32 %v4524_v62, %v4523_v35  ;;  %v2851_v44 = vpack.c.bf16 %v5111_v57, %v5109_v26 }
 0x269   : > { %v2792_v29 = vadd.f32 1.0, %v5113_v46  ;;  %v2700_v21 = vsub.f32 0.0, %v2604_v12  ;;  %v6492_v0 = vadd.f32 %v4461_v27, %v6394_v8 }
 0x26a   : > { %v5115_v42 = vpop.eup %5114  ;;  %v2607_v33 = vadd.f32 %v4525_v2, %v6397_v5  ;;  %4620 = vmatprep.subr.bf16.mxu1 %v2851_v44 }
 0x26b   : > { %v2793_v10 = vadd.f32 1.0, %v5115_v42  ;;  %v2742_v18 = vmul.f32 1.442695, %v2700_v21  ;;  %4621 = vmatpush3.bf16.msra.mxu1 %v2851_v44  ;;  %v4462_v59 = vpop.f32.mrb[136].mxu1  ;;  %v4526_v22 = vpop.f32.mrb[136].mxu0  ;;  %5124 = vrcp.f32 %v2792_v29 }
 0x26c   : > { %v2701_v9 = vsub.f32 0.0, %v2607_v33  ;;  %v4463_v40 = vpop.f32.mrb[137].mxu1  ;;  %v4527_v53 = vpop.f32.mrb[137].mxu0 }
 0x26d   : > { %v5117_v23 = vpop.eup %5116  ;;  %5126 = vrcp.f32 %v2793_v10  ;;  %v4464_v47 = vadd.f32 %v4463_v40, %v4462_v59  ;;  %v4528_v30 = vadd.f32 %v4527_v53, %v4526_v22  ;;  %v4465_v6 = vpop.f32.mrb[138].mxu1 }
 0x26e   : > { %v4529_v8 = vpop.f32.mrb[138].mxu0  ;;  %v5119_v16 = vpop.eup %5118  ;;  %5128 = vpow2.f32 %v2742_v18  ;;  %v2744_v52 = vmul.f32 1.442695, %v2701_v9 }
 0x26f   : > { %v4466_v5 = vpop.f32.mrb[139].mxu1  ;;  %v4530_v51 = vpop.f32.mrb[139].mxu0  ;;  %v6496_v39 = vadd.f32 %v4464_v47, %v6400_v7  ;;  %v2612_v60 = vadd.f32 %v4528_v30, %v6403_v37  ;;  %v2852_v61 = vpack.c.bf16 %v5119_v16, %v5117_v23  ;;  %v6511_v23 = vld [vmem:[#allocation6 + $0x8] sm:$0xff]  }
 0x270   : > { %v5121_v55 = vpop.eup %5120  ;;  %v4467_v11 = vadd.f32 %v4466_v5, %v4465_v6  ;;  %v4531_v31 = vadd.f32 %v4530_v51, %v4529_v8  ;;  %5130 = vpow2.f32 %v2744_v52 }
 0x271   : > { %v2794_v15 = vadd.f32 1.0, %v5121_v55  ;;  %v2702_v48 = vsub.f32 0.0, %v2612_v60  ;;  %4622 = vmatprep.subr.bf16.mxu1 %v2852_v61 }
 0x272   : > { %v5123_v14 = vpop.eup %5122  ;;  %v6500_v28 = vadd.f32 %v4467_v11, %v6406_v24  ;;  %v2615_v50 = vadd.f32 %v4531_v31, %v6409_v43  ;;  %4623 = vmatpush3.bf16.msra.mxu1 %v2852_v61 }
 0x273   : > { %v2795_v4 = vadd.f32 1.0, %v5123_v14  ;;  %5132 = vrcp.f32 %v2794_v15  ;;  %v2746_v58 = vmul.f32 1.442695, %v2702_v48  ;;  %v4468_v35 = vpop.f32.mrb[140].mxu1  ;;  %v4532_v37 = vpop.f32.mrb[140].mxu0 }
 0x274   : > { %v2703_v7 = vsub.f32 0.0, %v2615_v50  ;;  %v4469_v26 = vpop.f32.mrb[141].mxu1  ;;  %v4533_v36 = vpop.f32.mrb[141].mxu0 }
 0x275   : > { %5134 = vrcp.f32 %v2795_v4  ;;  %v4470_v57 = vadd.f32 %v4469_v26, %v4468_v35  ;;  %v4534_v12 = vadd.f32 %v4533_v36, %v4532_v37  ;;  %v4471_v27 = vpop.f32.mrb[142].mxu1  ;;  %v4535_v24 = vpop.f32.mrb[142].mxu0  ;;  %v6521_v4 = vld [vmem:[#allocation6 + $0x18] sm:$0xff]  }
 0x276   : > { %5136 = vpow2.f32 %v2746_v58  ;;  %v2748_v62 = vmul.f32 1.442695, %v2703_v7  ;;  %v5125_v46 = vpop.eup %5124  ;;  %v4472_v2 = vpop.f32.mrb[143].mxu1 }
 0x277   : > { %v4536_v43 = vpop.f32.mrb[143].mxu0  ;;  %v5127_v44 = vpop.eup %5126  ;;  %v6504_v29 = vadd.f32 %v4470_v57, %v6412_v32  ;;  %v2620_v21 = vadd.f32 %v4534_v12, %v6415_v1  ;;  %v4473_v42 = vadd.f32 %v4472_v2, %v4471_v27  ;;  %v6513_v1 = vld [vmem:[#allocation6 + $0x10] sm:$0xff]  }
 0x278   : > { %5138 = vpow2.f32 %v2748_v62  ;;  %v5129_v33 = vpop.eup %5128  ;;  %v4537_v10 = vadd.f32 %v4536_v43, %v4535_v24  ;;  %v2853_v18 = vpack.c.bf16 %v5127_v44, %v5125_v46 }
 0x279   : > { %v2796_v59 = vadd.f32 1.0, %v5129_v33  ;;  %v2704_v22 = vsub.f32 0.0, %v2620_v21  ;;  %v6508_v9 = vadd.f32 %v4473_v42, %v6418_v38 }
 0x27a   : > { %v5131_v40 = vpop.eup %5130  ;;  %v2623_v53 = vadd.f32 %v4537_v10, %v6421_v19  ;;  %4624 = vmatprep.subr.bf16.mxu1 %v2853_v18 }
 0x27b   : > { %v2797_v47 = vadd.f32 1.0, %v5131_v40  ;;  %v2750_v32 = vmul.f32 1.442695, %v2704_v22  ;;  %4625 = vmatpush3.bf16.msra.mxu1 %v2853_v18  ;;  %v4538_v30 = vpop.f32.mrb[144].mxu0  ;;  %5140 = vrcp.f32 %v2796_v59 }
 0x27c   : > { %v2705_v6 = vsub.f32 0.0, %v2623_v53  ;;  %v4539_v8 = vpop.f32.mrb[145].mxu0 }
 0x27d   : > { %v5133_v16 = vpop.eup %5132  ;;  %5142 = vrcp.f32 %v2797_v47  ;;  %v4540_v52 = vadd.f32 %v4539_v8, %v4538_v30  ;;  %v4541_v38 = vpop.f32.mrb[146].mxu0 }
 0x27e   : > { %5144 = vpow2.f32 %v2750_v32  ;;  %v2752_v51 = vmul.f32 1.442695, %v2705_v6  ;;  %4627 = vmatmul.mubr.msk.bf16.vlgmr.msra.gmra.mrb[144].mxu1 %vm2942_vm0, %v6511_v23  ;;  %v4542_v19 = vpop.f32.mrb[147].mxu0 }
 0x27f   : > { %v5135_v5 = vpop.eup %5134  ;;  %v2628_v60 = vadd.f32 %v4540_v52, %v6424_v56  ;;  %v4543_v11 = vadd.f32 %v4542_v19, %v4541_v38  ;;  %4630 = vmatprep.mubr.msk.bf16.mxu1 %vm2942_vm0, %v6513_v1 }
 0x280   : > { %v5137_v55 = vpop.eup %5136  ;;  %v2854_v31 = vpack.c.bf16 %v5135_v5, %v5133_v16  ;;  %5146 = vpow2.f32 %v2752_v51 }
 0x281   : > { %v2798_v15 = vadd.f32 1.0, %v5137_v55  ;;  %v2706_v14 = vsub.f32 0.0, %v2628_v60  ;;  %v2631_v48 = vadd.f32 %v4543_v11, %v6428_v54 }
 0x282   : > { %v5139_v61 = vpop.eup %5138  ;;  %4634 = vmatprep.subr.bf16.mxu1 %v2854_v31 }
 0x283   : > { %v2799_v50 = vadd.f32 1.0, %v5139_v61  ;;  %4635 = vmatpush3.bf16.msra.mxu1 %v2854_v31  ;;  %5148 = vrcp.f32 %v2798_v15  ;;  %v2754_v58 = vmul.f32 1.442695, %v2706_v14  ;;  %v2707_v7 = vsub.f32 0.0, %v2631_v48  ;;  %v4544_v56 = vpop.f32.mrb[148].mxu0 }
 0x284   : > { %v4545_v35 = vpop.f32.mrb[149].mxu0 }
 0x285   : > { %5150 = vrcp.f32 %v2799_v50  ;;  %v2756_v37 = vmul.f32 1.442695, %v2707_v7  ;;  %v4546_v26 = vadd.f32 %v4545_v35, %v4544_v56  ;;  %v4547_v36 = vpop.f32.mrb[150].mxu0  ;;  %v5141_v62 = vpop.eup %5140 }
 0x286   : > { %5152 = vpow2.f32 %v2754_v58  ;;  %4631 = vmatmul.mubr.msk.bf16.gmra.mrb[148].mxu1 %vm2942_vm0, %v6521_v4  ;;  %v4548_v54 = vpop.f32.mrb[151].mxu0 }
 0x287   : > { %v5143_v57 = vpop.eup %5142  ;;  %5154 = vpow2.f32 %v2756_v37  ;;  %v2636_v12 = vadd.f32 %v4546_v26, %v6432_v20  ;;  %v4549_v27 = vadd.f32 %v4548_v54, %v4547_v36  ;;  %4642 = vmatprep.mubr.msk.bf16.mxu1 %vm2942_vm0, %v6323_v17 }
 0x288   : > { %v5145_v24 = vpop.eup %5144  ;;  %v2855_v46 = vpack.c.bf16 %v5143_v57, %v5141_v62 }
 0x289   : > { %v2800_v2 = vadd.f32 1.0, %v5145_v24  ;;  %v2708_v43 = vsub.f32 0.0, %v2636_v12  ;;  %v2639_v44 = vadd.f32 %v4549_v27, %v6436_v3 }
 0x28a   : > { %v5147_v21 = vpop.eup %5146  ;;  %4636 = vmatprep.subr.bf16.mxu1 %v2855_v46 }
 0x28b   : > { %v2801_v42 = vadd.f32 1.0, %v5147_v21  ;;  %v2758_v33 = vmul.f32 1.442695, %v2708_v43  ;;  %v2709_v10 = vsub.f32 0.0, %v2639_v44  ;;  %4637 = vmatpush3.bf16.msra.mxu1 %v2855_v46  ;;  %v4550_v18 = vpop.f32.mrb[152].mxu0  ;;  %5156 = vrcp.f32 %v2800_v2 }
 0x28c   : > { %v4551_v59 = vpop.f32.mrb[153].mxu0 }
 0x28d   : > { %v5149_v20 = vpop.eup %5148  ;;  %5158 = vrcp.f32 %v2801_v42  ;;  %v2760_v22 = vmul.f32 1.442695, %v2709_v10  ;;  %v4552_v40 = vadd.f32 %v4551_v59, %v4550_v18  ;;  %v4553_v17 = vpop.f32.mrb[154].mxu0 }
 0x28e   : > { %5160 = vpow2.f32 %v2758_v33  ;;  %v4554_v47 = vpop.f32.mrb[155].mxu0 }
 0x28f   : > { %v5151_v53 = vpop.eup %5150  ;;  %5162 = vpow2.f32 %v2760_v22  ;;  %v2644_v3 = vadd.f32 %v4552_v40, %v6446_v34  ;;  %v4555_v30 = vadd.f32 %v4554_v47, %v4553_v17 }
 0x290   : > { %v5153_v32 = vpop.eup %5152  ;;  %v2856_v6 = vpack.c.bf16 %v5151_v53, %v5149_v20 }
 0x291   : > { %v2802_v8 = vadd.f32 1.0, %v5153_v32  ;;  %v5155_v16 = vpop.eup %5154  ;;  %v2710_v52 = vsub.f32 0.0, %v2644_v3  ;;  %v2647_v38 = vadd.f32 %v4555_v30, %v6453_v41 }
 0x292   : > { %4638 = vmatprep.subr.bf16.mxu1 %v2856_v6  ;;  %v2803_v5 = vadd.f32 1.0, %v5155_v16 }
 0x293   : > { %4639 = vmatpush3.bf16.msra.mxu1 %v2856_v6  ;;  %5164 = vrcp.f32 %v2802_v8  ;;  %v2762_v51 = vmul.f32 1.442695, %v2710_v52  ;;  %v2711_v19 = vsub.f32 0.0, %v2647_v38  ;;  %v4556_v55 = vpop.f32.mrb[156].mxu0  ;;  %v6542_v52 = vld [vmem:[#allocation6] sm:$0xff]  }
 0x294   : > { %5166 = vrcp.f32 %v2803_v5  ;;  %v4557_v60 = vpop.f32.mrb[157].mxu0 }
 0x295   : > { %5168 = vpow2.f32 %v2762_v51  ;;  %v2764_v11 = vmul.f32 1.442695, %v2711_v19  ;;  %v4558_v31 = vadd.f32 %v4557_v60, %v4556_v55  ;;  %v4559_v34 = vpop.f32.mrb[158].mxu0  ;;  %v5157_v15 = vpop.eup %5156 }
 0x296   : > { %v4560_v61 = vpop.f32.mrb[159].mxu0 }
 0x297   : > { %v5159_v14 = vpop.eup %5158  ;;  %5170 = vpow2.f32 %v2764_v11  ;;  %v2652_v48 = vadd.f32 %v4558_v31, %v6466_v49  ;;  %v4561_v41 = vadd.f32 %v4560_v61, %v4559_v34 }
 0x298   : > { %v5161_v50 = vpop.eup %5160  ;;  %v2857_v58 = vpack.c.bf16 %v5159_v14, %v5157_v15 }
 0x299   : > { %v5163_v7 = vpop.eup %5162  ;;  %v2804_v56 = vadd.f32 1.0, %v5161_v50  ;;  %v2712_v35 = vsub.f32 0.0, %v2652_v48  ;;  %v2655_v37 = vadd.f32 %v4561_v41, %v6473_v25 }
 0x29a   : > { %v2805_v26 = vadd.f32 1.0, %v5163_v7  ;;  %4640 = vmatprep.subr.bf16.mxu1 %v2857_v58 }
 0x29b   : > { %5172 = vrcp.f32 %v2804_v56  ;;  %v2766_v36 = vmul.f32 1.442695, %v2712_v35  ;;  %v2713_v62 = vsub.f32 0.0, %v2655_v37  ;;  %4641 = vmatpush3.bf16.msra.mxu1 %v2857_v58  ;;  %v4562_v54 = vpop.f32.mrb[160].mxu0 }
 0x29c   : > { %5174 = vrcp.f32 %v2805_v26  ;;  %v4563_v57 = vpop.f32.mrb[161].mxu0 }
 0x29d   : > { %v5165_v12 = vpop.eup %5164  ;;  %5176 = vpow2.f32 %v2766_v36  ;;  %v2768_v49 = vmul.f32 1.442695, %v2713_v62  ;;  %v4564_v27 = vadd.f32 %v4563_v57, %v4562_v54  ;;  %v4565_v24 = vpop.f32.mrb[162].mxu0 }
 0x29e   : > { %v5167_v46 = vpop.eup %5166  ;;  %4643 = vmatmul.mubr.msk.bf16.vlgmr.msra.gmra.mrb[152].mxu1 %vm2942_vm0, %v6511_v23  ;;  %v4566_v2 = vpop.f32.mrb[163].mxu0 }
 0x29f   : > { %v5169_v25 = vpop.eup %5168  ;;  %5178 = vpow2.f32 %v2768_v49  ;;  %v2660_v43 = vadd.f32 %v4564_v27, %v6480_v63  ;;  %v4567_v44 = vadd.f32 %v4566_v2, %v4565_v24  ;;  %v2858_v21 = vpack.c.bf16 %v5167_v46, %v5165_v12  ;;  %4646 = vmatprep.mubr.msk.bf16.mxu1 %vm2942_vm0, %v6513_v1 }
 0x2a0   : > { %v2806_v42 = vadd.f32 1.0, %v5169_v25 }
 0x2a1   : > { %v5171_v33 = vpop.eup %5170  ;;  %v2714_v10 = vsub.f32 0.0, %v2660_v43  ;;  %v2663_v18 = vadd.f32 %v4567_v44, %v6484_v45  ;;  %4650 = vmatprep.subr.bf16.mxu1 %v2858_v21 }
 0x2a2   : > { %v2807_v59 = vadd.f32 1.0, %v5171_v33  ;;  %4651 = vmatpush3.bf16.msra.mxu1 %v2858_v21  ;;  %5180 = vrcp.f32 %v2806_v42 }
 0x2a3   : > { %v2770_v20 = vmul.f32 1.442695, %v2714_v10  ;;  %v2715_v22 = vsub.f32 0.0, %v2663_v18  ;;  %v4568_v40 = vpop.f32.mrb[164].mxu0 }
 0x2a4   : > { %5182 = vrcp.f32 %v2807_v59  ;;  %v4569_v17 = vpop.f32.mrb[165].mxu0 }
 0x2a5   : > { %v5173_v63 = vpop.eup %5172  ;;  %5184 = vpow2.f32 %v2770_v20  ;;  %v2772_v53 = vmul.f32 1.442695, %v2715_v22  ;;  %v4570_v47 = vadd.f32 %v4569_v17, %v4568_v40  ;;  %v4571_v32 = vpop.f32.mrb[166].mxu0 }
 0x2a6   : > { %v5175_v3 = vpop.eup %5174  ;;  %4647 = vmatmul.mubr.msk.bf16.gmra.mrb[156].mxu1 %vm2942_vm0, %v6521_v4  ;;  %v4572_v30 = vpop.f32.mrb[167].mxu0 }
 0x2a7   : > { %v5177_v45 = vpop.eup %5176  ;;  %5186 = vpow2.f32 %v2772_v53  ;;  %v2668_v6 = vadd.f32 %v4570_v47, %v6488_v13  ;;  %v4573_v8 = vadd.f32 %v4572_v30, %v4571_v32  ;;  %v2859_v16 = vpack.c.bf16 %v5175_v3, %v5173_v63  ;;  %4658 = vmatprep.mubr.msk.bf16.mxu1 %vm2942_vm0, %v6542_v52 }
 0x2a8   : > { %v2808_v38 = vadd.f32 1.0, %v5177_v45 }
 0x2a9   : > { %v5179_v5 = vpop.eup %5178  ;;  %v2716_v51 = vsub.f32 0.0, %v2668_v6  ;;  %v2671_v19 = vadd.f32 %v4573_v8, %v6492_v0  ;;  %4652 = vmatprep.subr.bf16.mxu1 %v2859_v16 }
 0x2aa   : > { %v2809_v55 = vadd.f32 1.0, %v5179_v5  ;;  %4653 = vmatpush3.bf16.msra.mxu1 %v2859_v16  ;;  %5188 = vrcp.f32 %v2808_v38 }
 0x2ab   : > { %v2774_v60 = vmul.f32 1.442695, %v2716_v51  ;;  %v2717_v11 = vsub.f32 0.0, %v2671_v19  ;;  %v4574_v31 = vpop.f32.mrb[168].mxu0 }
 0x2ac   : > { %5190 = vrcp.f32 %v2809_v55  ;;  %v4575_v13 = vpop.f32.mrb[169].mxu0  ;;  %v5181_v34 = vpop.eup %5180 }
 0x2ad   : > { %5192 = vpow2.f32 %v2774_v60  ;;  %v2776_v15 = vmul.f32 1.442695, %v2717_v11  ;;  %v4576_v61 = vadd.f32 %v4575_v13, %v4574_v31  ;;  %v4577_v14 = vpop.f32.mrb[170].mxu0 }
 0x2ae   : > { %v5183_v48 = vpop.eup %5182  ;;  %v4578_v41 = vpop.f32.mrb[171].mxu0 }
 0x2af   : > { %v5185_v50 = vpop.eup %5184  ;;  %5194 = vpow2.f32 %v2776_v15  ;;  %v2676_v0 = vadd.f32 %v4576_v61, %v6496_v39  ;;  %v4579_v58 = vadd.f32 %v4578_v41, %v4577_v14  ;;  %v2860_v7 = vpack.c.bf16 %v5183_v48, %v5181_v34 }
 0x2b0   : > { %v2810_v56 = vadd.f32 1.0, %v5185_v50 }
 0x2b1   : > { %v5187_v35 = vpop.eup %5186  ;;  %v2718_v37 = vsub.f32 0.0, %v2676_v0  ;;  %v2679_v26 = vadd.f32 %v4579_v58, %v6500_v28  ;;  %4654 = vmatprep.subr.bf16.mxu1 %v2860_v7 }
 0x2b2   : > { %v2811_v36 = vadd.f32 1.0, %v5187_v35  ;;  %4655 = vmatpush3.bf16.msra.mxu1 %v2860_v7  ;;  %5196 = vrcp.f32 %v2810_v56 }
 0x2b3   : > { %v2778_v62 = vmul.f32 1.442695, %v2718_v37  ;;  %v2719_v54 = vsub.f32 0.0, %v2679_v26  ;;  %v4580_v57 = vpop.f32.mrb[172].mxu0 }
 0x2b4   : > { %5198 = vrcp.f32 %v2811_v36  ;;  %v4581_v12 = vpop.f32.mrb[173].mxu0  ;;  %v5189_v49 = vpop.eup %5188 }
 0x2b5   : > { %5200 = vpow2.f32 %v2778_v62  ;;  %v2780_v27 = vmul.f32 1.442695, %v2719_v54  ;;  %v4582_v39 = vadd.f32 %v4581_v12, %v4580_v57  ;;  %v4583_v24 = vpop.f32.mrb[174].mxu0 }
 0x2b6   : > { %v5191_v46 = vpop.eup %5190  ;;  %v4584_v2 = vpop.f32.mrb[175].mxu0 }
 0x2b7   : > { %v5193_v25 = vpop.eup %5192  ;;  %5202 = vpow2.f32 %v2780_v27  ;;  %v2684_v28 = vadd.f32 %v4582_v39, %v6504_v29  ;;  %v4585_v43 = vadd.f32 %v4584_v2, %v4583_v24  ;;  %v2861_v44 = vpack.c.bf16 %v5191_v46, %v5189_v49 }
 0x2b8   : > { %v2812_v21 = vadd.f32 1.0, %v5193_v25 }
 0x2b9   : > { %v5195_v42 = vpop.eup %5194  ;;  %v2720_v33 = vsub.f32 0.0, %v2684_v28  ;;  %v2687_v10 = vadd.f32 %v4585_v43, %v6508_v9  ;;  %4656 = vmatprep.subr.bf16.mxu1 %v2861_v44 }
 0x2ba   : > { %v2813_v18 = vadd.f32 1.0, %v5195_v42  ;;  %4657 = vmatpush3.bf16.msra.mxu1 %v2861_v44  ;;  %5204 = vrcp.f32 %v2812_v21 }
 0x2bb   : > { %v2782_v59 = vmul.f32 1.442695, %v2720_v33  ;;  %v2721_v20 = vsub.f32 0.0, %v2687_v10 }
 0x2bc   : > { %5206 = vrcp.f32 %v2813_v18  ;;  %v5197_v22 = vpop.eup %5196 }
 0x2bd   : > { %5208 = vpow2.f32 %v2782_v59  ;;  %v2784_v40 = vmul.f32 1.442695, %v2721_v20  ;;  %4659 = vmatmul.mubr.msk.bf16.vlgmr.msra.gmra.mrb[160].mxu1 %vm2942_vm0, %v6511_v23 }
 0x2be   : > { %v5199_v29 = vpop.eup %5198  ;;  %4662 = vmatprep.mubr.msk.bf16.mxu1 %vm2942_vm0, %v6513_v1 }
 0x2bf   : > { %v5201_v17 = vpop.eup %5200  ;;  %5210 = vpow2.f32 %v2784_v40  ;;  %v2862_v9 = vpack.c.bf16 %v5199_v29, %v5197_v22 }
 0x2c0   : > { %v2814_v63 = vadd.f32 1.0, %v5201_v17 }
 0x2c1   : > { %v5203_v53 = vpop.eup %5202  ;;  %4666 = vmatprep.subr.bf16.mxu1 %v2862_v9 }
 0x2c2   : > { %v2815_v47 = vadd.f32 1.0, %v5203_v53  ;;  %4667 = vmatpush3.bf16.msra.mxu1 %v2862_v9  ;;  %5212 = vrcp.f32 %v2814_v63 }
 0x2c4   : > { %5214 = vrcp.f32 %v2815_v47  ;;  %v5205_v32 = vpop.eup %5204 }
 0x2c5   : > { %4663 = vmatmul.mubr.msk.bf16.gmra.mrb[164].mxu1 %vm2942_vm0, %v6521_v4 }
 0x2c6   : > { %v5207_v3 = vpop.eup %5206  ;;  %4674 = vmatprep.mubr.msk.bf16.mxu1 %vm2942_vm0, %v6542_v52 }
 0x2c7   : > { %v5209_v30 = vpop.eup %5208  ;;  %v2863_v45 = vpack.c.bf16 %v5207_v3, %v5205_v32 }
 0x2c8   : > { %v2816_v6 = vadd.f32 1.0, %v5209_v30 }
 0x2c9   : > { %v5211_v8 = vpop.eup %5210  ;;  %4668 = vmatprep.subr.bf16.mxu1 %v2863_v45 }
 0x2ca   : > { %v2817_v16 = vadd.f32 1.0, %v5211_v8  ;;  %4669 = vmatpush3.bf16.msra.mxu1 %v2863_v45  ;;  %5216 = vrcp.f32 %v2816_v6 }
 0x2cb   : > { %v6565_v52 = vpop.permute.xlu0 %2884  ;;  %v6567_v11 = vpop.permute.xlu1 %2894 }
 0x2cc   : > { %5218 = vrcp.f32 %v2817_v16  ;;  %v5213_v38 = vpop.eup %5212 }
 0x2ce   : > { %v5215_v5 = vpop.eup %5214 }
 0x2cf   : > { %v2864_v51 = vpack.c.bf16 %v5215_v5, %v5213_v38  ;;  %v6569_v31 = vpop.permute.xlu0 %2889  ;;  %v6571_v13 = vpop.permute.xlu1 %2899 }
 0x2d1   : > { %4670 = vmatprep.subr.bf16.mxu1 %v2864_v51 }
 0x2d2   : > { %4671 = vmatpush3.bf16.msra.mxu1 %v2864_v51 }
 0x2d3   : > { %v6573_v15 = vpop.permute.xlu0 %2904 }
 0x2d4   : > { %v5217_v19 = vpop.eup %5216 }
 0x2d6   : > { %v5219_v55 = vpop.eup %5218 }
 0x2d7   : > { %v2865_v60 = vpack.c.bf16 %v5219_v55, %v5217_v19  ;;  %v6595_v35 = vpop.permute.xlu0 %2914 }
 0x2d9   : > { %4672 = vmatprep.subr.bf16.mxu1 %v2865_v60 }
 0x2da   : > { %4673 = vmatpush3.bf16.msra.mxu1 %v2865_v60 }
 0x2dd   : > { %4675 = vmatmul.mubr.msk.bf16.vlgmr.msra.gmra.mrb[168].mxu1 %vm2942_vm0, %v6511_v23 }
 0x2de   : > { %4678 = vmatprep.mubr.msk.bf16.mxu1 %vm2942_vm0, %v6513_v1 }
 0x2e5   : > { %4679 = vmatmul.mubr.msk.bf16.gmra.mrb[172].mxu1 %vm2942_vm0, %v6521_v4  ;;  %v6581_v4 = vpop.permute.xlu1 %2909 }
 0x2e9   : > { %v6604_v54 = vpop.permute.xlu1 %2919 }
 0x351   : > { %v4628_v34 = vpop.f32.mrb[144].mxu1 }
 0x352   : > { %v6576_v61 = vadd.f32 %v4628_v34, %v6567_v11  ;;  %v2989_v23 = vpop.f32.mrb[145].mxu1 }
 0x353   : > { %v6579_v1 = vadd.f32 %v2989_v23, %v6565_v52  ;;  %v4629_v14 = vpop.f32.mrb[146].mxu1 }
 0x354   : > { %v3022_v48 = vmax.f32 %v6576_v61, 0.0  ;;  %v2992_v41 = vpop.f32.mrb[147].mxu1  ;;  %v6585_v50 = vadd.f32 %v4629_v14, %v6571_v13 }
 0x355   : > { %v3020_v0 = vmax.f32 %v6579_v1, 0.0  ;;  %v6589_v58 = vadd.f32 %v2992_v41, %v6569_v31 }
 0x356   : > { %v3035_v7 = vsel %vm3028_vm1, %v3022_v48, -inf  ;;  %v3023_v26 = vmax.f32 %v6585_v50, 0.0 }
 0x357   : > { %v3021_v56 = vmax.f32 %v6589_v58, 0.0  ;;  %3036 = vmax.xlane.f32.xlu0 %v3035_v7  ;;  %v3029_v37 = vsel %vm3028_vm1, %v3020_v0, -inf }
 0x358   : > { %v3038_v46 = vsel %vm3028_vm1, %v3023_v26, -inf }
 0x359   : > { %v4632_v36 = vpop.f32.mrb[148].mxu1  ;;  %v3032_v62 = vsel %vm3028_vm1, %v3021_v56, -inf }
 0x35a   : > { %v6607_v57 = vadd.f32 %v4632_v36, %v6595_v35  ;;  %3033 = vmax.xlane.f32.xlu1 %v3032_v62  ;;  %v3005_v12 = vpop.f32.mrb[149].mxu1 }
 0x35b   : > { %3030 = vmax.xlane.f32.xlu0 %v3029_v37  ;;  %v6610_v49 = vadd.f32 %v3005_v12, %v6573_v15  ;;  %v4633_v27 = vpop.f32.mrb[150].mxu1 }
 0x35c   : > { %v3026_v39 = vmax.f32 %v6607_v57, 0.0  ;;  %v6614_v24 = vadd.f32 %v4633_v27, %v6604_v54  ;;  %v3008_v2 = vpop.f32.mrb[151].mxu1 }
 0x35d   : > { %v3024_v25 = vmax.f32 %v6610_v49, 0.0  ;;  %v6621_v28 = vadd.f32 %v3008_v2, %v6581_v4 }
 0x35e   : > { %v3027_v43 = vmax.f32 %v6614_v24, 0.0  ;;  %v3047_v44 = vsel %vm3028_vm1, %v3026_v39, -inf }
 0x35f   : > { %3048 = vmax.xlane.f32.xlu1 %v3047_v44  ;;  %3039 = vmax.xlane.f32.xlu0 %v3038_v46  ;;  %v3025_v21 = vmax.f32 %v6621_v28, 0.0  ;;  %v3041_v42 = vsel %vm3028_vm1, %v3024_v25, -inf }
 0x360   : > { %v3050_v33 = vsel %vm3028_vm1, %v3027_v43, -inf }
 0x361   : > { %v3044_v10 = vsel %vm3028_vm1, %v3025_v21, -inf }
 0x363   : > { %3042 = vmax.xlane.f32.xlu1 %v3041_v42  ;;  %3051 = vmax.xlane.f32.xlu0 %v3050_v33 }
 0x367   : > { %3045 = vmax.xlane.f32.xlu0 %v3044_v10 }
 0x371   : > { %v4644_v18 = vpop.f32.mrb[152].mxu1 }
 0x372   : > { %v6638_v59 = vadd.f32 %v4644_v18, %v6567_v11  ;;  %v3159_v20 = vpop.f32.mrb[153].mxu1 }
 0x373   : > { %v6641_v22 = vadd.f32 %v3159_v20, %v6565_v52  ;;  %v4645_v40 = vpop.f32.mrb[154].mxu1 }
 0x374   : > { %v3192_v29 = vmax.f32 %v6638_v59, 0.0  ;;  %v6645_v17 = vadd.f32 %v4645_v40, %v6571_v13  ;;  %v3162_v9 = vpop.f32.mrb[155].mxu1 }
 0x375   : > { %v3190_v63 = vmax.f32 %v6641_v22, 0.0  ;;  %v6649_v53 = vadd.f32 %v3162_v9, %v6569_v31 }
 0x376   : > { %v3193_v47 = vmax.f32 %v6645_v17, 0.0  ;;  %v3204_v32 = vsel %vm3028_vm1, %v3192_v29, -inf }
 0x377   : > { %v3191_v3 = vmax.f32 %v6649_v53, 0.0  ;;  %3205 = vmax.xlane.f32.xlu1 %v3204_v32  ;;  %v3198_v45 = vsel %vm3028_vm1, %v3190_v63, -inf }
 0x378   : > { %v3207_v30 = vsel %vm3028_vm1, %v3193_v47, -inf }
 0x379   : > { %v4648_v6 = vpop.f32.mrb[156].mxu1  ;;  %3208 = vmax.xlane.f32.xlu0 %v3207_v30  ;;  %v3201_v38 = vsel %vm3028_vm1, %v3191_v3, -inf }
 0x37a   : > { %v6663_v8 = vadd.f32 %v4648_v6, %v6595_v35  ;;  %v3175_v16 = vpop.f32.mrb[157].mxu1 }
 0x37b   : > { %v6669_v5 = vadd.f32 %v3175_v16, %v6573_v15  ;;  %v4649_v51 = vpop.f32.mrb[158].mxu1  ;;  %3199 = vmax.xlane.f32.xlu1 %v3198_v45 }
 0x37c   : > { %v3196_v19 = vmax.f32 %v6663_v8, 0.0  ;;  %v6673_v55 = vadd.f32 %v4649_v51, %v6604_v54  ;;  %v3178_v60 = vpop.f32.mrb[159].mxu1 }
 0x37d   : > { %v3194_v34 = vmax.f32 %v6669_v5, 0.0  ;;  %3202 = vmax.xlane.f32.xlu0 %v3201_v38  ;;  %v6677_v23 = vadd.f32 %v3178_v60, %v6581_v4 }
 0x37e   : > { %v3197_v14 = vmax.f32 %v6673_v55, 0.0  ;;  %v3216_v41 = vsel %vm3028_vm1, %v3196_v19, -inf }
 0x37f   : > { %3217 = vmax.xlane.f32.xlu1 %v3216_v41  ;;  %v3195_v7 = vmax.f32 %v6677_v23, 0.0  ;;  %v3210_v36 = vsel %vm3028_vm1, %v3194_v34, -inf }
 0x380   : > { %v3219_v37 = vsel %vm3028_vm1, %v3197_v14, -inf }
 0x381   : > { %3220 = vmax.xlane.f32.xlu0 %v3219_v37  ;;  %v3213_v62 = vsel %vm3028_vm1, %v3195_v7, -inf }
 0x383   : > { %3211 = vmax.xlane.f32.xlu1 %v3210_v36 }
 0x385   : > { %3214 = vmax.xlane.f32.xlu0 %v3213_v62 }
 0x390   : > { %v4660_v12 = vpop.f32.mrb[160].mxu1 }
 0x391   : > { %v6694_v27 = vadd.f32 %v4660_v12, %v6567_v11  ;;  %v3329_v46 = vpop.f32.mrb[161].mxu1 }
 0x392   : > { %v6697_v2 = vadd.f32 %v3329_v46, %v6565_v52  ;;  %v4661_v44 = vpop.f32.mrb[162].mxu1 }
 0x393   : > { %v3362_v42 = vmax.f32 %v6694_v27, 0.0  ;;  %v6701_v33 = vadd.f32 %v4661_v44, %v6571_v13  ;;  %v3332_v10 = vpop.f32.mrb[163].mxu1 }
 0x394   : > { %v6704_v18 = vadd.f32 %v3332_v10, %v6569_v31  ;;  %v3360_v20 = vmax.f32 %v6697_v2, 0.0 }
 0x395   : > { %v3363_v40 = vmax.f32 %v6701_v33, 0.0  ;;  %v3374_v9 = vsel %vm3028_vm1, %v3362_v42, -inf }
 0x396   : > { %3375 = vmax.xlane.f32.xlu1 %v3374_v9  ;;  %v3361_v32 = vmax.f32 %v6704_v18, 0.0  ;;  %v3368_v38 = vsel %vm3028_vm1, %v3360_v20, -inf }
 0x397   : > { %v3377_v30 = vsel %vm3028_vm1, %v3363_v40, -inf }
 0x398   : > { %v4664_v45 = vpop.f32.mrb[164].mxu1  ;;  %3378 = vmax.xlane.f32.xlu0 %v3377_v30  ;;  %v3371_v36 = vsel %vm3028_vm1, %v3361_v32, -inf }
 0x399   : > { %v6716_v6 = vadd.f32 %v4664_v45, %v6595_v35  ;;  %v3345_v16 = vpop.f32.mrb[165].mxu1 }
 0x39a   : > { %v6722_v51 = vadd.f32 %v3345_v16, %v6573_v15  ;;  %v4665_v60 = vpop.f32.mrb[166].mxu1  ;;  %3369 = vmax.xlane.f32.xlu1 %v3368_v38 }
 0x39b   : > { %v7129_v41 = vmax.f32 %v6716_v6, 0.0  ;;  %v6726_v37 = vadd.f32 %v4665_v60, %v6604_v54  ;;  %v3348_v62 = vpop.f32.mrb[167].mxu1 }
 0x39c   : > { %3372 = vmax.xlane.f32.xlu0 %v3371_v36  ;;  %v6732_v12 = vadd.f32 %v3348_v62, %v6581_v4  ;;  %v7125_v46 = vmax.f32 %v6722_v51, 0.0 }
 0x39d   : > { %v7124_v44 = vmax.f32 %v6726_v37, 0.0  ;;  %v3386_v10 = vsel %vm3028_vm1, %v7129_v41, -inf }
 0x39e   : > { %3387 = vmax.xlane.f32.xlu1 %v3386_v10  ;;  %v7126_v9 = vmax.f32 %v6732_v12, 0.0  ;;  %v3380_v45 = vsel %vm3028_vm1, %v7125_v46, -inf }
 0x39f   : > { %v3389_v30 = vsel %vm3028_vm1, %v7124_v44, -inf }
 0x3a0   : > { %3390 = vmax.xlane.f32.xlu0 %v3389_v30  ;;  %v3383_v16 = vsel %vm3028_vm1, %v7126_v9, -inf }
 0x3a2   : > { %3381 = vmax.xlane.f32.xlu1 %v3380_v45 }
 0x3a4   : > { %3384 = vmax.xlane.f32.xlu0 %v3383_v16 }
 0x3b0   : > { %v4676_v38 = vpop.f32.mrb[168].mxu1 }
 0x3b1   : > { %v6750_v60 = vadd.f32 %v4676_v38, %v6567_v11  ;;  %v3499_v36 = vpop.f32.mrb[169].mxu1 }
 0x3b2   : > { %v6753_v62 = vadd.f32 %v3499_v36, %v6565_v52  ;;  %v4677_v10 = vpop.f32.mrb[170].mxu1 }
 0x3b3   : > { %v7127_v30 = vmax.f32 %v6750_v60, 0.0  ;;  %v6757_v44 = vadd.f32 %v4677_v10, %v6571_v13  ;;  %v3502_v45 = vpop.f32.mrb[171].mxu1 }
 0x3b4   : > { %v6760_v46 = vadd.f32 %v3502_v45, %v6569_v31  ;;  %v7130_v16 = vmax.f32 %v6753_v62, 0.0 }
 0x3b5   : > { %v7128_v9 = vmax.f32 %v6757_v44, 0.0  ;;  %v3544_v11 = vsel %vm3028_vm1, %v7127_v30, -inf }
 0x3b6   : > { %3545 = vmax.xlane.f32.xlu1 %v3544_v11  ;;  %v7134_v52 = vmax.f32 %v6760_v46, 0.0  ;;  %v3538_v31 = vsel %vm3028_vm1, %v7130_v16, -inf }
 0x3b7   : > { %v3547_v13 = vsel %vm3028_vm1, %v7128_v9, -inf }
 0x3b8   : > { %v4680_v38 = vpop.f32.mrb[172].mxu1  ;;  %3548 = vmax.xlane.f32.xlu0 %v3547_v13  ;;  %v3541_v9 = vsel %vm3028_vm1, %v7134_v52, -inf }
 0x3b9   : > { %v3515_v36 = vpop.f32.mrb[173].mxu1  ;;  %v6775_v10 = vadd.f32 %v4680_v38, %v6595_v35 }
 0x3ba   : > { %v6778_v45 = vadd.f32 %v3515_v36, %v6573_v15  ;;  %v4681_v11 = vpop.f32.mrb[174].mxu1  ;;  %3539 = vmax.xlane.f32.xlu1 %v3538_v31 }
 0x3bb   : > { %v3518_v30 = vpop.f32.mrb[175].mxu1  ;;  %v6785_v41 = vadd.f32 %v4681_v11, %v6604_v54  ;;  %v7133_v35 = vmax.f32 %v6775_v10, 0.0 }
 0x3bc   : > { %v7131_v13 = vmax.f32 %v6778_v45, 0.0  ;;  %v6788_v16 = vadd.f32 %v3518_v30, %v6581_v4  ;;  %3542 = vmax.xlane.f32.xlu0 %v3541_v9 }
 0x3bd   : > { %v7135_v36 = vmax.f32 %v6785_v41, 0.0  ;;  %v3556_v4 = vsel %vm3028_vm1, %v7133_v35, -inf }
 0x3be   : > { %v7132_v15 = vmax.f32 %v6788_v16, 0.0  ;;  %v3550_v38 = vsel %vm3028_vm1, %v7131_v13, -inf }
 0x3bf   : > { %3551 = vmax.xlane.f32.xlu1 %v3550_v38  ;;  %v3559_v9 = vsel %vm3028_vm1, %v7135_v36, -inf }
 0x3c0   : > { %v3553_v54 = vsel %vm3028_vm1, %v7132_v15, -inf }
 0x3c1   : > { %3554 = vmax.xlane.f32.xlu0 %v3553_v54 }
 0x3c3   : > { %3557 = vmax.xlane.f32.xlu1 %v3556_v4 }
 0x3c5   : > { %3560 = vmax.xlane.f32.xlu0 %v3559_v9 }
 0x3e4   : > { %v3037_v30 = vpop.xlane.xlu0 %3036 }
 0x3e5   : > { %v3055_v31 = vsub.f32 %v3022_v48, %v3037_v30 }
 0x3e7   : > { %v3065_v11 = vmul.f32 1.442695, %v3055_v31  ;;  %v3034_v38 = vpop.xlane.xlu1 %3033 }
 0x3e8   : > { %v3031_v13 = vpop.xlane.xlu0 %3030  ;;  %v3054_v4 = vsub.f32 %v3021_v56, %v3034_v38 }
 0x3e9   : > { %5220 = vpow2.f32 %v3065_v11  ;;  %v3053_v54 = vsub.f32 %v3020_v0, %v3031_v13 }
 0x3ea   : > { %v3063_v31 = vmul.f32 1.442695, %v3054_v4 }
 0x3eb   : > { %v3061_v15 = vmul.f32 1.442695, %v3053_v54 }
 0x3ec   : > { %v3049_v35 = vpop.xlane.xlu1 %3048  ;;  %v3040_v52 = vpop.xlane.xlu0 %3039 }
 0x3ed   : > { %5222 = vpow2.f32 %v3061_v15  ;;  %v3059_v9 = vsub.f32 %v3026_v39, %v3049_v35  ;;  %v3056_v61 = vsub.f32 %v3023_v26, %v3040_v52 }
 0x3ef   : > { %v3073_v48 = vmul.f32 1.442695, %v3059_v9  ;;  %v3067_v30 = vmul.f32 1.442695, %v3056_v61 }
 0x3f0   : > { %v3043_v11 = vpop.xlane.xlu1 %3042  ;;  %v3052_v36 = vpop.xlane.xlu0 %3051 }
 0x3f1   : > { %5224 = vpow2.f32 %v3073_v48  ;;  %v3057_v1 = vsub.f32 %v3024_v25, %v3043_v11  ;;  %v3060_v0 = vsub.f32 %v3027_v43, %v3052_v36 }
 0x3f2   : > { %5226 = vpow2.f32 %v3067_v30 }
 0x3f3   : > { %v6819_v58 = vpop.eup %5220  ;;  %v3069_v56 = vmul.f32 1.442695, %v3057_v1  ;;  %5228 = vpow2.f32 %v3063_v31  ;;  %v3075_v57 = vmul.f32 1.442695, %v3060_v0 }
 0x3f4   : > { %v3046_v50 = vpop.xlane.xlu0 %3045  ;;  %v3083_v26 = vsel %vm3028_vm1, %v6819_v58, 0.0 }
 0x3f5   : > { %5230 = vpow2.f32 %v3069_v56  ;;  %v3058_v39 = vsub.f32 %v3025_v21, %v3046_v50  ;;  %3084 = vadd.xlane.f32.xlu1 %v3083_v26 }
 0x3f6   : > { %5232 = vpow2.f32 %v3075_v57 }
 0x3f7   : > { %v6825_v49 = vpop.eup %5222  ;;  %v3071_v24 = vmul.f32 1.442695, %v3058_v39 }
 0x3f8   : > { %v3077_v25 = vsel %vm3028_vm1, %v6825_v49, 0.0 }
 0x3f9   : > { %3078 = vadd.xlane.f32.xlu1 %v3077_v25  ;;  %5234 = vpow2.f32 %v3071_v24 }
 0x3fb   : > { %v6829_v43 = vpop.eup %5224 }
 0x3fc   : > { %v6831_v52 = vpop.eup %5226  ;;  %v3095_v13 = vsel %vm3028_vm1, %v6829_v43, 0.0 }
 0x3fd   : > { %3096 = vadd.xlane.f32.xlu1 %v3095_v13  ;;  %v3086_v28 = vsel %vm3028_vm1, %v6831_v52, 0.0  ;;  %v6837_v21 = vpop.eup %5228 }
 0x3fe   : > { %3087 = vadd.xlane.f32.xlu0 %v3086_v28  ;;  %v3080_v36 = vsel %vm3028_vm1, %v6837_v21, 0.0 }
 0x3ff   : > { %v6839_v35 = vpop.eup %5230 }
 0x400   : > { %v3089_v15 = vsel %vm3028_vm1, %v6839_v35, 0.0  ;;  %v6845_v38 = vpop.eup %5232 }
 0x401   : > { %3090 = vadd.xlane.f32.xlu1 %v3089_v15  ;;  %v3098_v9 = vsel %vm3028_vm1, %v6845_v38, 0.0 }
 0x402   : > { %3081 = vadd.xlane.f32.xlu0 %v3080_v36 }
 0x403   : > { %v6851_v61 = vpop.eup %5234 }
 0x404   : > { %v3206_v54 = vpop.xlane.xlu1 %3205  ;;  %v3092_v59 = vsel %vm3028_vm1, %v6851_v61, 0.0 }
 0x405   : > { %v3224_v4 = vsub.f32 %v3192_v29, %v3206_v54 }
 0x406   : > { %3099 = vadd.xlane.f32.xlu0 %v3098_v9  ;;  %v3209_v48 = vpop.xlane.xlu0 %3208 }
 0x407   : > { %v3234_v30 = vmul.f32 1.442695, %v3224_v4  ;;  %v3225_v31 = vsub.f32 %v3193_v47, %v3209_v48 }
 0x408   : > { %v3200_v11 = vpop.xlane.xlu1 %3199 }
 0x409   : > { %5236 = vpow2.f32 %v3234_v30  ;;  %v3236_v1 = vmul.f32 1.442695, %v3225_v31  ;;  %v3222_v0 = vsub.f32 %v3190_v63, %v3200_v11 }
 0x40a   : > { %3093 = vadd.xlane.f32.xlu0 %v3092_v59  ;;  %v3203_v29 = vpop.xlane.xlu0 %3202 }
 0x40b   : > { %5238 = vpow2.f32 %v3236_v1  ;;  %v3230_v56 = vmul.f32 1.442695, %v3222_v0  ;;  %v3223_v57 = vsub.f32 %v3191_v3, %v3203_v29 }
 0x40c   : > { %v3218_v50 = vpop.xlane.xlu1 %3217 }
 0x40d   : > { %5240 = vpow2.f32 %v3230_v56  ;;  %v3232_v17 = vmul.f32 1.442695, %v3223_v57  ;;  %v3228_v47 = vsub.f32 %v3196_v19, %v3218_v50 }
 0x40e   : > { %v3221_v26 = vpop.xlane.xlu0 %3220 }
 0x40f   : > { %5242 = vpow2.f32 %v3232_v17  ;;  %v3242_v22 = vmul.f32 1.442695, %v3228_v47  ;;  %v3229_v63 = vsub.f32 %v3197_v14, %v3221_v26 }
 0x410   : > { %v3212_v39 = vpop.xlane.xlu1 %3211 }
 0x411   : > { %5244 = vpow2.f32 %v3242_v22  ;;  %v3244_v24 = vmul.f32 1.442695, %v3229_v63  ;;  %v3226_v25 = vsub.f32 %v3194_v34, %v3212_v39  ;;  %v7147_v39 = vmax.f32 %v6726_v37, 0.0 }
 0x412   : > { %v3215_v53 = vpop.xlane.xlu0 %3214 }
 0x413   : > { %v6867_v3 = vpop.eup %5236  ;;  %5246 = vpow2.f32 %v3244_v24  ;;  %v3238_v13 = vmul.f32 1.442695, %v3226_v25  ;;  %v3227_v8 = vsub.f32 %v3195_v7, %v3215_v53  ;;  %v7148_v25 = vmax.f32 %v6722_v51, 0.0 }
 0x414   : > { %v3252_v19 = vsel %vm3028_vm1, %v6867_v3, 0.0 }
 0x415   : > { %v6873_v28 = vpop.eup %5238  ;;  %5248 = vpow2.f32 %v3238_v13  ;;  %v3240_v55 = vmul.f32 1.442695, %v3227_v8  ;;  %3253 = vadd.xlane.f32.xlu1 %v3252_v19 }
 0x416   : > { %v3255_v5 = vsel %vm3028_vm1, %v6873_v28, 0.0 }
 0x417   : > { %v6877_v34 = vpop.eup %5240  ;;  %5250 = vpow2.f32 %v3240_v55  ;;  %3256 = vadd.xlane.f32.xlu0 %v3255_v5 }
 0x418   : > { %v3246_v14 = vsel %vm3028_vm1, %v6877_v34, 0.0 }
 0x419   : > { %v6881_v23 = vpop.eup %5242  ;;  %3247 = vadd.xlane.f32.xlu1 %v3246_v14 }
 0x41a   : > { %v3249_v7 = vsel %vm3028_vm1, %v6881_v23, 0.0 }
 0x41b   : > { %v6885_v15 = vpop.eup %5244  ;;  %3250 = vadd.xlane.f32.xlu0 %v3249_v7 }
 0x41c   : > { %v3264_v36 = vsel %vm3028_vm1, %v6885_v15, 0.0 }
 0x41d   : > { %v6889_v54 = vpop.eup %5246  ;;  %3265 = vadd.xlane.f32.xlu1 %v3264_v36 }
 0x41e   : > { %v3267_v4 = vsel %vm3028_vm1, %v6889_v54, 0.0 }
 0x41f   : > { %v6893_v9 = vpop.eup %5248  ;;  %3268 = vadd.xlane.f32.xlu0 %v3267_v4 }
 0x420   : > { %v3258_v48 = vsel %vm3028_vm1, %v6893_v9, 0.0 }
 0x421   : > { %v6897_v30 = vpop.eup %5250  ;;  %3259 = vadd.xlane.f32.xlu1 %v3258_v48 }
 0x422   : > { %v3261_v31 = vsel %vm3028_vm1, %v6897_v30, 0.0 }
 0x423   : > { %3262 = vadd.xlane.f32.xlu0 %v3261_v31  ;;  %v3376_v11 = vpop.xlane.xlu1 %3375 }
 0x424   : > { %v3394_v1 = vsub.f32 %v3362_v42, %v3376_v11  ;;  %v7146_v42 = vmax.f32 %v6716_v6, 0.0  ;;  %v7149_v6 = vmax.f32 %v6732_v12, 0.0 }
 0x425   : > { %v3379_v0 = vpop.xlane.xlu0 %3378 }
 0x426   : > { %v3404_v59 = vmul.f32 1.442695, %v3394_v1  ;;  %v3395_v29 = vsub.f32 %v3363_v40, %v3379_v0 }
 0x427   : > { %v3370_v56 = vpop.xlane.xlu1 %3369 }
 0x428   : > { %5252 = vpow2.f32 %v3404_v59  ;;  %v3406_v57 = vmul.f32 1.442695, %v3395_v29  ;;  %v3392_v50 = vsub.f32 %v3360_v20, %v3370_v56  ;;  %v7150_v56 = vmax.f32 %v6750_v60, 0.0 }
 0x429   : > { %v3373_v17 = vpop.xlane.xlu0 %3372 }
 0x42a   : > { %5254 = vpow2.f32 %v3406_v57  ;;  %v3400_v47 = vmul.f32 1.442695, %v3392_v50  ;;  %v3393_v26 = vsub.f32 %v3361_v32, %v3373_v17 }
 0x42b   : > { %v3388_v22 = vpop.xlane.xlu1 %3387 }
 0x42c   : > { %5256 = vpow2.f32 %v3400_v47  ;;  %v3402_v27 = vmul.f32 1.442695, %v3393_v26  ;;  %v3398_v63 = vsub.f32 %v7146_v42, %v3388_v22  ;;  %v7151_v47 = vmax.f32 %v6757_v44, 0.0 }
 0x42d   : > { %v3391_v33 = vpop.xlane.xlu0 %3390  ;;  %v7152_v42 = vmax.f32 %v6753_v62, 0.0 }
 0x42e   : > { %5258 = vpow2.f32 %v3402_v27  ;;  %v3412_v40 = vmul.f32 1.442695, %v3398_v63  ;;  %v3399_v24 = vsub.f32 %v7147_v39, %v3391_v33  ;;  %v7153_v39 = vmax.f32 %v6760_v46, 0.0 }
 0x42f   : > { %v3382_v2 = vpop.xlane.xlu1 %3381 }
 0x430   : > { %5260 = vpow2.f32 %v3412_v40  ;;  %v3414_v20 = vmul.f32 1.442695, %v3399_v24  ;;  %v3396_v53 = vsub.f32 %v7148_v25, %v3382_v2 }
 0x431   : > { %v3385_v18 = vpop.xlane.xlu0 %3384 }
 0x432   : > { %v6915_v32 = vpop.eup %5252  ;;  %5262 = vpow2.f32 %v3414_v20  ;;  %v3408_v13 = vmul.f32 1.442695, %v3396_v53  ;;  %v3397_v8 = vsub.f32 %v7149_v6, %v3385_v18  ;;  %v7154_v20 = vmax.f32 %v6778_v45, 0.0 }
 0x433   : > { %v3422_v19 = vsel %vm3028_vm1, %v6915_v32, 0.0  ;;  %v7155_v18 = vmax.f32 %v6788_v16, 0.0  ;;  %v7157_v45 = vmax.f32 %v6785_v41, 0.0 }
 0x434   : > { %v6921_v55 = vpop.eup %5254  ;;  %5264 = vpow2.f32 %v3408_v13  ;;  %v3410_v37 = vmul.f32 1.442695, %v3397_v8  ;;  %3423 = vadd.xlane.f32.xlu1 %v3422_v19  ;;  %v7156_v8 = vmax.f32 %v6775_v10, 0.0 }
 0x435   : > { %v3425_v51 = vsel %vm3028_vm1, %v6921_v55, 0.0 }
 0x436   : > { %v6925_v5 = vpop.eup %5256  ;;  %5266 = vpow2.f32 %v3410_v37  ;;  %3426 = vadd.xlane.f32.xlu0 %v3425_v51 }
 0x437   : > { %v3416_v14 = vsel %vm3028_vm1, %v6925_v5, 0.0 }
 0x438   : > { %v6929_v12 = vpop.eup %5258  ;;  %3417 = vadd.xlane.f32.xlu1 %v3416_v14 }
 0x439   : > { %v3419_v7 = vsel %vm3028_vm1, %v6929_v12, 0.0 }
 0x43a   : > { %v6933_v36 = vpop.eup %5260  ;;  %3420 = vadd.xlane.f32.xlu0 %v3419_v7 }
 0x43b   : > { %v3434_v4 = vsel %vm3028_vm1, %v6933_v36, 0.0 }
 0x43c   : > { %v6937_v48 = vpop.eup %5262  ;;  %3435 = vadd.xlane.f32.xlu1 %v3434_v4 }
 0x43d   : > { %v3437_v31 = vsel %vm3028_vm1, %v6937_v48, 0.0 }
 0x43e   : > { %v6941_v11 = vpop.eup %5264  ;;  %3438 = vadd.xlane.f32.xlu0 %v3437_v31 }
 0x43f   : > { %v3428_v1 = vsel %vm3028_vm1, %v6941_v11, 0.0 }
 0x440   : > { %v6945_v0 = vpop.eup %5266  ;;  %3429 = vadd.xlane.f32.xlu1 %v3428_v1 }
 0x441   : > { %v3431_v59 = vsel %vm3028_vm1, %v6945_v0, 0.0 }
 0x442   : > { %3432 = vadd.xlane.f32.xlu0 %v3431_v59 }
 0x443   : > { %v3546_v29 = vpop.xlane.xlu1 %3545 }
 0x444   : > { %v3564_v57 = vsub.f32 %v7150_v56, %v3546_v29 }
 0x445   : > { %v3549_v50 = vpop.xlane.xlu0 %3548 }
 0x446   : > { %v3574_v17 = vmul.f32 1.442695, %v3564_v57  ;;  %v3565_v26 = vsub.f32 %v7151_v47, %v3549_v50 }
 0x447   : > { %v3540_v22 = vpop.xlane.xlu1 %3539 }
 0x448   : > { %5268 = vpow2.f32 %v3574_v17  ;;  %v3576_v27 = vmul.f32 1.442695, %v3565_v26  ;;  %v3562_v63 = vsub.f32 %v7152_v42, %v3540_v22 }
 0x449   : > { %v3543_v33 = vpop.xlane.xlu0 %3542 }
 0x44a   : > { %5270 = vpow2.f32 %v3576_v27  ;;  %v3570_v40 = vmul.f32 1.442695, %v3562_v63  ;;  %v3563_v24 = vsub.f32 %v7153_v39, %v3543_v33 }
 0x44c   : > { %5272 = vpow2.f32 %v3570_v40  ;;  %v3572_v60 = vmul.f32 1.442695, %v3563_v24  ;;  %v3552_v2 = vpop.xlane.xlu1 %3551 }
 0x44d   : > { %v3566_v25 = vsub.f32 %v7154_v20, %v3552_v2 }
 0x44e   : > { %5274 = vpow2.f32 %v3572_v60  ;;  %v3555_v44 = vpop.xlane.xlu0 %3554 }
 0x44f   : > { %v3578_v53 = vmul.f32 1.442695, %v3566_v25  ;;  %v3567_v13 = vsub.f32 %v7155_v18, %v3555_v44 }
 0x450   : > { %v3558_v62 = vpop.xlane.xlu1 %3557 }
 0x451   : > { %5276 = vpow2.f32 %v3578_v53  ;;  %v3580_v6 = vmul.f32 1.442695, %v3567_v13  ;;  %v3568_v19 = vsub.f32 %v7156_v8, %v3558_v62 }
 0x452   : > { %v6963_v46 = vpop.eup %5268  ;;  %v3561_v37 = vpop.xlane.xlu0 %3560 }
 0x453   : > { %5278 = vpow2.f32 %v3580_v6  ;;  %v3582_v51 = vmul.f32 1.442695, %v3568_v19  ;;  %v3569_v14 = vsub.f32 %v7157_v45, %v3561_v37  ;;  %v3592_v7 = vsel %vm3028_vm1, %v6963_v46, 0.0 }
 0x454   : > { %v6969_v4 = vpop.eup %5270  ;;  %3593 = vadd.xlane.f32.xlu1 %v3592_v7 }
 0x455   : > { %5280 = vpow2.f32 %v3582_v51  ;;  %v3584_v16 = vmul.f32 1.442695, %v3569_v14  ;;  %v3595_v10 = vsel %vm3028_vm1, %v6969_v4, 0.0 }
 0x456   : > { %v6973_v31 = vpop.eup %5272  ;;  %3596 = vadd.xlane.f32.xlu0 %v3595_v10 }
 0x457   : > { %5282 = vpow2.f32 %v3584_v16  ;;  %v3586_v1 = vsel %vm3028_vm1, %v6973_v31, 0.0 }
 0x458   : > { %v6977_v41 = vpop.eup %5274  ;;  %3587 = vadd.xlane.f32.xlu1 %v3586_v1 }
 0x459   : > { %v3589_v59 = vsel %vm3028_vm1, %v6977_v41, 0.0 }
 0x45a   : > { %3590 = vadd.xlane.f32.xlu0 %v3589_v59 }
 0x45b   : > { %v6981_v29 = vpop.eup %5276 }
 0x45c   : > { %v3598_v56 = vsel %vm3028_vm1, %v6981_v29, 0.0 }
 0x45d   : > { %v6985_v57 = vpop.eup %5278  ;;  %3599 = vadd.xlane.f32.xlu1 %v3598_v56 }
 0x45e   : > { %v3601_v50 = vsel %vm3028_vm1, %v6985_v57, 0.0 }
 0x45f   : > { %v6989_v17 = vpop.eup %5280  ;;  %3602 = vadd.xlane.f32.xlu0 %v3601_v50 }
 0x460   : > { %v3604_v47 = vsel %vm3028_vm1, %v6989_v17, 0.0 }
 0x461   : > { %v6993_v26 = vpop.eup %5282  ;;  %3605 = vadd.xlane.f32.xlu1 %v3604_v47 }
 0x462   : > { %v3607_v22 = vsel %vm3028_vm1, %v6993_v26, 0.0 }
 0x463   : > { %3608 = vadd.xlane.f32.xlu0 %v3607_v22 }
 0x482   : > { %v3085_v27 = vpop.xlane.xlu1 %3084 }
 0x483   : > { %5284 = vrcp.f32 %v3085_v27 }
 0x486   : > { %v3079_v42 = vpop.xlane.xlu1 %3078 }
 0x487   : > { %5286 = vrcp.f32 %v3079_v42 }
 0x48a   : > { %v3097_v63 = vpop.xlane.xlu1 %3096 }
 0x48b   : > { %5288 = vrcp.f32 %v3097_v63  ;;  %v3088_v33 = vpop.xlane.xlu0 %3087 }
 0x48c   : > { %5290 = vrcp.f32 %v3088_v33 }
 0x48d   : > { %v5285_v40 = vpop.eup %5284 }
 0x48e   : > { %v3111_v39 = vmul.f32 %v5285_v40, %v6819_v58  ;;  %v3091_v24 = vpop.xlane.xlu1 %3090 }
 0x48f   : > { %5292 = vrcp.f32 %v3091_v24  ;;  %v3082_v60 = vpop.xlane.xlu0 %3081 }
 0x490   : > { %3119 = vst.msk [vmem:[%s7002_s10 + $0x10] sm:$0xff] %vm3028_vm1, %v3111_v39  ;;  %5294 = vrcp.f32 %v3082_v60 }
 0x491   : > { %v5287_v2 = vpop.eup %5286 }
 0x492   : > { %v3109_v20 = vmul.f32 %v5287_v2, %v6825_v49 }
 0x493   : > { %v3100_v25 = vpop.xlane.xlu0 %3099 }
 0x494   : > { %3117 = vst.msk [vmem:[%s7002_s10] sm:$0xff] %vm3028_vm1, %v3109_v20  ;;  %5296 = vrcp.f32 %v3100_v25 }
 0x495   : > { %v5289_v44 = vpop.eup %5288 }
 0x496   : > { %v5291_v58 = vpop.eup %5290  ;;  %v3115_v53 = vmul.f32 %v5289_v44, %v6829_v43 }
 0x497   : > { %v3112_v18 = vmul.f32 %v5291_v58, %v6831_v52  ;;  %v3094_v13 = vpop.xlane.xlu0 %3093 }
 0x498   : > { %3123 = vst.msk [vmem:[%s7002_s10 + $0x30] sm:$0xff] %vm3028_vm1, %v3115_v53  ;;  %5298 = vrcp.f32 %v3094_v13 }
 0x499   : > { %v5293_v62 = vpop.eup %5292  ;;  %3120 = vst.msk [vmem:[%s7002_s10 + $0x18] sm:$0xff] %vm3028_vm1, %v3112_v18 }
 0x49a   : > { %v5295_v49 = vpop.eup %5294  ;;  %v3113_v6 = vmul.f32 %v5293_v62, %v6839_v35 }
 0x49b   : > { %v3110_v8 = vmul.f32 %v5295_v49, %v6837_v21 }
 0x49c   : > { %3121 = vst.msk [vmem:[%s7002_s10 + $0x20] sm:$0xff] %vm3028_vm1, %v3113_v6 }
 0x49d   : > { %3118 = vst.msk [vmem:[%s7002_s10 + $0x8] sm:$0xff] %vm3028_vm1, %v3110_v8 }
 0x49e   : > { %v5297_v43 = vpop.eup %5296 }
 0x49f   : > { %v3116_v52 = vmul.f32 %v5297_v43, %v6845_v38 }
 0x4a1   : > { %3124 = vst.msk [vmem:[%s7002_s10 + $0x38] sm:$0xff] %vm3028_vm1, %v3116_v52 }
 0x4a2   : > { %v5299_v19 = vpop.eup %5298  ;;  %v3254_v37 = vpop.xlane.xlu1 %3253 }
 0x4a3   : > { %v3114_v51 = vmul.f32 %v5299_v19, %v6851_v61  ;;  %5300 = vrcp.f32 %v3254_v37 }
 0x4a4   : > { %v3257_v45 = vpop.xlane.xlu0 %3256 }
 0x4a5   : > { %3122 = vst.msk [vmem:[%s7002_s10 + $0x28] sm:$0xff] %vm3028_vm1, %v3114_v51  ;;  %5302 = vrcp.f32 %v3257_v45 }
 0x4a6   : > { %v3248_v21 = vpop.xlane.xlu1 %3247 }
 0x4a7   : > { %5304 = vrcp.f32 %v3248_v21 }
 0x4a8   : > { %v3251_v35 = vpop.xlane.xlu0 %3250 }
 0x4a9   : > { %5306 = vrcp.f32 %v3251_v35 }
 0x4aa   : > { %v3266_v14 = vpop.xlane.xlu1 %3265 }
 0x4ab   : > { %5308 = vrcp.f32 %v3266_v14 }
 0x4ac   : > { %v3269_v38 = vpop.xlane.xlu0 %3268 }
 0x4ad   : > { %v5301_v7 = vpop.eup %5300  ;;  %5310 = vrcp.f32 %v3269_v38 }
 0x4ae   : > { %v3280_v61 = vmul.f32 %v5301_v7, %v6867_v3  ;;  %v3260_v16 = vpop.xlane.xlu1 %3259 }
 0x4af   : > { %v5303_v10 = vpop.eup %5302  ;;  %5312 = vrcp.f32 %v3260_v16 }
 0x4b0   : > { %3993 = vst.msk [vmem:[%s7002_s10 + $0x50] sm:$0xff] %vm3028_vm1, %v3280_v61  ;;  %v3281_v1 = vmul.f32 %v5303_v10, %v6873_v28  ;;  %v3263_v59 = vpop.xlane.xlu0 %3262 }
 0x4b1   : > { %v5305_v56 = vpop.eup %5304  ;;  %5314 = vrcp.f32 %v3263_v59 }
 0x4b2   : > { %3994 = vst.msk [vmem:[%s7002_s10 + $0x58] sm:$0xff] %vm3028_vm1, %v3281_v1  ;;  %v3278_v50 = vmul.f32 %v5305_v56, %v6877_v34 }
 0x4b3   : > { %v5307_v47 = vpop.eup %5306 }
 0x4b4   : > { %3991 = vst.msk [vmem:[%s7002_s10 + $0x40] sm:$0xff] %vm3028_vm1, %v3278_v50  ;;  %v3279_v3 = vmul.f32 %v5307_v47, %v6881_v23 }
 0x4b5   : > { %v5309_v22 = vpop.eup %5308 }
 0x4b6   : > { %3992 = vst.msk [vmem:[%s7002_s10 + $0x48] sm:$0xff] %vm3028_vm1, %v3279_v3  ;;  %v3284_v28 = vmul.f32 %v5309_v22, %v6885_v15 }
 0x4b7   : > { %v5311_v27 = vpop.eup %5310 }
 0x4b8   : > { %3997 = vst.msk [vmem:[%s7002_s10 + $0x70] sm:$0xff] %vm3028_vm1, %v3284_v28  ;;  %v3285_v42 = vmul.f32 %v5311_v27, %v6889_v54 }
 0x4b9   : > { %v5313_v63 = vpop.eup %5312 }
 0x4ba   : > { %3998 = vst.msk [vmem:[%s7002_s10 + $0x78] sm:$0xff] %vm3028_vm1, %v3285_v42  ;;  %v3282_v34 = vmul.f32 %v5313_v63, %v6893_v9 }
 0x4bb   : > { %v5315_v33 = vpop.eup %5314 }
 0x4bc   : > { %3995 = vst.msk [vmem:[%s7002_s10 + $0x60] sm:$0xff] %vm3028_vm1, %v3282_v34  ;;  %v3283_v23 = vmul.f32 %v5315_v33, %v6897_v30 }
 0x4be   : > { %3996 = vst.msk [vmem:[%s7002_s10 + $0x68] sm:$0xff] %vm3028_vm1, %v3283_v23 }
 0x4c1   : > { %v3424_v40 = vpop.xlane.xlu1 %3423 }
 0x4c2   : > { %5316 = vrcp.f32 %v3424_v40 }
 0x4c3   : > { %v3427_v15 = vpop.xlane.xlu0 %3426 }
 0x4c4   : > { %5318 = vrcp.f32 %v3427_v15 }
 0x4c5   : > { %v3418_v39 = vpop.xlane.xlu1 %3417 }
 0x4c6   : > { %5320 = vrcp.f32 %v3418_v39 }
 0x4c7   : > { %v3421_v54 = vpop.xlane.xlu0 %3420 }
 0x4c8   : > { %5322 = vrcp.f32 %v3421_v54 }
 0x4c9   : > { %v3436_v24 = vpop.xlane.xlu1 %3435 }
 0x4ca   : > { %5324 = vrcp.f32 %v3436_v24 }
 0x4cb   : > { %v3439_v9 = vpop.xlane.xlu0 %3438 }
 0x4cc   : > { %v5317_v60 = vpop.eup %5316  ;;  %5326 = vrcp.f32 %v3439_v9 }
 0x4cd   : > { %v3450_v30 = vmul.f32 %v5317_v60, %v6915_v32  ;;  %v3430_v2 = vpop.xlane.xlu1 %3429 }
 0x4ce   : > { %v5319_v20 = vpop.eup %5318  ;;  %5328 = vrcp.f32 %v3430_v2 }
 0x4cf   : > { %4005 = vst.msk [vmem:[%s7002_s10 + $0x90] sm:$0xff] %vm3028_vm1, %v3450_v30  ;;  %v3451_v25 = vmul.f32 %v5319_v20, %v6921_v55  ;;  %v3433_v44 = vpop.xlane.xlu0 %3432 }
 0x4d0   : > { %v5321_v58 = vpop.eup %5320  ;;  %5330 = vrcp.f32 %v3433_v44 }
 0x4d1   : > { %4006 = vst.msk [vmem:[%s7002_s10 + $0x98] sm:$0xff] %vm3028_vm1, %v3451_v25  ;;  %v3448_v53 = vmul.f32 %v5321_v58, %v6925_v5 }
 0x4d2   : > { %v5323_v18 = vpop.eup %5322 }
 0x4d3   : > { %4003 = vst.msk [vmem:[%s7002_s10 + $0x80] sm:$0xff] %vm3028_vm1, %v3448_v53  ;;  %v3449_v32 = vmul.f32 %v5323_v18, %v6929_v12 }
 0x4d4   : > { %v5325_v13 = vpop.eup %5324 }
 0x4d5   : > { %4004 = vst.msk [vmem:[%s7002_s10 + $0x88] sm:$0xff] %vm3028_vm1, %v3449_v32  ;;  %v3454_v55 = vmul.f32 %v5325_v13, %v6933_v36 }
 0x4d6   : > { %v5327_v62 = vpop.eup %5326 }
 0x4d7   : > { %4009 = vst.msk [vmem:[%s7002_s10 + $0xb0] sm:$0xff] %vm3028_vm1, %v3454_v55  ;;  %v3455_v49 = vmul.f32 %v5327_v62, %v6937_v48 }
 0x4d8   : > { %v5329_v6 = vpop.eup %5328 }
 0x4d9   : > { %4010 = vst.msk [vmem:[%s7002_s10 + $0xb8] sm:$0xff] %vm3028_vm1, %v3455_v49  ;;  %v3452_v5 = vmul.f32 %v5329_v6, %v6941_v11 }
 0x4da   : > { %v5331_v8 = vpop.eup %5330 }
 0x4db   : > { %4007 = vst.msk [vmem:[%s7002_s10 + $0xa0] sm:$0xff] %vm3028_vm1, %v3452_v5  ;;  %v3453_v12 = vmul.f32 %v5331_v8, %v6945_v0 }
 0x4dd   : > { %4008 = vst.msk [vmem:[%s7002_s10 + $0xa8] sm:$0xff] %vm3028_vm1, %v3453_v12 }
 0x4e1   : > { %v3594_v43 = vpop.xlane.xlu1 %3593 }
 0x4e2   : > { %5332 = vrcp.f32 %v3594_v43 }
 0x4e3   : > { %v3597_v36 = vpop.xlane.xlu0 %3596 }
 0x4e4   : > { %5334 = vrcp.f32 %v3597_v36 }
 0x4e5   : > { %v3588_v52 = vpop.xlane.xlu1 %3587 }
 0x4e6   : > { %5336 = vrcp.f32 %v3588_v52 }
 0x4e7   : > { %v3591_v48 = vpop.xlane.xlu0 %3590 }
 0x4e8   : > { %5338 = vrcp.f32 %v3591_v48 }
 0x4ea   : > { %v3600_v19 = vpop.xlane.xlu1 %3599 }
 0x4eb   : > { %5340 = vrcp.f32 %v3600_v19 }
 0x4ec   : > { %v5333_v11 = vpop.eup %5332  ;;  %v3603_v37 = vpop.xlane.xlu0 %3602 }
 0x4ed   : > { %v3620_v51 = vmul.f32 %v5333_v11, %v6963_v46  ;;  %5342 = vrcp.f32 %v3603_v37 }
 0x4ee   : > { %v5335_v0 = vpop.eup %5334  ;;  %v3606_v45 = vpop.xlane.xlu1 %3605 }
 0x4ef   : > { %4017 = vst.msk [vmem:[%s7002_s10 + $0xd0] sm:$0xff] %vm3028_vm1, %v3620_v51  ;;  %v3621_v21 = vmul.f32 %v5335_v0, %v6969_v4  ;;  %5344 = vrcp.f32 %v3606_v45 }
 0x4f0   : > { %v5337_v35 = vpop.eup %5336  ;;  %v3609_v14 = vpop.xlane.xlu0 %3608 }
 0x4f1   : > { %4018 = vst.msk [vmem:[%s7002_s10 + $0xd8] sm:$0xff] %vm3028_vm1, %v3621_v21  ;;  %v3618_v38 = vmul.f32 %v5337_v35, %v6973_v31  ;;  %5346 = vrcp.f32 %v3609_v14 }
 0x4f2   : > { %v5339_v46 = vpop.eup %5338 }
 0x4f3   : > { %4015 = vst.msk [vmem:[%s7002_s10 + $0xc0] sm:$0xff] %vm3028_vm1, %v3618_v38  ;;  %v3619_v7 = vmul.f32 %v5339_v46, %v6977_v41 }
 0x4f5   : > { %v5341_v61 = vpop.eup %5340  ;;  %4016 = vst.msk [vmem:[%s7002_s10 + $0xc8] sm:$0xff] %vm3028_vm1, %v3619_v7 }
 0x4f6   : > { %v3622_v4 = vmul.f32 %v5341_v61, %v6981_v29 }
 0x4f7   : > { %v5343_v16 = vpop.eup %5342 }
 0x4f8   : > { %4019 = vst.msk [vmem:[%s7002_s10 + $0xe0] sm:$0xff] %vm3028_vm1, %v3622_v4  ;;  %v3623_v10 = vmul.f32 %v5343_v16, %v6985_v57 }
 0x4f9   : > { %v5345_v1 = vpop.eup %5344 }
 0x4fa   : > { %4020 = vst.msk [vmem:[%s7002_s10 + $0xe8] sm:$0xff] %vm3028_vm1, %v3623_v10  ;;  %v3624_v31 = vmul.f32 %v5345_v1, %v6989_v17 }
 0x4fb   : > { %v5347_v59 = vpop.eup %5346 }
 0x4fc   : > { %4021 = vst.msk [vmem:[%s7002_s10 + $0xf0] sm:$0xff] %vm3028_vm1, %v3624_v31  ;;  %v3625_v41 = vmul.f32 %v5347_v59, %v6993_v26 }
 0x4fe   : > { %4022 = vst.msk [vmem:[%s7002_s10 + $0xf8] sm:$0xff] %vm3028_vm1, %v3625_v41 }
 0x4ff PF: > { %p16_p3 = scmp.ge.s32.totalorder %s5533_s23, 4   ;;  %s7158_s18 = smov %s5465_s19 }
 0x500   : > { %s7159_s19 = smov %s5469_s20  ;;  %s7160_s20 = smov %s5543_s26 }
 0x501   : > { %s7161_s21 = smov %s5533_s23  ;;  %18 = sbr.rel (!%p16_p3) target bundleno = 4 (0x4), region = 91 }
 0x508   :  { %3659 = vsyncpa [#allocation3], 1 }
 0x509   :  { %3661 = vsyncpa [#allocation3 + $0x1], 1 }
 0x50a   :  { %3662 = vsyncpa [#allocation5], 1 }

</bundles_post_ra>
